<compile_context>
chip_gen: v7x
topology: tpu7x:2x2x1
jax: 0.10.0
libtpu: 0.0.40
codegen_flags: <defaults>
</compile_context>

<pallas_src>
import functools

import jax
import jax.numpy as jnp
from jax.experimental import pallas as pl
from jax.experimental.pallas import tpu as pltpu


_INV_SQRT2 = 0.7071067811865476


def _erf(x):
    # Abramowitz & Stegun 7.1.26 polynomial, |abs error| < 1.5e-7.
    # Written with plain exp/abs/where so it lowers on Mosaic without relying
    # on an erf primitive.
    a1, a2, a3, a4, a5 = (0.254829592, -0.284496736, 1.421413741,
                          -1.453152027, 1.061405429)
    pp = 0.3275911
    sign = jnp.where(x < 0.0, -1.0, 1.0).astype(x.dtype)
    ax = jnp.abs(x)
    t = 1.0 / (1.0 + pp * ax)
    poly = ((((a5 * t + a4) * t + a3) * t + a2) * t + a1) * t
    return sign * (1.0 - poly * jnp.exp(-ax * ax))


def _gelu(x):
    # Exact (erf-based) GELU, matching torch.nn.GELU().
    return 0.5 * x * (1.0 + _erf(x * _INV_SQRT2))


def _softplus(x):
    # Numerically-safe softplus, matching torch.nn.Softplus().
    return jnp.maximum(x, 0.0) + jnp.log(1.0 + jnp.exp(-jnp.abs(x)))


def _clb_kernel(x_ref, cond_ref, binom_ref, kidx_ref,
                w1_ref, b1_ref, w2_ref, b2_ref, out_ref, *,
                cin, ccond, hidden, p_eps, max_temp, min_temp):
    """One (batch, pixel-tile) step: 1x1-conv MLP -> (p, t) -> log-binomial softmax."""
    f32 = jnp.float32
    nch = cin + ccond

    # Channel rows, each (1, tp), lane-dense.
    chans = [x_ref[c:c + 1, :].astype(f32) for c in range(cin)]
    chans += [cond_ref[c:c + 1, :].astype(f32) for c in range(ccond)]

    # --- 1x1 conv #1 + exact GELU (scalar-weight VPU FMAs; MXU pointless at C=8) ---
    hid = []
    for j in range(hidden):
        acc = chans[0] * w1_ref[j, 0]
        for c in range(1, nch):
            acc = acc + chans[c] * w1_ref[j, c]
        hid.append(_gelu(acc + b1_ref[0, j]))

    # --- 1x1 conv #2 + Softplus: 4 heads (p0, p1, t0, t1) ---
    heads = []
    for o in range(4):
        acc = hid[0] * w2_ref[o, 0]
        for j in range(1, hidden):
            acc = acc + hid[j] * w2_ref[o, j]
        heads.append(_softplus(acc + b2_ref[0, o]))

    p0 = heads[0] + p_eps
    p1 = heads[1] + p_eps
    t0 = heads[2] + p_eps
    t1 = heads[3] + p_eps
    p = p0 / (p0 + p1)                                  # (1, tp)
    tr = t0 / (t0 + t1)
    temp = (max_temp - min_temp) * tr + min_temp        # (1, tp)

    eps = 1e-4
    omp = jnp.clip(1.0 - p, eps, 1.0)   # clamp(1 - p) uses the un-clipped p (matches ref)
    pc = jnp.clip(p, eps, 1.0)
    logit = jnp.log(pc) - jnp.log(omp)                  # (1, tp)
    inv_t = 1.0 / temp                                  # (1, tp); exact (t can be tiny)

    # --- log-binomial logits + softmax over the class (sublane) axis ---
    # The k-independent (K-1)*log(1-p)/t term is dropped; it cancels in softmax.
    z = (binom_ref[...] + kidx_ref[...] * logit) * inv_t   # (K, tp)
    z = z - jnp.max(z, axis=0, keepdims=True)
    ez = jnp.exp(z)
    den = jnp.sum(ez, axis=0, keepdims=True)                 # (1, tp)
    # EUP approximate reciprocal + one Newton-Raphson refinement (cheap, (1,tp)).
    inv_den = pl.reciprocal(den, approx=True)
    inv_den = inv_den * (2.0 - den * inv_den)
    out_ref[...] = (ez * inv_den).astype(out_ref.dtype)


def _pick_pixel_tile(hw, target):
    """Largest multiple of 128 that divides hw and is <= target (or hw itself)."""
    if hw <= target:
        return hw
    best = 0
    t = 128
    while t <= target:
        if hw % t == 0:
            best = t
        t += 128
    return best if best > 0 else hw


def conditional_log_binomial(x, cond, params, *, n_classes=256, p_eps=1e-4,
                             max_temp=50.0, min_temp=1e-7, pixel_tile=8192):
    """x: (N, Cin, H, W), cond: (N, Ccond, H, W) -> probabilities (N, n_classes, H, W)."""
    N, cin, H, W = x.shape
    Nc, ccond, Hc, Wc = cond.shape
    assert (N, H, W) == (Nc, Hc, Wc)
    w1, b1, w2, b2 = params
    hidden = w1.shape[0]
    assert w1.shape == (hidden, cin + ccond)
    assert w2.shape == (4, hidden)

    hw = H * W
    tp = _pick_pixel_tile(hw, pixel_tile)
    grid = (N, hw // tp)

    # Pure reshapes -- channels stay on sublane, pixels stay lane-dense.
    x2 = x.reshape(N, cin, hw)
    c2 = cond.reshape(N, ccond, hw)

    # Grid-invariant per-class tables, hoisted out of the kernel.
    e = jnp.float32(1e-7)
    k = jnp.arange(n_classes, dtype=jnp.float32)
    n = jnp.float32(n_classes - 1)
    log_binom = ((n + e) * jnp.log(n + e)
                 - (k + e) * jnp.log(k + e)
                 - (n - k) * jnp.log(n - k + e))
    binom_col = log_binom.reshape(n_classes, 1)
    kidx_col = k.reshape(n_classes, 1)

    kernel = functools.partial(
        _clb_kernel, cin=cin, ccond=ccond, hidden=hidden,
        p_eps=float(p_eps), max_temp=float(max_temp), min_temp=float(min_temp))

    smem_specs = [pl.BlockSpec(memory_space=pltpu.MemorySpace.SMEM)
                  for _ in range(4)]

    out = pl.pallas_call(
        kernel,
        out_shape=jax.ShapeDtypeStruct((N, n_classes, hw), jnp.float32),
        grid=grid,
        in_specs=[
            pl.BlockSpec((None, cin, tp), lambda nb, i: (nb, 0, i)),
            pl.BlockSpec((None, ccond, tp), lambda nb, i: (nb, 0, i)),
            pl.BlockSpec((n_classes, 1), lambda nb, i: (0, 0)),   # log-binom table (resident)
            pl.BlockSpec((n_classes, 1), lambda nb, i: (0, 0)),   # k-index table (resident)
            *smem_specs,                                           # w1, b1, w2, b2 in SMEM
        ],
        out_specs=pl.BlockSpec((None, n_classes, tp), lambda nb, i: (nb, 0, i)),
        compiler_params=pltpu.CompilerParams(
            dimension_semantics=("parallel", "parallel"),
            vmem_limit_bytes=32 * 1024 * 1024),
    )(x2, c2, binom_col, kidx_col,
      w1, b1.reshape(1, -1), w2, b2.reshape(1, -1))

    # Pure reshape -- no transpose needed (class axis is already axis 1).
    return out.reshape(N, n_classes, H, W)


def init_params(key, in_features, condition_dim, bottleneck_factor=2):
    """Deterministic synthetic weights in the Conv2d(1x1) (out, in) orientation."""
    C = in_features + condition_dim
    B = C // bottleneck_factor
    k1, k2, k3, k4 = jax.random.split(key, 4)
    w1 = jax.random.normal(k1, (B, C), jnp.float32) * 0.3
    b1 = jax.random.normal(k2, (B,), jnp.float32) * 0.1
    w2 = jax.random.normal(k3, (4, B), jnp.float32) * 0.3
    b2 = jax.random.normal(k4, (4,), jnp.float32) * 0.1
    return (w1, b1, w2, b2)


def _reference(x, cond, params, *, n_classes=256, p_eps=1e-4,
               max_temp=50.0, min_temp=1e-7):
    """Pure-JAX port of the PyTorch ConditionalLogBinomial forward."""
    w1, b1, w2, b2 = params
    xc = jnp.concatenate([x, cond], axis=1).astype(jnp.float32)   # (N, C, H, W)
    h = jnp.einsum('oc,nchw->nohw', w1, xc) + b1[None, :, None, None]
    h = 0.5 * h * (1.0 + jax.scipy.special.erf(h / jnp.sqrt(2.0)))
    pt = jnp.einsum('oj,njhw->nohw', w2, h) + b2[None, :, None, None]
    pt = jax.nn.softplus(pt)
    p = pt[:, :2] + p_eps
    p = p[:, 0] / (p[:, 0] + p[:, 1])                             # (N, H, W)
    t = pt[:, 2:] + p_eps
    t = t[:, 0] / (t[:, 0] + t[:, 1])                             # (N, H, W)
    t = (max_temp - min_temp) * t + min_temp
    t = t[:, None]                                                # (N, 1, H, W)
    p = p[:, None]                                                # (N, 1, H, W)
    eps = 1e-4
    omp = jnp.clip(1.0 - p, eps, 1.0)
    p = jnp.clip(p, eps, 1.0)
    k = jnp.arange(n_classes, dtype=jnp.float32)[None, :, None, None]
    e = 1e-7
    n = jnp.float32(n_classes - 1)
    lb = ((n + e) * jnp.log(n + e)
          - (k + e) * jnp.log(k + e)
          - (n - k) * jnp.log(n - k + e))
    y = lb + k * jnp.log(p) + (n_classes - 1 - k) * jnp.log(omp)
    y = y / t
    return jax.nn.softmax(y, axis=1)


if __name__ == "__main__":
    key = jax.random.PRNGKey(0)
    kx, kc, kp = jax.random.split(key, 3)

    N, Cin, Ccond, H, W = 2, 4, 4, 16, 16
    n_classes = 256

    x = jax.random.normal(kx, (N, Cin, H, W), jnp.float32)
    cond = jax.random.normal(kc, (N, Ccond, H, W), jnp.float32)
    params = init_params(kp, Cin, Ccond)

    out = conditional_log_binomial(x, cond, params, n_classes=n_classes)
    out = jax.block_until_ready(out)

    assert out.shape == (N, n_classes, H, W)
    assert bool(jnp.all(jnp.isfinite(out))), "non-finite values in kernel output"
    assert bool(jnp.all(out >= 0.0)), "negative probabilities in kernel output"

    sums = jnp.sum(out, axis=1)
    max_sum_err = float(jnp.max(jnp.abs(sums - 1.0)))
    assert max_sum_err < 5e-3, f"softmax sums off by {max_sum_err}"

    ref = _reference(x, cond, params, n_classes=n_classes)
    max_diff = float(jnp.max(jnp.abs(out - ref)))
    assert max_diff < 5e-2, f"kernel vs reference max abs diff {max_diff}"

    print("KERNEL_OK")
</pallas_src>

<mosaic_0001>
module attributes {stable_mosaic.version = 11 : i64} {
  func.func @_clb_kernel(%arg0: i32, %arg1: i32, %arg2: memref<1x4x256xf32, #tpu.memory_space<vmem>>, %arg3: memref<1x4x256xf32, #tpu.memory_space<vmem>>, %arg4: memref<256x1xf32, #tpu.memory_space<vmem>>, %arg5: memref<256x1xf32, #tpu.memory_space<vmem>>, %arg6: memref<4x8xf32, #tpu.memory_space<smem>>, %arg7: memref<1x4xf32, #tpu.memory_space<smem>>, %arg8: memref<4x4xf32, #tpu.memory_space<smem>>, %arg9: memref<1x4xf32, #tpu.memory_space<smem>>, %arg10: memref<1x256x256xf32, #tpu.memory_space<vmem>>) attributes {dimension_semantics = [#tpu.dimension_semantics<parallel>, #tpu.dimension_semantics<parallel>], iteration_bounds = array<i64: 2, 1>, scalar_prefetch = 0 : i64, scratch_operands = 0 : i64, tpu.core_type = #tpu.core_type<tc>, window_params = [{transform_indices = @transform_0, window_bounds = array<i64: 1, 4, 256>}, {transform_indices = @transform_1, window_bounds = array<i64: 1, 4, 256>}, {pipeline_mode = #tpu.pipeline_mode<synchronous>, transform_indices = @transform_2, window_bounds = array<i64: 256, 1>}, {pipeline_mode = #tpu.pipeline_mode<synchronous>, transform_indices = @transform_3, window_bounds = array<i64: 256, 1>}, {transform_indices = @transform_4, window_bounds = array<i64: 4, 8>}, {transform_indices = @transform_5, window_bounds = array<i64: 1, 4>}, {transform_indices = @transform_6, window_bounds = array<i64: 4, 4>}, {transform_indices = @transform_7, window_bounds = array<i64: 1, 4>}, {transform_indices = @transform_8, window_bounds = array<i64: 1, 256, 256>}]} {
    %c0 = arith.constant 0 : index
    %c0_0 = arith.constant 0 : index
    %c0_1 = arith.constant 0 : index
    %0 = vector.load %arg2[%c0, %c0_0, %c0_1] : memref<1x4x256xf32, #tpu.memory_space<vmem>>, vector<1x1x256xf32>
    %1 = vector.shape_cast %0 : vector<1x1x256xf32> to vector<1x256xf32>
    %c0_2 = arith.constant 0 : index
    %c1 = arith.constant 1 : index
    %c0_3 = arith.constant 0 : index
    %2 = vector.load %arg2[%c0_2, %c1, %c0_3] : memref<1x4x256xf32, #tpu.memory_space<vmem>>, vector<1x1x256xf32>
    %3 = vector.shape_cast %2 : vector<1x1x256xf32> to vector<1x256xf32>
    %c0_4 = arith.constant 0 : index
    %c2 = arith.constant 2 : index
    %c0_5 = arith.constant 0 : index
    %4 = vector.load %arg2[%c0_4, %c2, %c0_5] : memref<1x4x256xf32, #tpu.memory_space<vmem>>, vector<1x1x256xf32>
    %5 = vector.shape_cast %4 : vector<1x1x256xf32> to vector<1x256xf32>
    %c0_6 = arith.constant 0 : index
    %c3 = arith.constant 3 : index
    %c0_7 = arith.constant 0 : index
    %6 = vector.load %arg2[%c0_6, %c3, %c0_7] : memref<1x4x256xf32, #tpu.memory_space<vmem>>, vector<1x1x256xf32>
    %7 = vector.shape_cast %6 : vector<1x1x256xf32> to vector<1x256xf32>
    %c0_8 = arith.constant 0 : index
    %c0_9 = arith.constant 0 : index
    %c0_10 = arith.constant 0 : index
    %8 = vector.load %arg3[%c0_8, %c0_9, %c0_10] : memref<1x4x256xf32, #tpu.memory_space<vmem>>, vector<1x1x256xf32>
    %9 = vector.shape_cast %8 : vector<1x1x256xf32> to vector<1x256xf32>
    %c0_11 = arith.constant 0 : index
    %c1_12 = arith.constant 1 : index
    %c0_13 = arith.constant 0 : index
    %10 = vector.load %arg3[%c0_11, %c1_12, %c0_13] : memref<1x4x256xf32, #tpu.memory_space<vmem>>, vector<1x1x256xf32>
    %11 = vector.shape_cast %10 : vector<1x1x256xf32> to vector<1x256xf32>
    %c0_14 = arith.constant 0 : index
    %c2_15 = arith.constant 2 : index
    %c0_16 = arith.constant 0 : index
    %12 = vector.load %arg3[%c0_14, %c2_15, %c0_16] : memref<1x4x256xf32, #tpu.memory_space<vmem>>, vector<1x1x256xf32>
    %13 = vector.shape_cast %12 : vector<1x1x256xf32> to vector<1x256xf32>
    %c0_17 = arith.constant 0 : index
    %c3_18 = arith.constant 3 : index
    %c0_19 = arith.constant 0 : index
    %14 = vector.load %arg3[%c0_17, %c3_18, %c0_19] : memref<1x4x256xf32, #tpu.memory_space<vmem>>, vector<1x1x256xf32>
    %15 = vector.shape_cast %14 : vector<1x1x256xf32> to vector<1x256xf32>
    %c0_20 = arith.constant 0 : index
    %c0_21 = arith.constant 0 : index
    %16 = memref.load %arg6[%c0_20, %c0_21] : memref<4x8xf32, #tpu.memory_space<smem>>
    %17 = vector.broadcast %16 : f32 to vector<1x256xf32>
    %18 = arith.mulf %1, %17 : vector<1x256xf32>
    %c0_22 = arith.constant 0 : index
    %c1_23 = arith.constant 1 : index
    %19 = memref.load %arg6[%c0_22, %c1_23] : memref<4x8xf32, #tpu.memory_space<smem>>
    %20 = vector.broadcast %19 : f32 to vector<1x256xf32>
    %21 = arith.mulf %3, %20 : vector<1x256xf32>
    %22 = arith.addf %18, %21 : vector<1x256xf32>
    %c0_24 = arith.constant 0 : index
    %c2_25 = arith.constant 2 : index
    %23 = memref.load %arg6[%c0_24, %c2_25] : memref<4x8xf32, #tpu.memory_space<smem>>
    %24 = vector.broadcast %23 : f32 to vector<1x256xf32>
    %25 = arith.mulf %5, %24 : vector<1x256xf32>
    %26 = arith.addf %22, %25 : vector<1x256xf32>
    %c0_26 = arith.constant 0 : index
    %c3_27 = arith.constant 3 : index
    %27 = memref.load %arg6[%c0_26, %c3_27] : memref<4x8xf32, #tpu.memory_space<smem>>
    %28 = vector.broadcast %27 : f32 to vector<1x256xf32>
    %29 = arith.mulf %7, %28 : vector<1x256xf32>
    %30 = arith.addf %26, %29 : vector<1x256xf32>
    %c0_28 = arith.constant 0 : index
    %c4 = arith.constant 4 : index
    %31 = memref.load %arg6[%c0_28, %c4] : memref<4x8xf32, #tpu.memory_space<smem>>
    %32 = vector.broadcast %31 : f32 to vector<1x256xf32>
    %33 = arith.mulf %9, %32 : vector<1x256xf32>
    %34 = arith.addf %30, %33 : vector<1x256xf32>
    %c0_29 = arith.constant 0 : index
    %c5 = arith.constant 5 : index
    %35 = memref.load %arg6[%c0_29, %c5] : memref<4x8xf32, #tpu.memory_space<smem>>
    %36 = vector.broadcast %35 : f32 to vector<1x256xf32>
    %37 = arith.mulf %11, %36 : vector<1x256xf32>
    %38 = arith.addf %34, %37 : vector<1x256xf32>
    %c0_30 = arith.constant 0 : index
    %c6 = arith.constant 6 : index
    %39 = memref.load %arg6[%c0_30, %c6] : memref<4x8xf32, #tpu.memory_space<smem>>
    %40 = vector.broadcast %39 : f32 to vector<1x256xf32>
    %41 = arith.mulf %13, %40 : vector<1x256xf32>
    %42 = arith.addf %38, %41 : vector<1x256xf32>
    %c0_31 = arith.constant 0 : index
    %c7 = arith.constant 7 : index
    %43 = memref.load %arg6[%c0_31, %c7] : memref<4x8xf32, #tpu.memory_space<smem>>
    %44 = vector.broadcast %43 : f32 to vector<1x256xf32>
    %45 = arith.mulf %15, %44 : vector<1x256xf32>
    %46 = arith.addf %42, %45 : vector<1x256xf32>
    %c0_32 = arith.constant 0 : index
    %c0_33 = arith.constant 0 : index
    %47 = memref.load %arg7[%c0_32, %c0_33] : memref<1x4xf32, #tpu.memory_space<smem>>
    %48 = vector.broadcast %47 : f32 to vector<1x256xf32>
    %49 = arith.addf %46, %48 : vector<1x256xf32>
    %cst = arith.constant 5.000000e-01 : f32
    %50 = vector.broadcast %cst : f32 to vector<1x256xf32>
    %51 = arith.mulf %50, %49 : vector<1x256xf32>
    %cst_34 = arith.constant 0.707106769 : f32
    %52 = vector.broadcast %cst_34 : f32 to vector<1x256xf32>
    %53 = arith.mulf %49, %52 : vector<1x256xf32>
    %cst_35 = arith.constant 0.000000e+00 : f32
    %54 = vector.broadcast %cst_35 : f32 to vector<1x256xf32>
    %55 = arith.cmpf olt, %53, %54 : vector<1x256xf32>
    %cst_36 = arith.constant -1.000000e+00 : f32
    %cst_37 = arith.constant 1.000000e+00 : f32
    %56 = vector.broadcast %cst_36 : f32 to vector<1x256xf32>
    %57 = vector.broadcast %cst_37 : f32 to vector<1x256xf32>
    %58 = arith.select %55, %56, %57 : vector<1x256xi1>, vector<1x256xf32>
    %59 = math.absf %53 : vector<1x256xf32>
    %cst_38 = arith.constant 0.327591091 : f32
    %60 = vector.broadcast %cst_38 : f32 to vector<1x256xf32>
    %61 = arith.mulf %60, %59 : vector<1x256xf32>
    %cst_39 = arith.constant 1.000000e+00 : f32
    %62 = vector.broadcast %cst_39 : f32 to vector<1x256xf32>
    %63 = arith.addf %62, %61 : vector<1x256xf32>
    %cst_40 = arith.constant 1.000000e+00 : f32
    %64 = vector.broadcast %cst_40 : f32 to vector<1x256xf32>
    %65 = arith.divf %64, %63 : vector<1x256xf32>
    %cst_41 = arith.constant 1.06140542 : f32
    %66 = vector.broadcast %cst_41 : f32 to vector<1x256xf32>
    %67 = arith.mulf %66, %65 : vector<1x256xf32>
    %cst_42 = arith.constant -1.45315206 : f32
    %68 = vector.broadcast %cst_42 : f32 to vector<1x256xf32>
    %69 = arith.addf %67, %68 : vector<1x256xf32>
    %70 = arith.mulf %69, %65 : vector<1x256xf32>
    %cst_43 = arith.constant 1.42141378 : f32
    %71 = vector.broadcast %cst_43 : f32 to vector<1x256xf32>
    %72 = arith.addf %70, %71 : vector<1x256xf32>
    %73 = arith.mulf %72, %65 : vector<1x256xf32>
    %cst_44 = arith.constant -0.284496725 : f32
    %74 = vector.broadcast %cst_44 : f32 to vector<1x256xf32>
    %75 = arith.addf %73, %74 : vector<1x256xf32>
    %76 = arith.mulf %75, %65 : vector<1x256xf32>
    %cst_45 = arith.constant 0.254829586 : f32
    %77 = vector.broadcast %cst_45 : f32 to vector<1x256xf32>
    %78 = arith.addf %76, %77 : vector<1x256xf32>
    %79 = arith.mulf %78, %65 : vector<1x256xf32>
    %cst_46 = arith.constant 0.000000e+00 : f32
    %80 = vector.broadcast %cst_46 : f32 to vector<1x256xf32>
    %81 = arith.subf %80, %59 : vector<1x256xf32>
    %82 = arith.mulf %81, %59 : vector<1x256xf32>
    %83 = math.exp %82 : vector<1x256xf32>
    %84 = arith.mulf %79, %83 : vector<1x256xf32>
    %cst_47 = arith.constant 1.000000e+00 : f32
    %85 = vector.broadcast %cst_47 : f32 to vector<1x256xf32>
    %86 = arith.subf %85, %84 : vector<1x256xf32>
    %87 = arith.mulf %58, %86 : vector<1x256xf32>
    %cst_48 = arith.constant 1.000000e+00 : f32
    %88 = vector.broadcast %cst_48 : f32 to vector<1x256xf32>
    %89 = arith.addf %88, %87 : vector<1x256xf32>
    %90 = arith.mulf %51, %89 : vector<1x256xf32>
    %c1_49 = arith.constant 1 : index
    %c0_50 = arith.constant 0 : index
    %91 = memref.load %arg6[%c1_49, %c0_50] : memref<4x8xf32, #tpu.memory_space<smem>>
    %92 = vector.broadcast %91 : f32 to vector<1x256xf32>
    %93 = arith.mulf %1, %92 : vector<1x256xf32>
    %c1_51 = arith.constant 1 : index
    %c1_52 = arith.constant 1 : index
    %94 = memref.load %arg6[%c1_51, %c1_52] : memref<4x8xf32, #tpu.memory_space<smem>>
    %95 = vector.broadcast %94 : f32 to vector<1x256xf32>
    %96 = arith.mulf %3, %95 : vector<1x256xf32>
    %97 = arith.addf %93, %96 : vector<1x256xf32>
    %c1_53 = arith.constant 1 : index
    %c2_54 = arith.constant 2 : index
    %98 = memref.load %arg6[%c1_53, %c2_54] : memref<4x8xf32, #tpu.memory_space<smem>>
    %99 = vector.broadcast %98 : f32 to vector<1x256xf32>
    %100 = arith.mulf %5, %99 : vector<1x256xf32>
    %101 = arith.addf %97, %100 : vector<1x256xf32>
    %c1_55 = arith.constant 1 : index
    %c3_56 = arith.constant 3 : index
    %102 = memref.load %arg6[%c1_55, %c3_56] : memref<4x8xf32, #tpu.memory_space<smem>>
    %103 = vector.broadcast %102 : f32 to vector<1x256xf32>
    %104 = arith.mulf %7, %103 : vector<1x256xf32>
    %105 = arith.addf %101, %104 : vector<1x256xf32>
    %c1_57 = arith.constant 1 : index
    %c4_58 = arith.constant 4 : index
    %106 = memref.load %arg6[%c1_57, %c4_58] : memref<4x8xf32, #tpu.memory_space<smem>>
    %107 = vector.broadcast %106 : f32 to vector<1x256xf32>
    %108 = arith.mulf %9, %107 : vector<1x256xf32>
    %109 = arith.addf %105, %108 : vector<1x256xf32>
    %c1_59 = arith.constant 1 : index
    %c5_60 = arith.constant 5 : index
    %110 = memref.load %arg6[%c1_59, %c5_60] : memref<4x8xf32, #tpu.memory_space<smem>>
    %111 = vector.broadcast %110 : f32 to vector<1x256xf32>
    %112 = arith.mulf %11, %111 : vector<1x256xf32>
    %113 = arith.addf %109, %112 : vector<1x256xf32>
    %c1_61 = arith.constant 1 : index
    %c6_62 = arith.constant 6 : index
    %114 = memref.load %arg6[%c1_61, %c6_62] : memref<4x8xf32, #tpu.memory_space<smem>>
    %115 = vector.broadcast %114 : f32 to vector<1x256xf32>
    %116 = arith.mulf %13, %115 : vector<1x256xf32>
    %117 = arith.addf %113, %116 : vector<1x256xf32>
    %c1_63 = arith.constant 1 : index
    %c7_64 = arith.constant 7 : index
    %118 = memref.load %arg6[%c1_63, %c7_64] : memref<4x8xf32, #tpu.memory_space<smem>>
    %119 = vector.broadcast %118 : f32 to vector<1x256xf32>
    %120 = arith.mulf %15, %119 : vector<1x256xf32>
    %121 = arith.addf %117, %120 : vector<1x256xf32>
    %c0_65 = arith.constant 0 : index
    %c1_66 = arith.constant 1 : index
    %122 = memref.load %arg7[%c0_65, %c1_66] : memref<1x4xf32, #tpu.memory_space<smem>>
    %123 = vector.broadcast %122 : f32 to vector<1x256xf32>
    %124 = arith.addf %121, %123 : vector<1x256xf32>
    %cst_67 = arith.constant 5.000000e-01 : f32
    %125 = vector.broadcast %cst_67 : f32 to vector<1x256xf32>
    %126 = arith.mulf %125, %124 : vector<1x256xf32>
    %cst_68 = arith.constant 0.707106769 : f32
    %127 = vector.broadcast %cst_68 : f32 to vector<1x256xf32>
    %128 = arith.mulf %124, %127 : vector<1x256xf32>
    %cst_69 = arith.constant 0.000000e+00 : f32
    %129 = vector.broadcast %cst_69 : f32 to vector<1x256xf32>
    %130 = arith.cmpf olt, %128, %129 : vector<1x256xf32>
    %cst_70 = arith.constant -1.000000e+00 : f32
    %cst_71 = arith.constant 1.000000e+00 : f32
    %131 = vector.broadcast %cst_70 : f32 to vector<1x256xf32>
    %132 = vector.broadcast %cst_71 : f32 to vector<1x256xf32>
    %133 = arith.select %130, %131, %132 : vector<1x256xi1>, vector<1x256xf32>
    %134 = math.absf %128 : vector<1x256xf32>
    %cst_72 = arith.constant 0.327591091 : f32
    %135 = vector.broadcast %cst_72 : f32 to vector<1x256xf32>
    %136 = arith.mulf %135, %134 : vector<1x256xf32>
    %cst_73 = arith.constant 1.000000e+00 : f32
    %137 = vector.broadcast %cst_73 : f32 to vector<1x256xf32>
    %138 = arith.addf %137, %136 : vector<1x256xf32>
    %cst_74 = arith.constant 1.000000e+00 : f32
    %139 = vector.broadcast %cst_74 : f32 to vector<1x256xf32>
    %140 = arith.divf %139, %138 : vector<1x256xf32>
    %cst_75 = arith.constant 1.06140542 : f32
    %141 = vector.broadcast %cst_75 : f32 to vector<1x256xf32>
    %142 = arith.mulf %141, %140 : vector<1x256xf32>
    %cst_76 = arith.constant -1.45315206 : f32
    %143 = vector.broadcast %cst_76 : f32 to vector<1x256xf32>
    %144 = arith.addf %142, %143 : vector<1x256xf32>
    %145 = arith.mulf %144, %140 : vector<1x256xf32>
    %cst_77 = arith.constant 1.42141378 : f32
    %146 = vector.broadcast %cst_77 : f32 to vector<1x256xf32>
    %147 = arith.addf %145, %146 : vector<1x256xf32>
    %148 = arith.mulf %147, %140 : vector<1x256xf32>
    %cst_78 = arith.constant -0.284496725 : f32
    %149 = vector.broadcast %cst_78 : f32 to vector<1x256xf32>
    %150 = arith.addf %148, %149 : vector<1x256xf32>
    %151 = arith.mulf %150, %140 : vector<1x256xf32>
    %cst_79 = arith.constant 0.254829586 : f32
    %152 = vector.broadcast %cst_79 : f32 to vector<1x256xf32>
    %153 = arith.addf %151, %152 : vector<1x256xf32>
    %154 = arith.mulf %153, %140 : vector<1x256xf32>
    %cst_80 = arith.constant 0.000000e+00 : f32
    %155 = vector.broadcast %cst_80 : f32 to vector<1x256xf32>
    %156 = arith.subf %155, %134 : vector<1x256xf32>
    %157 = arith.mulf %156, %134 : vector<1x256xf32>
    %158 = math.exp %157 : vector<1x256xf32>
    %159 = arith.mulf %154, %158 : vector<1x256xf32>
    %cst_81 = arith.constant 1.000000e+00 : f32
    %160 = vector.broadcast %cst_81 : f32 to vector<1x256xf32>
    %161 = arith.subf %160, %159 : vector<1x256xf32>
    %162 = arith.mulf %133, %161 : vector<1x256xf32>
    %cst_82 = arith.constant 1.000000e+00 : f32
    %163 = vector.broadcast %cst_82 : f32 to vector<1x256xf32>
    %164 = arith.addf %163, %162 : vector<1x256xf32>
    %165 = arith.mulf %126, %164 : vector<1x256xf32>
    %c2_83 = arith.constant 2 : index
    %c0_84 = arith.constant 0 : index
    %166 = memref.load %arg6[%c2_83, %c0_84] : memref<4x8xf32, #tpu.memory_space<smem>>
    %167 = vector.broadcast %166 : f32 to vector<1x256xf32>
    %168 = arith.mulf %1, %167 : vector<1x256xf32>
    %c2_85 = arith.constant 2 : index
    %c1_86 = arith.constant 1 : index
    %169 = memref.load %arg6[%c2_85, %c1_86] : memref<4x8xf32, #tpu.memory_space<smem>>
    %170 = vector.broadcast %169 : f32 to vector<1x256xf32>
    %171 = arith.mulf %3, %170 : vector<1x256xf32>
    %172 = arith.addf %168, %171 : vector<1x256xf32>
    %c2_87 = arith.constant 2 : index
    %c2_88 = arith.constant 2 : index
    %173 = memref.load %arg6[%c2_87, %c2_88] : memref<4x8xf32, #tpu.memory_space<smem>>
    %174 = vector.broadcast %173 : f32 to vector<1x256xf32>
    %175 = arith.mulf %5, %174 : vector<1x256xf32>
    %176 = arith.addf %172, %175 : vector<1x256xf32>
    %c2_89 = arith.constant 2 : index
    %c3_90 = arith.constant 3 : index
    %177 = memref.load %arg6[%c2_89, %c3_90] : memref<4x8xf32, #tpu.memory_space<smem>>
    %178 = vector.broadcast %177 : f32 to vector<1x256xf32>
    %179 = arith.mulf %7, %178 : vector<1x256xf32>
    %180 = arith.addf %176, %179 : vector<1x256xf32>
    %c2_91 = arith.constant 2 : index
    %c4_92 = arith.constant 4 : index
    %181 = memref.load %arg6[%c2_91, %c4_92] : memref<4x8xf32, #tpu.memory_space<smem>>
    %182 = vector.broadcast %181 : f32 to vector<1x256xf32>
    %183 = arith.mulf %9, %182 : vector<1x256xf32>
    %184 = arith.addf %180, %183 : vector<1x256xf32>
    %c2_93 = arith.constant 2 : index
    %c5_94 = arith.constant 5 : index
    %185 = memref.load %arg6[%c2_93, %c5_94] : memref<4x8xf32, #tpu.memory_space<smem>>
    %186 = vector.broadcast %185 : f32 to vector<1x256xf32>
    %187 = arith.mulf %11, %186 : vector<1x256xf32>
    %188 = arith.addf %184, %187 : vector<1x256xf32>
    %c2_95 = arith.constant 2 : index
    %c6_96 = arith.constant 6 : index
    %189 = memref.load %arg6[%c2_95, %c6_96] : memref<4x8xf32, #tpu.memory_space<smem>>
    %190 = vector.broadcast %189 : f32 to vector<1x256xf32>
    %191 = arith.mulf %13, %190 : vector<1x256xf32>
    %192 = arith.addf %188, %191 : vector<1x256xf32>
    %c2_97 = arith.constant 2 : index
    %c7_98 = arith.constant 7 : index
    %193 = memref.load %arg6[%c2_97, %c7_98] : memref<4x8xf32, #tpu.memory_space<smem>>
    %194 = vector.broadcast %193 : f32 to vector<1x256xf32>
    %195 = arith.mulf %15, %194 : vector<1x256xf32>
    %196 = arith.addf %192, %195 : vector<1x256xf32>
    %c0_99 = arith.constant 0 : index
    %c2_100 = arith.constant 2 : index
    %197 = memref.load %arg7[%c0_99, %c2_100] : memref<1x4xf32, #tpu.memory_space<smem>>
    %198 = vector.broadcast %197 : f32 to vector<1x256xf32>
    %199 = arith.addf %196, %198 : vector<1x256xf32>
    %cst_101 = arith.constant 5.000000e-01 : f32
    %200 = vector.broadcast %cst_101 : f32 to vector<1x256xf32>
    %201 = arith.mulf %200, %199 : vector<1x256xf32>
    %cst_102 = arith.constant 0.707106769 : f32
    %202 = vector.broadcast %cst_102 : f32 to vector<1x256xf32>
    %203 = arith.mulf %199, %202 : vector<1x256xf32>
    %cst_103 = arith.constant 0.000000e+00 : f32
    %204 = vector.broadcast %cst_103 : f32 to vector<1x256xf32>
    %205 = arith.cmpf olt, %203, %204 : vector<1x256xf32>
    %cst_104 = arith.constant -1.000000e+00 : f32
    %cst_105 = arith.constant 1.000000e+00 : f32
    %206 = vector.broadcast %cst_104 : f32 to vector<1x256xf32>
    %207 = vector.broadcast %cst_105 : f32 to vector<1x256xf32>
    %208 = arith.select %205, %206, %207 : vector<1x256xi1>, vector<1x256xf32>
    %209 = math.absf %203 : vector<1x256xf32>
    %cst_106 = arith.constant 0.327591091 : f32
    %210 = vector.broadcast %cst_106 : f32 to vector<1x256xf32>
    %211 = arith.mulf %210, %209 : vector<1x256xf32>
    %cst_107 = arith.constant 1.000000e+00 : f32
    %212 = vector.broadcast %cst_107 : f32 to vector<1x256xf32>
    %213 = arith.addf %212, %211 : vector<1x256xf32>
    %cst_108 = arith.constant 1.000000e+00 : f32
    %214 = vector.broadcast %cst_108 : f32 to vector<1x256xf32>
    %215 = arith.divf %214, %213 : vector<1x256xf32>
    %cst_109 = arith.constant 1.06140542 : f32
    %216 = vector.broadcast %cst_109 : f32 to vector<1x256xf32>
    %217 = arith.mulf %216, %215 : vector<1x256xf32>
    %cst_110 = arith.constant -1.45315206 : f32
    %218 = vector.broadcast %cst_110 : f32 to vector<1x256xf32>
    %219 = arith.addf %217, %218 : vector<1x256xf32>
    %220 = arith.mulf %219, %215 : vector<1x256xf32>
    %cst_111 = arith.constant 1.42141378 : f32
    %221 = vector.broadcast %cst_111 : f32 to vector<1x256xf32>
    %222 = arith.addf %220, %221 : vector<1x256xf32>
    %223 = arith.mulf %222, %215 : vector<1x256xf32>
    %cst_112 = arith.constant -0.284496725 : f32
    %224 = vector.broadcast %cst_112 : f32 to vector<1x256xf32>
    %225 = arith.addf %223, %224 : vector<1x256xf32>
    %226 = arith.mulf %225, %215 : vector<1x256xf32>
    %cst_113 = arith.constant 0.254829586 : f32
    %227 = vector.broadcast %cst_113 : f32 to vector<1x256xf32>
    %228 = arith.addf %226, %227 : vector<1x256xf32>
    %229 = arith.mulf %228, %215 : vector<1x256xf32>
    %cst_114 = arith.constant 0.000000e+00 : f32
    %230 = vector.broadcast %cst_114 : f32 to vector<1x256xf32>
    %231 = arith.subf %230, %209 : vector<1x256xf32>
    %232 = arith.mulf %231, %209 : vector<1x256xf32>
    %233 = math.exp %232 : vector<1x256xf32>
    %234 = arith.mulf %229, %233 : vector<1x256xf32>
    %cst_115 = arith.constant 1.000000e+00 : f32
    %235 = vector.broadcast %cst_115 : f32 to vector<1x256xf32>
    %236 = arith.subf %235, %234 : vector<1x256xf32>
    %237 = arith.mulf %208, %236 : vector<1x256xf32>
    %cst_116 = arith.constant 1.000000e+00 : f32
    %238 = vector.broadcast %cst_116 : f32 to vector<1x256xf32>
    %239 = arith.addf %238, %237 : vector<1x256xf32>
    %240 = arith.mulf %201, %239 : vector<1x256xf32>
    %c3_117 = arith.constant 3 : index
    %c0_118 = arith.constant 0 : index
    %241 = memref.load %arg6[%c3_117, %c0_118] : memref<4x8xf32, #tpu.memory_space<smem>>
    %242 = vector.broadcast %241 : f32 to vector<1x256xf32>
    %243 = arith.mulf %1, %242 : vector<1x256xf32>
    %c3_119 = arith.constant 3 : index
    %c1_120 = arith.constant 1 : index
    %244 = memref.load %arg6[%c3_119, %c1_120] : memref<4x8xf32, #tpu.memory_space<smem>>
    %245 = vector.broadcast %244 : f32 to vector<1x256xf32>
    %246 = arith.mulf %3, %245 : vector<1x256xf32>
    %247 = arith.addf %243, %246 : vector<1x256xf32>
    %c3_121 = arith.constant 3 : index
    %c2_122 = arith.constant 2 : index
    %248 = memref.load %arg6[%c3_121, %c2_122] : memref<4x8xf32, #tpu.memory_space<smem>>
    %249 = vector.broadcast %248 : f32 to vector<1x256xf32>
    %250 = arith.mulf %5, %249 : vector<1x256xf32>
    %251 = arith.addf %247, %250 : vector<1x256xf32>
    %c3_123 = arith.constant 3 : index
    %c3_124 = arith.constant 3 : index
    %252 = memref.load %arg6[%c3_123, %c3_124] : memref<4x8xf32, #tpu.memory_space<smem>>
    %253 = vector.broadcast %252 : f32 to vector<1x256xf32>
    %254 = arith.mulf %7, %253 : vector<1x256xf32>
    %255 = arith.addf %251, %254 : vector<1x256xf32>
    %c3_125 = arith.constant 3 : index
    %c4_126 = arith.constant 4 : index
    %256 = memref.load %arg6[%c3_125, %c4_126] : memref<4x8xf32, #tpu.memory_space<smem>>
    %257 = vector.broadcast %256 : f32 to vector<1x256xf32>
    %258 = arith.mulf %9, %257 : vector<1x256xf32>
    %259 = arith.addf %255, %258 : vector<1x256xf32>
    %c3_127 = arith.constant 3 : index
    %c5_128 = arith.constant 5 : index
    %260 = memref.load %arg6[%c3_127, %c5_128] : memref<4x8xf32, #tpu.memory_space<smem>>
    %261 = vector.broadcast %260 : f32 to vector<1x256xf32>
    %262 = arith.mulf %11, %261 : vector<1x256xf32>
    %263 = arith.addf %259, %262 : vector<1x256xf32>
    %c3_129 = arith.constant 3 : index
    %c6_130 = arith.constant 6 : index
    %264 = memref.load %arg6[%c3_129, %c6_130] : memref<4x8xf32, #tpu.memory_space<smem>>
    %265 = vector.broadcast %264 : f32 to vector<1x256xf32>
    %266 = arith.mulf %13, %265 : vector<1x256xf32>
    %267 = arith.addf %263, %266 : vector<1x256xf32>
    %c3_131 = arith.constant 3 : index
    %c7_132 = arith.constant 7 : index
    %268 = memref.load %arg6[%c3_131, %c7_132] : memref<4x8xf32, #tpu.memory_space<smem>>
    %269 = vector.broadcast %268 : f32 to vector<1x256xf32>
    %270 = arith.mulf %15, %269 : vector<1x256xf32>
    %271 = arith.addf %267, %270 : vector<1x256xf32>
    %c0_133 = arith.constant 0 : index
    %c3_134 = arith.constant 3 : index
    %272 = memref.load %arg7[%c0_133, %c3_134] : memref<1x4xf32, #tpu.memory_space<smem>>
    %273 = vector.broadcast %272 : f32 to vector<1x256xf32>
    %274 = arith.addf %271, %273 : vector<1x256xf32>
    %cst_135 = arith.constant 5.000000e-01 : f32
    %275 = vector.broadcast %cst_135 : f32 to vector<1x256xf32>
    %276 = arith.mulf %275, %274 : vector<1x256xf32>
    %cst_136 = arith.constant 0.707106769 : f32
    %277 = vector.broadcast %cst_136 : f32 to vector<1x256xf32>
    %278 = arith.mulf %274, %277 : vector<1x256xf32>
    %cst_137 = arith.constant 0.000000e+00 : f32
    %279 = vector.broadcast %cst_137 : f32 to vector<1x256xf32>
    %280 = arith.cmpf olt, %278, %279 : vector<1x256xf32>
    %cst_138 = arith.constant -1.000000e+00 : f32
    %cst_139 = arith.constant 1.000000e+00 : f32
    %281 = vector.broadcast %cst_138 : f32 to vector<1x256xf32>
    %282 = vector.broadcast %cst_139 : f32 to vector<1x256xf32>
    %283 = arith.select %280, %281, %282 : vector<1x256xi1>, vector<1x256xf32>
    %284 = math.absf %278 : vector<1x256xf32>
    %cst_140 = arith.constant 0.327591091 : f32
    %285 = vector.broadcast %cst_140 : f32 to vector<1x256xf32>
    %286 = arith.mulf %285, %284 : vector<1x256xf32>
    %cst_141 = arith.constant 1.000000e+00 : f32
    %287 = vector.broadcast %cst_141 : f32 to vector<1x256xf32>
    %288 = arith.addf %287, %286 : vector<1x256xf32>
    %cst_142 = arith.constant 1.000000e+00 : f32
    %289 = vector.broadcast %cst_142 : f32 to vector<1x256xf32>
    %290 = arith.divf %289, %288 : vector<1x256xf32>
    %cst_143 = arith.constant 1.06140542 : f32
    %291 = vector.broadcast %cst_143 : f32 to vector<1x256xf32>
    %292 = arith.mulf %291, %290 : vector<1x256xf32>
    %cst_144 = arith.constant -1.45315206 : f32
    %293 = vector.broadcast %cst_144 : f32 to vector<1x256xf32>
    %294 = arith.addf %292, %293 : vector<1x256xf32>
    %295 = arith.mulf %294, %290 : vector<1x256xf32>
    %cst_145 = arith.constant 1.42141378 : f32
    %296 = vector.broadcast %cst_145 : f32 to vector<1x256xf32>
    %297 = arith.addf %295, %296 : vector<1x256xf32>
    %298 = arith.mulf %297, %290 : vector<1x256xf32>
    %cst_146 = arith.constant -0.284496725 : f32
    %299 = vector.broadcast %cst_146 : f32 to vector<1x256xf32>
    %300 = arith.addf %298, %299 : vector<1x256xf32>
    %301 = arith.mulf %300, %290 : vector<1x256xf32>
    %cst_147 = arith.constant 0.254829586 : f32
    %302 = vector.broadcast %cst_147 : f32 to vector<1x256xf32>
    %303 = arith.addf %301, %302 : vector<1x256xf32>
    %304 = arith.mulf %303, %290 : vector<1x256xf32>
    %cst_148 = arith.constant 0.000000e+00 : f32
    %305 = vector.broadcast %cst_148 : f32 to vector<1x256xf32>
    %306 = arith.subf %305, %284 : vector<1x256xf32>
    %307 = arith.mulf %306, %284 : vector<1x256xf32>
    %308 = math.exp %307 : vector<1x256xf32>
    %309 = arith.mulf %304, %308 : vector<1x256xf32>
    %cst_149 = arith.constant 1.000000e+00 : f32
    %310 = vector.broadcast %cst_149 : f32 to vector<1x256xf32>
    %311 = arith.subf %310, %309 : vector<1x256xf32>
    %312 = arith.mulf %283, %311 : vector<1x256xf32>
    %cst_150 = arith.constant 1.000000e+00 : f32
    %313 = vector.broadcast %cst_150 : f32 to vector<1x256xf32>
    %314 = arith.addf %313, %312 : vector<1x256xf32>
    %315 = arith.mulf %276, %314 : vector<1x256xf32>
    %c0_151 = arith.constant 0 : index
    %c0_152 = arith.constant 0 : index
    %316 = memref.load %arg8[%c0_151, %c0_152] : memref<4x4xf32, #tpu.memory_space<smem>>
    %317 = vector.broadcast %316 : f32 to vector<1x256xf32>
    %318 = arith.mulf %90, %317 : vector<1x256xf32>
    %c0_153 = arith.constant 0 : index
    %c1_154 = arith.constant 1 : index
    %319 = memref.load %arg8[%c0_153, %c1_154] : memref<4x4xf32, #tpu.memory_space<smem>>
    %320 = vector.broadcast %319 : f32 to vector<1x256xf32>
    %321 = arith.mulf %165, %320 : vector<1x256xf32>
    %322 = arith.addf %318, %321 : vector<1x256xf32>
    %c0_155 = arith.constant 0 : index
    %c2_156 = arith.constant 2 : index
    %323 = memref.load %arg8[%c0_155, %c2_156] : memref<4x4xf32, #tpu.memory_space<smem>>
    %324 = vector.broadcast %323 : f32 to vector<1x256xf32>
    %325 = arith.mulf %240, %324 : vector<1x256xf32>
    %326 = arith.addf %322, %325 : vector<1x256xf32>
    %c0_157 = arith.constant 0 : index
    %c3_158 = arith.constant 3 : index
    %327 = memref.load %arg8[%c0_157, %c3_158] : memref<4x4xf32, #tpu.memory_space<smem>>
    %328 = vector.broadcast %327 : f32 to vector<1x256xf32>
    %329 = arith.mulf %315, %328 : vector<1x256xf32>
    %330 = arith.addf %326, %329 : vector<1x256xf32>
    %c0_159 = arith.constant 0 : index
    %c0_160 = arith.constant 0 : index
    %331 = memref.load %arg9[%c0_159, %c0_160] : memref<1x4xf32, #tpu.memory_space<smem>>
    %332 = vector.broadcast %331 : f32 to vector<1x256xf32>
    %333 = arith.addf %330, %332 : vector<1x256xf32>
    %cst_161 = arith.constant 0.000000e+00 : f32
    %334 = vector.broadcast %cst_161 : f32 to vector<1x256xf32>
    %335 = arith.maximumf %333, %334 : vector<1x256xf32>
    %336 = math.absf %333 : vector<1x256xf32>
    %cst_162 = arith.constant 0.000000e+00 : f32
    %337 = vector.broadcast %cst_162 : f32 to vector<1x256xf32>
    %338 = arith.subf %337, %336 : vector<1x256xf32>
    %339 = math.exp %338 : vector<1x256xf32>
    %cst_163 = arith.constant 1.000000e+00 : f32
    %340 = vector.broadcast %cst_163 : f32 to vector<1x256xf32>
    %341 = arith.addf %340, %339 : vector<1x256xf32>
    %342 = math.log %341 : vector<1x256xf32>
    %343 = arith.addf %335, %342 : vector<1x256xf32>
    %c1_164 = arith.constant 1 : index
    %c0_165 = arith.constant 0 : index
    %344 = memref.load %arg8[%c1_164, %c0_165] : memref<4x4xf32, #tpu.memory_space<smem>>
    %345 = vector.broadcast %344 : f32 to vector<1x256xf32>
    %346 = arith.mulf %90, %345 : vector<1x256xf32>
    %c1_166 = arith.constant 1 : index
    %c1_167 = arith.constant 1 : index
    %347 = memref.load %arg8[%c1_166, %c1_167] : memref<4x4xf32, #tpu.memory_space<smem>>
    %348 = vector.broadcast %347 : f32 to vector<1x256xf32>
    %349 = arith.mulf %165, %348 : vector<1x256xf32>
    %350 = arith.addf %346, %349 : vector<1x256xf32>
    %c1_168 = arith.constant 1 : index
    %c2_169 = arith.constant 2 : index
    %351 = memref.load %arg8[%c1_168, %c2_169] : memref<4x4xf32, #tpu.memory_space<smem>>
    %352 = vector.broadcast %351 : f32 to vector<1x256xf32>
    %353 = arith.mulf %240, %352 : vector<1x256xf32>
    %354 = arith.addf %350, %353 : vector<1x256xf32>
    %c1_170 = arith.constant 1 : index
    %c3_171 = arith.constant 3 : index
    %355 = memref.load %arg8[%c1_170, %c3_171] : memref<4x4xf32, #tpu.memory_space<smem>>
    %356 = vector.broadcast %355 : f32 to vector<1x256xf32>
    %357 = arith.mulf %315, %356 : vector<1x256xf32>
    %358 = arith.addf %354, %357 : vector<1x256xf32>
    %c0_172 = arith.constant 0 : index
    %c1_173 = arith.constant 1 : index
    %359 = memref.load %arg9[%c0_172, %c1_173] : memref<1x4xf32, #tpu.memory_space<smem>>
    %360 = vector.broadcast %359 : f32 to vector<1x256xf32>
    %361 = arith.addf %358, %360 : vector<1x256xf32>
    %cst_174 = arith.constant 0.000000e+00 : f32
    %362 = vector.broadcast %cst_174 : f32 to vector<1x256xf32>
    %363 = arith.maximumf %361, %362 : vector<1x256xf32>
    %364 = math.absf %361 : vector<1x256xf32>
    %cst_175 = arith.constant 0.000000e+00 : f32
    %365 = vector.broadcast %cst_175 : f32 to vector<1x256xf32>
    %366 = arith.subf %365, %364 : vector<1x256xf32>
    %367 = math.exp %366 : vector<1x256xf32>
    %cst_176 = arith.constant 1.000000e+00 : f32
    %368 = vector.broadcast %cst_176 : f32 to vector<1x256xf32>
    %369 = arith.addf %368, %367 : vector<1x256xf32>
    %370 = math.log %369 : vector<1x256xf32>
    %371 = arith.addf %363, %370 : vector<1x256xf32>
    %c2_177 = arith.constant 2 : index
    %c0_178 = arith.constant 0 : index
    %372 = memref.load %arg8[%c2_177, %c0_178] : memref<4x4xf32, #tpu.memory_space<smem>>
    %373 = vector.broadcast %372 : f32 to vector<1x256xf32>
    %374 = arith.mulf %90, %373 : vector<1x256xf32>
    %c2_179 = arith.constant 2 : index
    %c1_180 = arith.constant 1 : index
    %375 = memref.load %arg8[%c2_179, %c1_180] : memref<4x4xf32, #tpu.memory_space<smem>>
    %376 = vector.broadcast %375 : f32 to vector<1x256xf32>
    %377 = arith.mulf %165, %376 : vector<1x256xf32>
    %378 = arith.addf %374, %377 : vector<1x256xf32>
    %c2_181 = arith.constant 2 : index
    %c2_182 = arith.constant 2 : index
    %379 = memref.load %arg8[%c2_181, %c2_182] : memref<4x4xf32, #tpu.memory_space<smem>>
    %380 = vector.broadcast %379 : f32 to vector<1x256xf32>
    %381 = arith.mulf %240, %380 : vector<1x256xf32>
    %382 = arith.addf %378, %381 : vector<1x256xf32>
    %c2_183 = arith.constant 2 : index
    %c3_184 = arith.constant 3 : index
    %383 = memref.load %arg8[%c2_183, %c3_184] : memref<4x4xf32, #tpu.memory_space<smem>>
    %384 = vector.broadcast %383 : f32 to vector<1x256xf32>
    %385 = arith.mulf %315, %384 : vector<1x256xf32>
    %386 = arith.addf %382, %385 : vector<1x256xf32>
    %c0_185 = arith.constant 0 : index
    %c2_186 = arith.constant 2 : index
    %387 = memref.load %arg9[%c0_185, %c2_186] : memref<1x4xf32, #tpu.memory_space<smem>>
    %388 = vector.broadcast %387 : f32 to vector<1x256xf32>
    %389 = arith.addf %386, %388 : vector<1x256xf32>
    %cst_187 = arith.constant 0.000000e+00 : f32
    %390 = vector.broadcast %cst_187 : f32 to vector<1x256xf32>
    %391 = arith.maximumf %389, %390 : vector<1x256xf32>
    %392 = math.absf %389 : vector<1x256xf32>
    %cst_188 = arith.constant 0.000000e+00 : f32
    %393 = vector.broadcast %cst_188 : f32 to vector<1x256xf32>
    %394 = arith.subf %393, %392 : vector<1x256xf32>
    %395 = math.exp %394 : vector<1x256xf32>
    %cst_189 = arith.constant 1.000000e+00 : f32
    %396 = vector.broadcast %cst_189 : f32 to vector<1x256xf32>
    %397 = arith.addf %396, %395 : vector<1x256xf32>
    %398 = math.log %397 : vector<1x256xf32>
    %399 = arith.addf %391, %398 : vector<1x256xf32>
    %c3_190 = arith.constant 3 : index
    %c0_191 = arith.constant 0 : index
    %400 = memref.load %arg8[%c3_190, %c0_191] : memref<4x4xf32, #tpu.memory_space<smem>>
    %401 = vector.broadcast %400 : f32 to vector<1x256xf32>
    %402 = arith.mulf %90, %401 : vector<1x256xf32>
    %c3_192 = arith.constant 3 : index
    %c1_193 = arith.constant 1 : index
    %403 = memref.load %arg8[%c3_192, %c1_193] : memref<4x4xf32, #tpu.memory_space<smem>>
    %404 = vector.broadcast %403 : f32 to vector<1x256xf32>
    %405 = arith.mulf %165, %404 : vector<1x256xf32>
    %406 = arith.addf %402, %405 : vector<1x256xf32>
    %c3_194 = arith.constant 3 : index
    %c2_195 = arith.constant 2 : index
    %407 = memref.load %arg8[%c3_194, %c2_195] : memref<4x4xf32, #tpu.memory_space<smem>>
    %408 = vector.broadcast %407 : f32 to vector<1x256xf32>
    %409 = arith.mulf %240, %408 : vector<1x256xf32>
    %410 = arith.addf %406, %409 : vector<1x256xf32>
    %c3_196 = arith.constant 3 : index
    %c3_197 = arith.constant 3 : index
    %411 = memref.load %arg8[%c3_196, %c3_197] : memref<4x4xf32, #tpu.memory_space<smem>>
    %412 = vector.broadcast %411 : f32 to vector<1x256xf32>
    %413 = arith.mulf %315, %412 : vector<1x256xf32>
    %414 = arith.addf %410, %413 : vector<1x256xf32>
    %c0_198 = arith.constant 0 : index
    %c3_199 = arith.constant 3 : index
    %415 = memref.load %arg9[%c0_198, %c3_199] : memref<1x4xf32, #tpu.memory_space<smem>>
    %416 = vector.broadcast %415 : f32 to vector<1x256xf32>
    %417 = arith.addf %414, %416 : vector<1x256xf32>
    %cst_200 = arith.constant 0.000000e+00 : f32
    %418 = vector.broadcast %cst_200 : f32 to vector<1x256xf32>
    %419 = arith.maximumf %417, %418 : vector<1x256xf32>
    %420 = math.absf %417 : vector<1x256xf32>
    %cst_201 = arith.constant 0.000000e+00 : f32
    %421 = vector.broadcast %cst_201 : f32 to vector<1x256xf32>
    %422 = arith.subf %421, %420 : vector<1x256xf32>
    %423 = math.exp %422 : vector<1x256xf32>
    %cst_202 = arith.constant 1.000000e+00 : f32
    %424 = vector.broadcast %cst_202 : f32 to vector<1x256xf32>
    %425 = arith.addf %424, %423 : vector<1x256xf32>
    %426 = math.log %425 : vector<1x256xf32>
    %427 = arith.addf %419, %426 : vector<1x256xf32>
    %cst_203 = arith.constant 9.99999974E-5 : f32
    %428 = vector.broadcast %cst_203 : f32 to vector<1x256xf32>
    %429 = arith.addf %343, %428 : vector<1x256xf32>
    %cst_204 = arith.constant 9.99999974E-5 : f32
    %430 = vector.broadcast %cst_204 : f32 to vector<1x256xf32>
    %431 = arith.addf %371, %430 : vector<1x256xf32>
    %cst_205 = arith.constant 9.99999974E-5 : f32
    %432 = vector.broadcast %cst_205 : f32 to vector<1x256xf32>
    %433 = arith.addf %399, %432 : vector<1x256xf32>
    %cst_206 = arith.constant 9.99999974E-5 : f32
    %434 = vector.broadcast %cst_206 : f32 to vector<1x256xf32>
    %435 = arith.addf %427, %434 : vector<1x256xf32>
    %436 = arith.addf %429, %431 : vector<1x256xf32>
    %437 = arith.divf %429, %436 : vector<1x256xf32>
    %438 = arith.addf %433, %435 : vector<1x256xf32>
    %439 = arith.divf %433, %438 : vector<1x256xf32>
    %cst_207 = arith.constant 5.000000e+01 : f32
    %440 = vector.broadcast %cst_207 : f32 to vector<1x256xf32>
    %441 = arith.mulf %440, %439 : vector<1x256xf32>
    %cst_208 = arith.constant 1.000000e-07 : f32
    %442 = vector.broadcast %cst_208 : f32 to vector<1x256xf32>
    %443 = arith.addf %441, %442 : vector<1x256xf32>
    %cst_209 = arith.constant 1.000000e+00 : f32
    %444 = vector.broadcast %cst_209 : f32 to vector<1x256xf32>
    %445 = arith.subf %444, %437 : vector<1x256xf32>
    %cst_210 = arith.constant 9.99999974E-5 : f32
    %cst_211 = arith.constant 1.000000e+00 : f32
    %446 = vector.broadcast %cst_210 : f32 to vector<1x256xf32>
    %447 = arith.maximumf %446, %445 : vector<1x256xf32>
    %448 = vector.broadcast %cst_211 : f32 to vector<1x256xf32>
    %449 = arith.minimumf %448, %447 : vector<1x256xf32>
    %cst_212 = arith.constant 9.99999974E-5 : f32
    %cst_213 = arith.constant 1.000000e+00 : f32
    %450 = vector.broadcast %cst_212 : f32 to vector<1x256xf32>
    %451 = arith.maximumf %450, %437 : vector<1x256xf32>
    %452 = vector.broadcast %cst_213 : f32 to vector<1x256xf32>
    %453 = arith.minimumf %452, %451 : vector<1x256xf32>
    %454 = math.log %453 : vector<1x256xf32>
    %455 = math.log %449 : vector<1x256xf32>
    %456 = arith.subf %454, %455 : vector<1x256xf32>
    %cst_214 = arith.constant 1.000000e+00 : f32
    %457 = vector.broadcast %cst_214 : f32 to vector<1x256xf32>
    %458 = arith.divf %457, %443 : vector<1x256xf32>
    %c0_215 = arith.constant 0 : index
    %c0_216 = arith.constant 0 : index
    %459 = vector.load %arg4[%c0_215, %c0_216] : memref<256x1xf32, #tpu.memory_space<vmem>>, vector<256x1xf32>
    %c0_217 = arith.constant 0 : index
    %c0_218 = arith.constant 0 : index
    %460 = vector.load %arg5[%c0_217, %c0_218] : memref<256x1xf32, #tpu.memory_space<vmem>>, vector<256x1xf32>
    %461 = vector.broadcast %460 : vector<256x1xf32> to vector<256x256xf32>
    %462 = vector.broadcast %456 : vector<1x256xf32> to vector<256x256xf32>
    %463 = arith.mulf %461, %462 : vector<256x256xf32>
    %464 = vector.broadcast %459 : vector<256x1xf32> to vector<256x256xf32>
    %465 = arith.addf %464, %463 : vector<256x256xf32>
    %466 = vector.broadcast %458 : vector<1x256xf32> to vector<256x256xf32>
    %467 = arith.mulf %465, %466 : vector<256x256xf32>
    %cst_219 = arith.constant dense<0xFF800000> : vector<256xf32>
    %468 = vector.multi_reduction <maximumf>, %467, %cst_219 [0] : vector<256x256xf32> to vector<256xf32>
    %469 = vector.shape_cast %468 : vector<256xf32> to vector<1x256xf32>
    %470 = vector.broadcast %469 : vector<1x256xf32> to vector<256x256xf32>
    %471 = arith.subf %467, %470 : vector<256x256xf32>
    %472 = math.exp %471 : vector<256x256xf32>
    %cst_220 = arith.constant dense<0.000000e+00> : vector<256xf32>
    %473 = vector.multi_reduction <add>, %472, %cst_220 [0] : vector<256x256xf32> to vector<256xf32>
    %474 = vector.shape_cast %473 : vector<256xf32> to vector<1x256xf32>
    %475 = tpu.reciprocal %474 {approx = true} : vector<1x256xf32> -> vector<1x256xf32>
    %476 = arith.mulf %474, %475 : vector<1x256xf32>
    %cst_221 = arith.constant 2.000000e+00 : f32
    %477 = vector.broadcast %cst_221 : f32 to vector<1x256xf32>
    %478 = arith.subf %477, %476 : vector<1x256xf32>
    %479 = arith.mulf %475, %478 : vector<1x256xf32>
    %480 = vector.broadcast %479 : vector<1x256xf32> to vector<256x256xf32>
    %481 = arith.mulf %472, %480 : vector<256x256xf32>
    %c0_222 = arith.constant 0 : index
    %c0_223 = arith.constant 0 : index
    %c0_224 = arith.constant 0 : index
    %482 = vector.load %arg10[%c0_222, %c0_223, %c0_224] : memref<1x256x256xf32, #tpu.memory_space<vmem>>, vector<1x256x256xf32>
    %483 = vector.shape_cast %482 : vector<1x256x256xf32> to vector<256x256xf32>
    %484 = vector.shape_cast %481 : vector<256x256xf32> to vector<1x256x256xf32>
    tpu.vector_store %arg10[%c0_222, %c0_223, %c0_224], %484 {strides = array<i32>} : memref<1x256x256xf32, #tpu.memory_space<vmem>>, vector<1x256x256xf32>,
    return
  }
  func.func @transform_0(%arg0: i32, %arg1: i32) -> (i32, i32, i32) {
    %c0_i32 = arith.constant 0 : i32
    %c0_i32_0 = arith.constant 0 : i32
    return %arg0, %c0_i32, %arg1 : i32, i32, i32
  }
  func.func @transform_1(%arg0: i32, %arg1: i32) -> (i32, i32, i32) {
    %c0_i32 = arith.constant 0 : i32
    %c0_i32_0 = arith.constant 0 : i32
    return %arg0, %c0_i32, %arg1 : i32, i32, i32
  }
  func.func @transform_2(%arg0: i32, %arg1: i32) -> (i32, i32) {
    %c0_i32 = arith.constant 0 : i32
    %c0_i32_0 = arith.constant 0 : i32
    %c0_i32_1 = arith.constant 0 : i32
    return %c0_i32, %c0_i32_0 : i32, i32
  }
  func.func @transform_3(%arg0: i32, %arg1: i32) -> (i32, i32) {
    %c0_i32 = arith.constant 0 : i32
    %c0_i32_0 = arith.constant 0 : i32
    %c0_i32_1 = arith.constant 0 : i32
    return %c0_i32, %c0_i32_0 : i32, i32
  }
  func.func @transform_4(%arg0: i32, %arg1: i32) -> (i32, i32) {
    %c0_i32 = arith.constant 0 : i32
    %c0_i32_0 = arith.constant 0 : i32
    %c0_i32_1 = arith.constant 0 : i32
    return %c0_i32, %c0_i32_0 : i32, i32
  }
  func.func @transform_5(%arg0: i32, %arg1: i32) -> (i32, i32) {
    %c0_i32 = arith.constant 0 : i32
    %c0_i32_0 = arith.constant 0 : i32
    %c0_i32_1 = arith.constant 0 : i32
    return %c0_i32, %c0_i32_0 : i32, i32
  }
  func.func @transform_6(%arg0: i32, %arg1: i32) -> (i32, i32) {
    %c0_i32 = arith.constant 0 : i32
    %c0_i32_0 = arith.constant 0 : i32
    %c0_i32_1 = arith.constant 0 : i32
    return %c0_i32, %c0_i32_0 : i32, i32
  }
  func.func @transform_7(%arg0: i32, %arg1: i32) -> (i32, i32) {
    %c0_i32 = arith.constant 0 : i32
    %c0_i32_0 = arith.constant 0 : i32
    %c0_i32_1 = arith.constant 0 : i32
    return %c0_i32, %c0_i32_0 : i32, i32
  }
  func.func @transform_8(%arg0: i32, %arg1: i32) -> (i32, i32, i32) {
    %c0_i32 = arith.constant 0 : i32
    %c0_i32_0 = arith.constant 0 : i32
    return %arg0, %c0_i32, %arg1 : i32, i32, i32
  }
}

</mosaic_0001>

<bundles_post_ra>
// kernel: tpu_custom_call.1
= control target key start
LH: loop header
LB: loop body
LE: loop exit
PB: predicated region body
PF: predicated region fallthrough
CT: control target
= control target key end

     0   :  { %s4421_s0 = inlined_call_operand.vmem [shape: f32[2,4,256], index: 0, kind: input, shape index: {}]   ;;  %s4422_s1 = inlined_call_operand.vmem [shape: f32[2,4,256], index: 1, kind: input, shape index: {}]   ;;  %s4423_s2 = inlined_call_operand.vmem [shape: f32[256,1], index: 2, kind: input, shape index: {}]   ;;  %s4424_s3 = inlined_call_operand.vmem [shape: f32[256,1], index: 3, kind: input, shape index: {}]   ;;  %s4425_s4 = inlined_call_operand.vmem [shape: f32[4,8], index: 4, kind: input, shape index: {}]   ;;  %s4426_s5 = inlined_call_operand.vmem [shape: f32[1,4], index: 5, kind: input, shape index: {}]   ;;  %s4427_s6 = inlined_call_operand.vmem [shape: f32[4,4], index: 6, kind: input, shape index: {}]   ;;  %s4428_s7 = inlined_call_operand.vmem [shape: f32[1,4], index: 7, kind: input, shape index: {}]   ;;  %s4429_s8 = inlined_call_operand.hbm [shape: f32[2,256,256], index: 8, kind: output, shape index: {}]  }
   0x1   :  { %4485 = sst [smem:[#allocation42_spill]] %s4421_s0 }
   0x2   :  { %4486 = sst [smem:[#allocation43_spill]] %s4425_s4 }
   0x3   :  { %4487 = sst [smem:[#allocation44_spill]] %s4426_s5 }
   0x4   :  { %4488 = sst [smem:[#allocation45_spill]] %s4427_s6 }
   0x5   :  { %4489 = sst [smem:[#allocation46_spill]] %s4428_s7 }
   0x6   :  { %13 = vsyncpa [#allocation4], 0 }
   0x7   :  { %14 = vsyncpa [#allocation6], 0 }
   0x8   :  { %15 = vsyncpa [#allocation9], 0 }
   0x9   :  { %16 = vsyncpa [#allocation3], 0 }
   0xa   :  { %18 = vsyncpa [#allocation3 + $0x1], 0  ;;  %s2607_s27 = smov 0   ;;  %s2609_s28 = smov 0  }
   0xb   :  { %s2611_s29 = smov 0   ;;  %s2613_s30 = smov 0  }
   0xc   :  { %s2615_s9 = smov 0   ;;  %s2617_s10 = smov 0  }
   0xd LB: > { %4490 = sst [smem:[#allocation15_spill]] %s2531_s27  ;;  %s2041_s11 = sadd.s32 4294967295, %s2551_s10   ;;  %s2551_s10 = sphi %s2617_s10, %s24_s10   ;;  %s2547_s9 = sphi %s2615_s9, %s4631_s9   ;;  %s2543_s30 = sphi %s2613_s30, %s4630_s30   ;;  %s2539_s29 = sphi %s2611_s29, %s4629_s29   ;;  %s2535_s28 = sphi %s2609_s28, %s4633_s28   ;;  %s2531_s27 = sphi %s2607_s27, %s4632_s27  }
   0xe   : > { %4491 = sst [smem:[#allocation16_spill]] %s2539_s29  ;;  %s2042_s12 = sadd.s32 4294967294, %s2551_s10  }
   0xf   : > { %4492 = sst [smem:[#allocation17_spill]] %s2547_s9  ;;  %s36_s13 = sadd.s32 1, %s2547_s9 }
  0x10   : > { %s227_s14 = sadd.s32 1, %s2539_s29  ;;  %p38_p0 = scmp.ge.s32.totalorder %s36_s13, 2 }
  0x11   : > { %p237_p1 = scmp.ne.s32.totalorder %s2539_s29, %s2535_s28  ;;  %p238_p2 = scmp.eq.s32.totalorder %s2041_s11, 1 }
  0x12   : > { %p243_p3 = scmp.ne.s32.totalorder %s2535_s28, %s2531_s27  ;;  %s4635_s13 = smov (%p38_p0, %s36_s13), 0 }
  0x13   : > { %4493 = sst [smem:[#allocation18_spill]] %s4635_s13  ;;  %p2647_p4 = por %p238_p2, %p237_p1 }
  0x14   : > { %p244_p5 = scmp.eq.s32.totalorder %s2042_s12, 1  ;;  %s222_s16 = ssub.s32 %s2547_s9, %s4635_s13 }
  0x15   : > { %s4494_s15 = scalar_select %p2647_p4, 1, 0 }
  0x16   : > { %p2043_p6 = scmp.ge.s32.totalorder %s2551_s10, 1  ;;  %p225_p7 = scmp.eq.s32.totalorder %s222_s16, 0 }
  0x17   : > { %p2654_p8 = por %p244_p5, %p243_p3  ;;  %p251_p9 = scmp.lt.s32.totalorder %s2551_s10, 3 }
  0x18   : > { %s2660_s18 = scalar_select %p225_p7, %s2539_s29, %s227_s14  }
  0x19   : > { %s4495_s17 = scalar_select %p2654_p8, 1, 0 }
  0x1a   : > { %4497 = sst [smem:[#allocation20_spill]] %s2660_s18  ;;  %p2662_p10 = pnand %p2043_p6, %p251_p9 }
  0x1b   : > { %4496 = sst [smem:[#allocation19_spill]] %s4495_s17  ;;  %p2666_p11 = scmp.eq.s32.totalorder %s2041_s11, 0 }
  0x1c   : > { %s4498_s19 = scalar_select %p2662_p10, 1, 0 }
  0x1d   : > { %s4499_s20 = scalar_select %p2666_p11, 1, 0 }
  0x1e   : > { %s4500_s5 = sld [smem:[#allocation44_spill]]  ;;  %p2143_p12 = pneg %p2662_p10 }
  0x1f   : > { %s4501_s4 = sld [smem:[#allocation43_spill]]  ;;  %s4503_s6 = sld [smem:[#allocation45_spill]] }
  0x20   : > { %p2680_p13 = pnand %p2666_p11, %p2143_p12 }
  0x22   : > { %p2403_p1 = pneg %p2680_p13 }
  0x24   : > { %s281_s23 = sshll.u32 %s4500_s5, 4  ;;  %s282_s23 = int_to_ptr.vmem [resolvable:$true] %s281_s23 }
  0x25   : > { %s270_s26 = sshll.u32 %s4501_s4, 4  ;;  %s292_s16 = sshll.u32 %s4503_s6, 4  ;;  %s271_s26 = int_to_ptr.vmem [resolvable:$true] %s270_s26  ;;  %s293_s16 = int_to_ptr.vmem [resolvable:$true] %s292_s16 }
  0x26   : > { %s2401_s21 = scalar_lea.vmem %s282_s23, 16  ;;  %p2409_p5 = scmp.lt.s32.totalorder %s282_s23, %s282_s23 }
  0x27   : > { %p2402_p0 = scmp.ne.s32.totalorder %s282_s23, %s2401_s21  ;;  %p2410_p6 = scmp.lt.s32.totalorder %s2401_s21, %s2401_s21 }
  0x29   : > { %p2404_p2 = pnand %p2403_p1, %p2402_p0  ;;  %p2411_p7 = por %p2410_p6, %p2409_p5 }
  0x2b   : > { %p2405_p3 = pneg %p2404_p2 }
  0x2d   : > { %p2412_p9 = pnand %p2411_p7, %p2405_p3 }
  0x2f   : > { %2415 = shalt.err (!%p2412_p9)
}
  0x30   : > { %s2553_s22 = smov [#allocation5]   ;;  %s2416_s24 = scalar_lea.vmem %s271_s26, 64 }
  0x31   : > { %2149 = dma.vmem_to_smem (!%p2680_p13), %s282_s23, 16, %s2553_s22, [#allocation6]  }
  0x32   : > { %p2417_p12 = scmp.ne.s32.totalorder %s271_s26, %s2416_s24  ;;  %p2424_p11 = scmp.lt.s32.totalorder %s271_s26, %s271_s26 }
  0x33   : > { %p2425_p10 = scmp.lt.s32.totalorder %s2416_s24, %s2416_s24 }
  0x34   : > { %p2419_p8 = pnand %p2417_p12, %p2403_p1 }
  0x35   : > { %p2426_p0 = por %p2425_p10, %p2424_p11 }
  0x36   : > { %p2420_p4 = pneg %p2419_p8 }
  0x38   : > { %p2427_p2 = pnand %p2426_p0, %p2420_p4 }
  0x3a   : > { %2430 = shalt.err (!%p2427_p2)
}
  0x3b   : > { %s2554_s25 = smov [#allocation2]   ;;  %s2431_s11 = scalar_lea.vmem %s293_s16, 64 }
  0x3c   : > { %2146 = dma.vmem_to_smem (!%p2680_p13), %s271_s26, 64, %s2554_s25, [#allocation4]  }
  0x3d   : > { %p2432_p3 = scmp.ne.s32.totalorder %s293_s16, %s2431_s11  ;;  %p2439_p7 = scmp.lt.s32.totalorder %s293_s16, %s293_s16 }
  0x3e   : > { %p2440_p9 = scmp.lt.s32.totalorder %s2431_s11, %s2431_s11 }
  0x3f   : > { %p2434_p5 = pnand %p2432_p3, %p2403_p1 }
  0x40   : > { %p2441_p8 = por %p2440_p9, %p2439_p7 }
  0x41   : > { %p2435_p6 = pneg %p2434_p5 }
  0x43   : > { %p2442_p12 = pnand %p2441_p8, %p2435_p6 }
  0x45   : > { %2445 = shalt.err (!%p2442_p12)
}
  0x46   : > { %s2555_s23 = smov [#allocation7]   ;;  %s4504_s7 = sld [smem:[#allocation46_spill]] }
  0x47   : > { %2152 = dma.vmem_to_smem (!%p2680_p13), %s293_s16, 64, %s2555_s23, [#allocation6]  }
  0x4c   : > { %s303_s26 = sshll.u32 %s4504_s7, 4  ;;  %s304_s26 = int_to_ptr.vmem [resolvable:$true] %s303_s26 }
  0x4d   : > { %s2446_s22 = scalar_lea.vmem %s304_s26, 16  ;;  %p2454_p0 = scmp.lt.s32.totalorder %s304_s26, %s304_s26 }
  0x4e   : > { %p2447_p4 = scmp.ne.s32.totalorder %s304_s26, %s2446_s22  ;;  %p2455_p2 = scmp.lt.s32.totalorder %s2446_s22, %s2446_s22 }
  0x50   : > { %p2449_p10 = pnand %p2447_p4, %p2403_p1  ;;  %p2456_p3 = por %p2455_p2, %p2454_p0 }
  0x52   : > { %p2450_p11 = pneg %p2449_p10 }
  0x54   : > { %p2457_p5 = pnand %p2456_p3, %p2450_p11 }
  0x56   : > { %2460 = shalt.err (!%p2457_p5)
}
  0x57   : > { %s2556_s24 = smov [#allocation8]   ;;  %p4505_p6 = scmp.ne.s32.totalorder %s4498_s19, 0 }
  0x58   : > { %2155 = dma.vmem_to_smem (!%p2680_p13), %s304_s26, 16, %s2556_s24, [#allocation9]  }
  0x59   : > { %342 = sbr.rel (%p4505_p6) target bundleno = 537 (0x219), region = 52 }
  0x60   : > { %p4506_p7 = scmp.ne.s32.totalorder %s4499_s20, 0 }
  0x62   : > { %2514 = dma.done.wait (%p4506_p7), [#allocation4], 64  }
  0x63   : > { %2516 = vsyncadd (%p4506_p7), [#allocation4], 4294967232 }
  0x64   : > { %2518 = dma.done.wait (%p4506_p7), [#allocation6], 80  }
  0x65   : > { %2520 = vsyncadd (%p4506_p7), [#allocation6], 4294967216 }
  0x66   : > { %2522 = dma.done.wait (%p4506_p7), [#allocation9], 16  }
  0x67   : > { %2524 = vsyncadd (%p4506_p7), [#allocation9], 4294967280 }
  0x68   : > { %360 = sfence }
  0x69   : > { %v847_v0 = vld [vmem:[%s4424_s3 + $0x10] sm:$0xff]  ;;  %v845_v1 = vld [vmem:[%s4424_s3] sm:$0xff]  ;;  %v2557_v2 = vmov 0   ;;  %v848_v3 = vld [vmem:[%s4424_s3 + $0x18] sm:$0xff]  ;;  %p403_p13 = scmp.lt.s32.totalorder %s2543_s30, 1  ;;  %s2754_s23 = sld [smem:[#allocation2]] }
  0x6a   : > { %2226 = vset.pattern.permute.xlu1 %v2557_v2  ;;  %2225 = vset.pattern.permute.xlu0 %v2557_v2  ;;  %v846_v4 = vld [vmem:[%s4424_s3 + $0x8] sm:$0xff]  ;;  %v849_v6 = vld [vmem:[%s4424_s3 + $0x20] sm:$0xff]  ;;  %v852_v7 = vld [vmem:[%s4424_s3 + $0x38] sm:$0xff]  ;;  %s2756_s20 = sld [smem:[#allocation2 + $0x1]]  ;;  %s2759_s21 = sld [smem:[#allocation2 + $0x2]] }
  0x6b   : > { %889 = vperm.xlu1 %2226, %v847_v0   ;;  %879 = vperm.xlu0 %2225, %v845_v1   ;;  %v850_v5 = vld [vmem:[%s4424_s3 + $0x28] sm:$0xff]  ;;  %s2746_s19 = scalar_select %p403_p13, %s2543_s30, 1  ;;  %v851_v8 = vld [vmem:[%s4424_s3 + $0x30] sm:$0xff]  ;;  %v853_v9 = vld [vmem:[%s4424_s3 + $0x40] sm:$0xff] }
  0x6c   : > { %s2761_s26 = sld [smem:[#allocation2 + $0x3]]  ;;  %s2763_s22 = sld [smem:[#allocation2 + $0x80]]  ;;  %v813_v10 = vld [vmem:[%s4423_s2] sm:$0xff]  ;;  %v814_v11 = vld [vmem:[%s4423_s2 + $0x8] sm:$0xff]  ;;  %v815_v12 = vld [vmem:[%s4423_s2 + $0x10] sm:$0xff] }
  0x6d   : > { %s2765_s24 = sld [smem:[#allocation2 + $0x4]]  ;;  %s2767_s12 = sld [smem:[#allocation2 + $0x81]]  ;;  %v816_v18 = vld [vmem:[%s4423_s2 + $0x18] sm:$0xff]  ;;  %v817_v28 = vld [vmem:[%s4423_s2 + $0x20] sm:$0xff]  ;;  %v818_v47 = vld [vmem:[%s4423_s2 + $0x28] sm:$0xff] }
  0x6e   : > { %s4507_s4 = sshll.u32 %s2746_s19, 3  ;;  %s4508_s0 = sld [smem:[#allocation42_spill]]  ;;  %v854_v48 = vld [vmem:[%s4424_s3 + $0x48] sm:$0xff]  ;;  %v819_v61 = vld [vmem:[%s4423_s2 + $0x30] sm:$0xff]  ;;  %v820_v62 = vld [vmem:[%s4423_s2 + $0x38] sm:$0xff] }
  0x6f   : > { %894 = vperm.xlu1 %2226, %v848_v3   ;;  %884 = vperm.xlu0 %2225, %v846_v4   ;;  %s2782_s13 = sld [smem:[#allocation2 + $0x82]]  ;;  %s2784_s9 = sld [smem:[#allocation2 + $0x5]]  ;;  %v438_v13 = vstv %s2754_s23 }
  0x70   : > { %s2786_s16 = sld [smem:[#allocation2 + $0x83]]  ;;  %s2788_s25 = sld [smem:[#allocation2 + $0x6]]  ;;  %v441_v15 = vstv %s2756_s20  ;;  %v445_v16 = vstv %s2759_s21 }
  0x71   : > { %s2790_s14 = sld [smem:[#allocation2 + $0x84]]  ;;  %s2792_s5 = sld [smem:[#allocation2 + $0x7]] }
  0x72   : > { %v499_v14 = vstv %s2763_s22  ;;  %s2807_s29 = sld [smem:[#allocation2 + $0x86]]  ;;  %s4509_s6 = sshll.u32 %s2746_s19, 3  ;;  %v449_v20 = vstv %s2761_s26 }
  0x73   : > { %904 = vperm.xlu1 %2226, %v850_v5   ;;  %899 = vperm.xlu0 %2225, %v849_v6   ;;  %v502_v17 = vstv %s2767_s12  ;;  %s420_s18 = scalar_lea.vmem %s4422_s1, %s4509_s6  ;;  %s2822_s23 = sld [smem:[#allocation2 + $0x87]]  ;;  %v453_v25 = vstv %s2765_s24 }
  0x74   : > { %s2780_s7 = scalar_lea.vmem %s4508_s0, %s4507_s4  ;;  %s2794_s4 = sld [smem:[#allocation2 + $0x85]]  ;;  %v2846_v34 = vld [vmem:[%s420_s18] ss:$4 sm:$0x3] }
  0x75   : > { %v2818_v19 = vld [vmem:[%s2780_s7] ss:$4 sm:$0x3]  ;;  %v506_v21 = vstv %s2782_s13  ;;  %v2825_v22 = vld [vmem:[%s2780_s7 + $0x1] ss:$4 sm:$0x3]  ;;  %v457_v36 = vstv %s2784_s9  ;;  %v454_v50 = vmul.f32 %v453_v25, %v2846_v34 }
  0x76   : > { %v2828_v23 = vld [vmem:[%s2780_s7 + $0x2] ss:$4 sm:$0x3]  ;;  %v439_v24 = vmul.f32 %v438_v13, %v2818_v19  ;;  %v500_v26 = vmul.f32 %v499_v14, %v2818_v19  ;;  %v510_v27 = vstv %s2786_s16  ;;  %v2838_v29 = vld [vmem:[%s2780_s7 + $0x3] ss:$4 sm:$0x3]  ;;  %v442_v30 = vmul.f32 %v2825_v22, %v441_v15 }
  0x77   : > { %914 = vperm.xlu1 %2226, %v852_v7   ;;  %909 = vperm.xlu0 %2225, %v851_v8   ;;  %v446_v31 = vmul.f32 %v2828_v23, %v445_v16  ;;  %s2842_s13 = sld [smem:[#allocation5]]  ;;  %v503_v32 = vmul.f32 %v2825_v22, %v502_v17  ;;  %v507_v33 = vmul.f32 %v2828_v23, %v506_v21  ;;  %v2848_v35 = vld [vmem:[%s420_s18 + $0x1] ss:$4 sm:$0x3]  ;;  %v514_v37 = vstv %s2790_s14  ;;  %s2863_s9 = sld [smem:[#allocation2 + $0x101]]  ;;  %v855_v13 = vld [vmem:[%s4424_s3 + $0x50] sm:$0xff] }
  0x78   : > { %v2852_v38 = vld [vmem:[%s420_s18 + $0x2] ss:$4 sm:$0x3]  ;;  %v2854_v39 = vld [vmem:[%s420_s18 + $0x3] ss:$4 sm:$0x3]  ;;  %v443_v40 = vadd.f32 %v442_v30, %v439_v24  ;;  %v450_v41 = vmul.f32 %v2838_v29, %v449_v20  ;;  %v511_v43 = vmul.f32 %v2838_v29, %v510_v27  ;;  %v461_v44 = vstv %s2788_s25 }
  0x79   : > { %v504_v42 = vadd.f32 %v503_v32, %v500_v26  ;;  %s2858_s7 = sld [smem:[#allocation2 + $0x100]]  ;;  %v465_v45 = vstv %s2792_s5  ;;  %s2865_s19 = sld [smem:[#allocation2 + $0x102]]  ;;  %v515_v52 = vmul.f32 %v514_v37, %v2846_v34  ;;  %v458_v53 = vmul.f32 %v2848_v35, %v457_v36  ;;  %v856_v14 = vld [vmem:[%s4424_s3 + $0x58] sm:$0xff]  ;;  %v821_v36 = vld [vmem:[%s4423_s2 + $0x40] sm:$0xff]  ;;  %v822_v37 = vld [vmem:[%s4423_s2 + $0x48] sm:$0xff] }
  0x7a   : > { %v518_v46 = vstv %s2794_s4  ;;  %v447_v49 = vadd.f32 %v446_v31, %v443_v40  ;;  %s2875_s24 = sld [smem:[#allocation2 + $0x103]]  ;;  %s2877_s12 = sld [smem:[#allocation2 + $0x104]]  ;;  %v522_v54 = vstv %s2807_s29  ;;  %v526_v58 = vstv %s2822_s23 }
  0x7b   : > { %919 = vperm.xlu0 %2225, %v853_v9   ;;  %1114 = vperm.xlu1 %2226, %v813_v10   ;;  %v508_v51 = vadd.f32 %v507_v33, %v504_v42  ;;  %s2881_s16 = sld [smem:[#allocation5 + $0x1]]  ;;  %s2883_s25 = sld [smem:[#allocation2 + $0x105]]  ;;  %v519_v57 = vmul.f32 %v2848_v35, %v518_v46  ;;  %v462_v59 = vmul.f32 %v2852_v38, %v461_v44 }
  0x7c   : > { %v451_v55 = vadd.f32 %v450_v41, %v447_v49  ;;  %s2887_s14 = sld [smem:[#allocation2 + $0x106]]  ;;  %v466_v60 = vmul.f32 %v2854_v39, %v465_v45  ;;  %s2891_s29 = sld [smem:[#allocation2 + $0x180]]  ;;  %v523_v1 = vmul.f32 %v2852_v38, %v522_v54  ;;  %v527_v3 = vmul.f32 %v2854_v39, %v526_v58 }
  0x7d   : > { %v512_v56 = vadd.f32 %v511_v43, %v508_v51  ;;  %s2893_s5 = sld [smem:[#allocation2 + $0x181]]  ;;  %s2903_s18 = sld [smem:[#allocation2 + $0x182]]  ;;  %v563_v5 = vstv %s2863_s9  ;;  %v469_v20 = vstv %s2842_s13 }
  0x7e   : > { %v455_v63 = vadd.f32 %v454_v50, %v451_v55  ;;  %s2909_s23 = sld [smem:[#allocation2 + $0x183]]  ;;  %v564_v9 = vmul.f32 %v2825_v22, %v563_v5  ;;  %s2913_s27 = sld [smem:[#allocation2 + $0x107]] }
  0x7f   : > { %1119 = vperm.xlu0 %2225, %v814_v11   ;;  %1124 = vperm.xlu1 %2226, %v815_v12   ;;  %v516_v0 = vadd.f32 %v515_v52, %v512_v56  ;;  %v560_v2 = vstv %s2858_s7  ;;  %v567_v6 = vstv %s2865_s19  ;;  %s2924_s20 = sld [smem:[#allocation2 + $0x184]]  ;;  %s2930_s21 = sld [smem:[#allocation2 + $0x185]]  ;;  %v857_v52 = vld [vmem:[%s4424_s3 + $0x60] sm:$0xff] }
  0x80   : > { %v561_v4 = vmul.f32 %v560_v2, %v2818_v19  ;;  %v459_v7 = vadd.f32 %v458_v53, %v455_v63  ;;  %v568_v10 = vmul.f32 %v2828_v23, %v567_v6  ;;  %v571_v11 = vstv %s2875_s24  ;;  %s2936_s26 = sld [smem:[#allocation2 + $0x186]]  ;;  %v858_v53 = vld [vmem:[%s4424_s3 + $0x68] sm:$0xff]  ;;  %s2977_s6 = sld [smem:[#allocation5 + $0x3]]  ;;  %v823_v2 = vld [vmem:[%s4423_s2 + $0x50] sm:$0xff] }
  0x81   : > { %v520_v8 = vadd.f32 %v519_v57, %v516_v0  ;;  %v575_v12 = vstv %s2877_s12  ;;  %v530_v21 = vstv %s2881_s16  ;;  %v579_v24 = vstv %s2883_s25  ;;  %s2948_s16 = sld [smem:[#allocation5 + $0x2]]  ;;  %s2963_s25 = sld [smem:[#allocation2 + $0x187]] }
  0x82   : > { %v463_v15 = vadd.f32 %v462_v59, %v459_v7  ;;  %v565_v17 = vadd.f32 %v564_v9, %v561_v4  ;;  %v576_v30 = vmul.f32 %v575_v12, %v2846_v34  ;;  %v621_v31 = vstv %s2891_s29  ;;  %s3065_s22 = sld [smem:[#allocation7]]  ;;  %s3068_s24 = sld [smem:[#allocation7 + $0x1]] }
  0x83   : > { %1129 = vperm.xlu0 %2225, %v816_v18   ;;  %1134 = vperm.xlu1 %2226, %v817_v28   ;;  %v524_v16 = vadd.f32 %v523_v1, %v520_v8  ;;  %v572_v18 = vmul.f32 %v2838_v29, %v571_v11  ;;  %v583_v28 = vstv %s2887_s14  ;;  %v624_v32 = vstv %s2893_s5  ;;  %s3070_s12 = sld [smem:[#allocation7 + $0x80]]  ;;  %s3079_s5 = sld [smem:[#allocation7 + $0x81]] }
  0x84   : > { %v467_v25 = vadd.f32 %v466_v60, %v463_v15  ;;  %v569_v27 = vadd.f32 %v568_v10, %v565_v17  ;;  %v628_v33 = vstv %s2903_s18  ;;  %v622_v43 = vmul.f32 %v621_v31, %v2818_v19  ;;  %s3081_s4 = sld [smem:[#allocation7 + $0x100]]  ;;  %s3088_s0 = sld [smem:[#allocation7 + $0x181]] }
  0x85   : > { %v528_v26 = vadd.f32 %v527_v3, %v524_v16  ;;  %v580_v44 = vmul.f32 %v2848_v35, %v579_v24  ;;  %v625_v45 = vmul.f32 %v2825_v22, %v624_v32  ;;  %v629_v46 = vmul.f32 %v2828_v23, %v628_v33  ;;  %v824_v3 = vld [vmem:[%s4423_s2 + $0x58] sm:$0xff]  ;;  %v826_v24 = vld [vmem:[%s4423_s2 + $0x68] sm:$0xff]  ;;  %v861_v33 = vld [vmem:[%s4424_s3 + $0x80] sm:$0xff]  ;;  %s3085_s11 = sld [smem:[#allocation7 + $0x180]]  ;;  %s3100_s7 = sld [smem:[#allocation7 + $0x2]] }
  0x86   : > { %v2944_v40 = vadd.f32 %v469_v20, %v467_v25  ;;  %v573_v42 = vadd.f32 %v572_v18, %v569_v27  ;;  %v584_v50 = vmul.f32 %v2852_v38, %v583_v28  ;;  %v587_v51 = vstv %s2913_s27  ;;  %s3102_s9 = sld [smem:[#allocation7 + $0x82]]  ;;  %s3157_s27 = sld [smem:[#allocation8 + $0x1]] }
  0x87   : > { %1139 = vperm.xlu0 %2225, %v818_v47   ;;  %924 = vperm.xlu1 %2226, %v854_v48   ;;  %v2946_v41 = vadd.f32 %v530_v21, %v528_v26  ;;  %v632_v47 = vstv %s2909_s23  ;;  %v626_v22 = vadd.f32 %v625_v45, %v622_v43  ;;  %v636_v56 = vstv %s2924_s20  ;;  %v825_v21 = vld [vmem:[%s4423_s2 + $0x60] sm:$0xff]  ;;  %s3104_s19 = sld [smem:[#allocation7 + $0x102]]  ;;  %p4624_p9 = scmp.ne.s32.totalorder %s4494_s15, 0 }
  0x88   : > { %v2956_v48 = vmul.f32 0.70710677, %v2944_v40  ;;  %v577_v19 = vadd.f32 %v576_v30, %v573_v42  ;;  %v633_v23 = vmul.f32 %v2838_v29, %v632_v47  ;;  %v588_v58 = vmul.f32 %v2854_v39, %v587_v51  ;;  %v828_v51 = vld [vmem:[%s4423_s2 + $0x78] sm:$0xff]  ;;  %s3110_s20 = sld [smem:[#allocation7 + $0x182]] }
  0x89   : > { %v2959_v49 = vmul.f32 0.70710677, %v2946_v41  ;;  %v630_v59 = vadd.f32 %v629_v46, %v626_v22  ;;  %v637_v0 = vmul.f32 %v636_v56, %v2846_v34  ;;  %v644_v1 = vstv %s2936_s26  ;;  %v863_v56 = vld [vmem:[%s4424_s3 + $0x90] sm:$0xff]  ;;  %s3159_s17 = sld [smem:[#allocation8 + $0x2]]  ;;  %s2124_s26 = sshll.u32 %s2543_s30, 13 }
  0x8a   : > { %v475_v54 = vand.u32 2147483647, %v2956_v48  ;;  %v581_v57 = vadd.f32 %v580_v44, %v577_v19  ;;  %v591_v6 = vstv %s2948_s16  ;;  %v645_v10 = vmul.f32 %v2852_v38, %v644_v1 }
  0x8b   : > { %1144 = vperm.xlu0 %2225, %v819_v61   ;;  %1149 = vperm.xlu1 %2226, %v820_v62   ;;  %v536_v55 = vand.u32 2147483647, %v2959_v49  ;;  %v640_v61 = vstv %s2930_s21  ;;  %v634_v63 = vadd.f32 %v633_v23, %v630_v59  ;;  %v648_v34 = vstv %s2963_s25  ;;  %s3132_s25 = sld [smem:[#allocation7 + $0x83]] }
  0x8c   : > { %v476_v29 = vmul.f32 0.3275911, %v475_v54  ;;  %v585_v62 = vadd.f32 %v584_v50, %v581_v57  ;;  %v641_v9 = vmul.f32 %v2848_v35, %v640_v61  ;;  %v860_v35 = vld [vmem:[%s4424_s3 + $0x78] sm:$0xff]  ;;  %v489_v16 = vsub.f32 0.0, %v475_v54  ;;  %v827_v50 = vld [vmem:[%s4423_s2 + $0x70] sm:$0xff] }
  0x8d   : > { %v537_v60 = vmul.f32 0.3275911, %v536_v55  ;;  %v638_v8 = vadd.f32 %v637_v0, %v634_v63  ;;  %v652_v17 = vstv %s2977_s6  ;;  %v550_v18 = vsub.f32 0.0, %v536_v55  ;;  %v864_v57 = vld [vmem:[%s4424_s3 + $0x98] sm:$0xff]  ;;  %v830_v0 = vld [vmem:[%s4423_s2 + $0x88] sm:$0xff]  ;;  %s3083_s6 = sld [smem:[#allocation7 + $0x101]] }
  0x8e   : > { %v477_v4 = vadd.f32 1.0, %v476_v29  ;;  %v589_v7 = vadd.f32 %v588_v58, %v585_v62  ;;  %v490_v27 = vmul.f32 %v489_v16, %v475_v54  ;;  %v829_v62 = vld [vmem:[%s4423_s2 + $0x80] sm:$0xff]  ;;  %vm473_vm0 = vcmp.lt.f32.partialorder %v2956_v48, 0.0  ;;  %v832_v48 = vld [vmem:[%s4423_s2 + $0x98] sm:$0xff] }
  0x8f   : > { %929 = vperm.xlu0 %2225, %v855_v13   ;;  %934 = vperm.xlu1 %2226, %v856_v14   ;;  %v538_v5 = vadd.f32 1.0, %v537_v60  ;;  %v642_v12 = vadd.f32 %v641_v9, %v638_v8  ;;  %v649_v13 = vmul.f32 %v2854_v39, %v648_v34  ;;  %v859_v14 = vld [vmem:[%s4424_s3 + $0x70] sm:$0xff]  ;;  %v551_v28 = vmul.f32 %v550_v18, %v536_v55  ;;  %v866_v34 = vld [vmem:[%s4424_s3 + $0xa8] sm:$0xff] }
  0x90   : > { %2227 = vrcp.f32 %v477_v4  ;;  %v2991_v11 = vadd.f32 %v591_v6, %v589_v7  ;;  %v491_v43 = vmul.f32 1.442695, %v490_v27  ;;  %vm534_vm1 = vcmp.lt.f32.partialorder %v2959_v49, 0.0 }
  0x91   : > { %2229 = vrcp.f32 %v538_v5  ;;  %v646_v15 = vadd.f32 %v645_v10, %v642_v12  ;;  %v552_v47 = vmul.f32 1.442695, %v551_v28  ;;  %v865_v10 = vld [vmem:[%s4424_s3 + $0xa0] sm:$0xff] }
  0x92   : > { %v3001_v38 = vmul.f32 0.70710677, %v2991_v11 }
  0x93   : > { %1154 = vperm.xlu0 %2225, %v821_v36   ;;  %1159 = vperm.xlu1 %2226, %v822_v37   ;;  %v650_v39 = vadd.f32 %v649_v13, %v646_v15  ;;  %v862_v36 = vld [vmem:[%s4424_s3 + $0x88] sm:$0xff] }
  0x94   : > { %v597_v20 = vand.u32 2147483647, %v3001_v38  ;;  %vm595_vm2 = vcmp.lt.f32.partialorder %v3001_v38, 0.0 }
  0x95   : > { %v3011_v26 = vadd.f32 %v652_v17, %v650_v39 }
  0x96   : > { %v598_v25 = vmul.f32 0.3275911, %v597_v20 }
  0x97   : > { %939 = vperm.xlu0 %2225, %v857_v52   ;;  %944 = vperm.xlu1 %2226, %v858_v53   ;;  %v3014_v31 = vmul.f32 0.70710677, %v3011_v26  ;;  %v611_v52 = vsub.f32 0.0, %v597_v20 }
  0x98   : > { %v599_v30 = vadd.f32 1.0, %v598_v25 }
  0x99   : > { %v658_v45 = vand.u32 2147483647, %v3014_v31  ;;  %v612_v29 = vmul.f32 %v611_v52, %v597_v20  ;;  %v833_v52 = vld [vmem:[%s4423_s2 + $0xa0] sm:$0xff]  ;;  %vm656_vm3 = vcmp.lt.f32.partialorder %v3014_v31, 0.0 }
  0x9a   : > { %v2228_v32 = vpop.eup %2227  ;;  %2231 = vrcp.f32 %v599_v30 }
  0x9b   : > { %1164 = vperm.xlu0 %2225, %v823_v2   ;;  %1169 = vperm.xlu1 %2226, %v824_v3   ;;  %v2230_v37 = vpop.eup %2229  ;;  %v480_v42 = vmul.f32 1.0614054, %v2228_v32  ;;  %v659_v22 = vmul.f32 0.3275911, %v658_v45  ;;  %2233 = vpow2.f32 %v491_v43  ;;  %v672_v3 = vsub.f32 0.0, %v658_v45 }
  0x9c   : > { %v541_v44 = vmul.f32 1.0614054, %v2230_v37  ;;  %2235 = vpow2.f32 %v552_v47  ;;  %v613_v5 = vmul.f32 1.442695, %v612_v29  ;;  %v682_v29 = vstv %s3065_s22  ;;  %s4349_s22 = scalar_lea.hbm %s4429_s8, %s2124_s26 }
  0x9d   : > { %v481_v46 = vadd.f32 -1.4531521, %v480_v42  ;;  %v660_v54 = vadd.f32 1.0, %v659_v22 }
  0x9e   : > { %v542_v19 = vadd.f32 -1.4531521, %v541_v44  ;;  %v867_v44 = vld [vmem:[%s4424_s3 + $0xb0] sm:$0xff] }
  0x9f   : > { %949 = vperm.xlu0 %2225, %v859_v14   ;;  %954 = vperm.xlu1 %2226, %v860_v35   ;;  %v482_v23 = vmul.f32 %v2228_v32, %v481_v46  ;;  %2237 = vrcp.f32 %v660_v54  ;;  %v673_v14 = vmul.f32 %v672_v3, %v658_v45  ;;  %v868_v45 = vld [vmem:[%s4424_s3 + $0xb8] sm:$0xff]  ;;  %v834_v54 = vld [vmem:[%s4423_s2 + $0xa8] sm:$0xff]  ;;  %v593_v3 = vmul.f32 0.5, %v2991_v11 }
  0xa0   : > { %v543_v53 = vmul.f32 %v2230_v37, %v542_v19  ;;  %2239 = vpow2.f32 %v613_v5  ;;  %v712_v5 = vstv %s3079_s5  ;;  %s3137_s5 = sld [smem:[#allocation7 + $0x103]] }
  0xa1   : > { %v483_v55 = vadd.f32 1.4214138, %v482_v23  ;;  %v674_v28 = vmul.f32 1.442695, %v673_v14 }
  0xa2   : > { %v544_v58 = vadd.f32 1.4214138, %v543_v53 }
  0xa3   : > { %1174 = vperm.xlu0 %2225, %v825_v21   ;;  %1179 = vperm.xlu1 %2226, %v826_v24   ;;  %v484_v59 = vmul.f32 %v2228_v32, %v483_v55  ;;  %v831_v21 = vld [vmem:[%s4423_s2 + $0x90] sm:$0xff]  ;;  %v2558_v24 = vmov 1.0   ;;  %2241 = vpow2.f32 %v674_v28 }
  0xa4   : > { %v545_v60 = vmul.f32 %v2230_v37, %v544_v58  ;;  %v3035_v61 = vpop.eup %2231  ;;  %v474_v25 = vsel %vm473_vm0, -1.0, %v2558_v24 }
  0xa5   : > { %v485_v63 = vadd.f32 -0.28449672, %v484_v59  ;;  %v602_v2 = vmul.f32 1.0614054, %v3035_v61  ;;  %v2234_v9 = vpop.eup %2233 }
  0xa6   : > { %v546_v1 = vadd.f32 -0.28449672, %v545_v60  ;;  %v2236_v35 = vpop.eup %2235  ;;  %v685_v60 = vstv %s3068_s24 }
  0xa7   : > { %959 = vperm.xlu0 %2225, %v861_v33   ;;  %964 = vperm.xlu1 %2226, %v862_v36   ;;  %v486_v4 = vmul.f32 %v2228_v32, %v485_v63  ;;  %v603_v7 = vadd.f32 -1.4531521, %v602_v2  ;;  %v736_v2 = vstv %s3081_s4  ;;  %s3139_s4 = sld [smem:[#allocation7 + $0x183]] }
  0xa8   : > { %v547_v6 = vmul.f32 %v2230_v37, %v546_v1  ;;  %v709_v1 = vstv %s3070_s12  ;;  %s3130_s12 = sld [smem:[#allocation7 + $0x3]] }
  0xa9   : > { %v487_v8 = vadd.f32 0.2548296, %v486_v4  ;;  %v604_v13 = vmul.f32 %v3035_v61, %v603_v7  ;;  %v3052_v16 = vpop.eup %2237 }
  0xaa   : > { %v548_v12 = vadd.f32 0.2548296, %v547_v6  ;;  %v663_v39 = vmul.f32 1.0614054, %v3052_v16  ;;  %v2240_v23 = vpop.eup %2239  ;;  %v739_v6 = vstv %s3083_s6 }
  0xab   : > { %1184 = vperm.xlu0 %2225, %v827_v50   ;;  %1189 = vperm.xlu1 %2226, %v828_v51   ;;  %v488_v15 = vmul.f32 %v2228_v32, %v487_v8  ;;  %v605_v18 = vadd.f32 1.4214138, %v604_v13  ;;  %v535_v32 = vsel %vm534_vm1, -1.0, %v2558_v24  ;;  %v471_v51 = vmul.f32 0.5, %v2944_v40 }
  0xac   : > { %v549_v17 = vmul.f32 %v2230_v37, %v548_v12  ;;  %v664_v33 = vadd.f32 -1.4531521, %v663_v39  ;;  %v532_v40 = vmul.f32 0.5, %v2946_v41  ;;  %v596_v41 = vsel %vm595_vm2, -1.0, %v2558_v24  ;;  %v835_v12 = vld [vmem:[%s4423_s2 + $0xb0] sm:$0xff] }
  0xad   : > { %v493_v20 = vmul.f32 %v2234_v9, %v488_v15  ;;  %v606_v49 = vmul.f32 %v3035_v61, %v605_v18  ;;  %v2242_v7 = vpop.eup %2241  ;;  %v689_v39 = vstv %s3100_s7  ;;  %s3161_s7 = sld [smem:[#allocation8 + $0x3]] }
  0xae   : > { %v554_v27 = vmul.f32 %v2236_v35, %v549_v17  ;;  %v665_v43 = vmul.f32 %v3052_v16, %v664_v33  ;;  %v836_v35 = vld [vmem:[%s4423_s2 + $0xb8] sm:$0xff]  ;;  %v770_v33 = vstv %s3110_s20 }
  0xaf   : > { %969 = vperm.xlu0 %2225, %v863_v56   ;;  %974 = vperm.xlu1 %2226, %v864_v57   ;;  %v494_v30 = vsub.f32 1.0, %v493_v20  ;;  %v607_v37 = vadd.f32 -0.28449672, %v606_v49 }
  0xb0   : > { %v555_v36 = vsub.f32 1.0, %v554_v27  ;;  %v666_v50 = vadd.f32 1.4214138, %v665_v43  ;;  %v657_v27 = vsel %vm656_vm3, -1.0, %v2558_v24 }
  0xb1   : > { %v495_v42 = vmul.f32 %v494_v30, %v474_v25  ;;  %v608_v47 = vmul.f32 %v3035_v61, %v607_v37  ;;  %v871_v30 = vld [vmem:[%s4424_s3 + $0xd0] sm:$0xff]  ;;  %v654_v37 = vmul.f32 0.5, %v3011_v26  ;;  %v837_v26 = vld [vmem:[%s4423_s2 + $0xc0] sm:$0xff] }
  0xb2   : > { %v556_v46 = vmul.f32 %v555_v36, %v535_v32  ;;  %v667_v53 = vmul.f32 %v3052_v16, %v666_v50  ;;  %v872_v36 = vld [vmem:[%s4424_s3 + $0xd8] sm:$0xff] }
  0xb3   : > { %1194 = vperm.xlu0 %2225, %v829_v62   ;;  %1199 = vperm.xlu1 %2226, %v830_v0   ;;  %v496_v19 = vadd.f32 1.0, %v495_v42  ;;  %v609_v22 = vadd.f32 0.2548296, %v608_v47  ;;  %v870_v62 = vld [vmem:[%s4424_s3 + $0xc8] sm:$0xff] }
  0xb4   : > { %v557_v55 = vadd.f32 1.0, %v556_v46  ;;  %v668_v57 = vadd.f32 -0.28449672, %v667_v53  ;;  %v774_v53 = vstv %s3139_s4 }
  0xb5   : > { %v610_v56 = vmul.f32 %v3035_v61, %v609_v22  ;;  %v497_v58 = vmul.f32 %v496_v19, %v471_v51  ;;  %v869_v61 = vld [vmem:[%s4424_s3 + $0xc0] sm:$0xff]  ;;  %v838_v51 = vld [vmem:[%s4423_s2 + $0xc8] sm:$0xff]  ;;  %v693_v22 = vstv %s3130_s12 }
  0xb6   : > { %v669_v38 = vmul.f32 %v3052_v16, %v668_v57  ;;  %v558_v63 = vmul.f32 %v557_v55, %v532_v40 }
  0xb7   : > { %979 = vperm.xlu0 %2225, %v865_v10   ;;  %984 = vperm.xlu1 %2226, %v866_v34   ;;  %v615_v59 = vmul.f32 %v2240_v23, %v610_v56  ;;  %v683_v9 = vmul.f32 %v682_v29, %v497_v58  ;;  %v763_v10 = vstv %s3085_s11  ;;  %v766_v34 = vstv %s3088_s0  ;;  %s3150_s0 = sld [smem:[#allocation8]]  ;;  %v874_v29 = vld [vmem:[%s4424_s3 + $0xe8] sm:$0xff] }
  0xb8   : > { %v670_v4 = vadd.f32 0.2548296, %v669_v38  ;;  %v710_v13 = vmul.f32 %v709_v1, %v497_v58  ;;  %v737_v14 = vmul.f32 %v736_v2, %v497_v58  ;;  %v686_v17 = vmul.f32 %v685_v60, %v558_v63 }
  0xb9   : > { %v616_v0 = vsub.f32 1.0, %v615_v59  ;;  %v713_v18 = vmul.f32 %v712_v5, %v558_v63  ;;  %v740_v20 = vmul.f32 %v739_v6, %v558_v63  ;;  %v764_v49 = vmul.f32 %v763_v10, %v497_v58  ;;  %v873_v58 = vld [vmem:[%s4424_s3 + $0xe0] sm:$0xff] }
  0xba   : > { %v671_v11 = vmul.f32 %v3052_v16, %v670_v4  ;;  %v767_v28 = vmul.f32 %v766_v34, %v558_v63  ;;  %v687_v31 = vadd.f32 %v686_v17, %v683_v9  ;;  %v720_v23 = vstv %s3132_s25  ;;  %v840_v9 = vld [vmem:[%s4423_s2 + $0xd8] sm:$0xff]  ;;  %s2559_s25 = smov [#allocation10]  }
  0xbb   : > { %1204 = vperm.xlu0 %2225, %v831_v21   ;;  %1209 = vperm.xlu1 %2226, %v832_v48   ;;  %v617_v8 = vmul.f32 %v616_v0, %v596_v41  ;;  %v716_v21 = vstv %s3102_s9  ;;  %v743_v48 = vstv %s3104_s19  ;;  %v714_v24 = vadd.f32 %v713_v18, %v710_v13  ;;  %v876_v17 = vld [vmem:[%s4424_s3 + $0xf8] sm:$0xff]  ;;  %s399_s19 = sand.u32 1, %s2535_s28   ;;  %s2465_s14 = sshll.u32 %s2559_s25, 4  ;;  %s2466_s14 = int_to_ptr.vmem [resolvable:$false] %s2465_s14 }
  0xbc   : > { %v676_v16 = vmul.f32 %v2242_v7, %v671_v11  ;;  %v741_v42 = vadd.f32 %v740_v20, %v737_v14  ;;  %v768_v47 = vadd.f32 %v767_v28, %v764_v49  ;;  %v843_v49 = vld [vmem:[%s4423_s2 + $0xf0] sm:$0xff]  ;;  %v844_v28 = vld [vmem:[%s4423_s2 + $0xf8] sm:$0xff]  ;;  %s2054_s20 = sshll.u32 %s399_s19, 9  ;;  %s4375_s24 = scalar_lea.sflag [#allocation3], %s399_s19 }
  0xbd   : > { %v618_v15 = vadd.f32 1.0, %v617_v8  ;;  %v697_v60 = vstv %s3150_s0  ;;  %v839_v8 = vld [vmem:[%s4423_s2 + $0xd0] sm:$0xff]  ;;  %s4186_s21 = scalar_lea.vmem [#allocation10], %s2054_s20  ;;  %s2467_s29 = scalar_lea.vmem %s2466_s14, 16384 }
  0xbe   : > { %v677_v32 = vsub.f32 1.0, %v676_v16  ;;  %s1903_s13 = sshll.u32 %s4186_s21, 4  ;;  %s4351_s13 = int_to_ptr.vmem [resolvable:$true] %s1903_s13 }
  0xbf   : > { %989 = vperm.xlu0 %2225, %v867_v44   ;;  %994 = vperm.xlu1 %2226, %v868_v45   ;;  %v619_v25 = vmul.f32 %v618_v15, %v593_v3  ;;  %v778_v3 = vstv %s3161_s7  ;;  %v875_v15 = vld [vmem:[%s4424_s3 + $0xf0] sm:$0xff]  ;;  %s2461_s12 = scalar_lea.vmem %s4351_s13, 8192  ;;  %p2468_p4 = scmp.lt.s32.totalorder %s4351_s13, %s2466_s14 }
  0xc0   : > { %v678_v43 = vmul.f32 %v677_v32, %v657_v27  ;;  %v842_v27 = vld [vmem:[%s4423_s2 + $0xe8] sm:$0xff]  ;;  %p2462_p1 = scmp.ne.s32.totalorder %s4351_s13, %s2461_s12  ;;  %p2469_p10 = scmp.lt.s32.totalorder %s2467_s29, %s2461_s12 }
  0xc1   : > { %v690_v44 = vmul.f32 %v689_v39, %v619_v25  ;;  %v717_v45 = vmul.f32 %v716_v21, %v619_v25  ;;  %v744_v46 = vmul.f32 %v743_v48, %v619_v25  ;;  %v771_v50 = vmul.f32 %v770_v33, %v619_v25  ;;  %v841_v25 = vld [vmem:[%s4423_s2 + $0xe0] sm:$0xff] }
  0xc2   : > { %v679_v19 = vadd.f32 1.0, %v678_v43  ;;  %p2463_p8 = pnand %p2462_p1, %p4624_p9  ;;  %p2470_p11 = por %p2469_p10, %p2468_p4 }
  0xc3   : > { %1214 = vperm.xlu0 %2225, %v833_v52   ;;  %1219 = vperm.xlu1 %2226, %v834_v54   ;;  %v747_v52 = vstv %s3137_s5  ;;  %v691_v40 = vadd.f32 %v690_v44, %v687_v31  ;;  %v718_v55 = vadd.f32 %v717_v45, %v714_v24  ;;  %v745_v56 = vadd.f32 %v744_v46, %v741_v42 }
  0xc4   : > { %v680_v54 = vmul.f32 %v679_v19, %v654_v37  ;;  %v772_v57 = vadd.f32 %v771_v50, %v768_v47  ;;  %p2464_p12 = pneg %p2463_p8 }
  0xc6   : > { %v694_v59 = vmul.f32 %v693_v22, %v680_v54  ;;  %v721_v41 = vmul.f32 %v720_v23, %v680_v54  ;;  %v748_v38 = vmul.f32 %v747_v52, %v680_v54  ;;  %v775_v63 = vmul.f32 %v774_v53, %v680_v54  ;;  %p2471_p0 = pnand %p2470_p11, %p2464_p12 }
  0xc7   : > { %999 = vperm.xlu0 %2225, %v869_v61   ;;  %1004 = vperm.xlu1 %2226, %v870_v62   ;;  %v724_v61 = vstv %s3157_s27  ;;  %v751_v62 = vstv %s3159_s17 }
  0xc8   : > { %v695_v0 = vadd.f32 %v694_v59, %v691_v40  ;;  %v722_v1 = vadd.f32 %v721_v41, %v718_v55  ;;  %v749_v2 = vadd.f32 %v748_v38, %v745_v56  ;;  %v776_v4 = vadd.f32 %v775_v63, %v772_v57 }
  0xca   : > { %v3183_v5 = vadd.f32 %v697_v60, %v695_v0  ;;  %v3185_v6 = vadd.f32 %v724_v61, %v722_v1  ;;  %v3187_v7 = vadd.f32 %v751_v62, %v749_v2  ;;  %v3195_v10 = vadd.f32 %v778_v3, %v776_v4 }
  0xcb   : > { %1224 = vperm.xlu0 %2225, %v835_v12   ;;  %1229 = vperm.xlu1 %2226, %v836_v35  }
  0xcc   : > { %v700_v34 = vand.u32 2147483647, %v3183_v5  ;;  %v727_v12 = vand.u32 2147483647, %v3185_v6  ;;  %v754_v11 = vand.u32 2147483647, %v3187_v7 }
  0xcd   : > { %v781_v13 = vand.u32 2147483647, %v3195_v10  ;;  %v726_v19 = vmax.f32 %v3185_v6, 0.0  ;;  %v753_v54 = vmax.f32 %v3187_v7, 0.0  ;;  %v780_v56 = vmax.f32 %v3195_v10, 0.0 }
  0xce   : > { %v701_v14 = vsub.f32 0.0, %v700_v34  ;;  %v728_v35 = vsub.f32 0.0, %v727_v12  ;;  %v755_v18 = vsub.f32 0.0, %v754_v11 }
  0xcf   : > { %1009 = vperm.xlu0 %2225, %v871_v30   ;;  %1014 = vperm.xlu1 %2226, %v872_v36   ;;  %v782_v20 = vsub.f32 0.0, %v781_v13 }
  0xd0   : > { %v702_v16 = vmul.f32 1.442695, %v701_v14  ;;  %v729_v39 = vmul.f32 1.442695, %v728_v35  ;;  %v756_v21 = vmul.f32 1.442695, %v755_v18 }
  0xd1   : > { %v783_v48 = vmul.f32 1.442695, %v782_v20 }
  0xd2   : > { %2243 = vpow2.f32 %v702_v16 }
  0xd3   : > { %1234 = vperm.xlu0 %2225, %v837_v26   ;;  %1239 = vperm.xlu1 %2226, %v838_v51   ;;  %2245 = vpow2.f32 %v729_v39  ;;  %v699_v26 = vmax.f32 %v3183_v5, 0.0 }
  0xd4   : > { %2247 = vpow2.f32 %v756_v21 }
  0xd5   : > { %2249 = vpow2.f32 %v783_v48 }
  0xd7   : > { %1019 = vperm.xlu0 %2225, %v873_v58   ;;  %1024 = vperm.xlu1 %2226, %v874_v29  }
  0xdb   : > { %1244 = vperm.xlu0 %2225, %v839_v8   ;;  %1249 = vperm.xlu1 %2226, %v840_v9  }
  0xdc   : > { %v2244_v30 = vpop.eup %2243 }
  0xdd   : > { %v2246_v32 = vpop.eup %2245  ;;  %v704_v36 = vadd.f32 1.0, %v2244_v30 }
  0xde   : > { %v2248_v31 = vpop.eup %2247  ;;  %v731_v24 = vadd.f32 1.0, %v2246_v32 }
  0xdf   : > { %1029 = vperm.xlu0 %2225, %v875_v15   ;;  %1034 = vperm.xlu1 %2226, %v876_v17   ;;  %v2250_v42 = vpop.eup %2249  ;;  %2251 = vlog2.f32 %v704_v36  ;;  %v758_v43 = vadd.f32 1.0, %v2248_v31 }
  0xe0   : > { %2253 = vlog2.f32 %v731_v24  ;;  %v785_v44 = vadd.f32 1.0, %v2250_v42 }
  0xe1   : > { %2255 = vlog2.f32 %v758_v43 }
  0xe2   : > { %2257 = vlog2.f32 %v785_v44 }
  0xe3   : > { %1254 = vperm.xlu0 %2225, %v841_v25   ;;  %1259 = vperm.xlu1 %2226, %v842_v27  }
  0xe7   : > { %1264 = vperm.xlu0 %2225, %v843_v49   ;;  %1269 = vperm.xlu1 %2226, %v844_v28   ;;  %v1038_v28 = vlaneseq }
  0xe9   : > { %v2252_v51 = vpop.eup %2251  ;;  %v1039_v36 = vshrl.u32 %v1038_v28, 7 }
  0xea   : > { %v3219_v33 = vpop.permute.xlu1 %889  ;;  %v3221_v37 = vpop.permute.xlu0 %879  ;;  %v706_v53 = vmul.f32 0.6931472, %v2252_v51 }
  0xeb   : > { %v2254_v52 = vpop.eup %2253  ;;  %v1044_v51 = vsub.s32 1, %v1039_v36 }
  0xec   : > { %v2256_v40 = vpop.eup %2255  ;;  %v733_v55 = vmul.f32 0.6931472, %v2254_v52  ;;  %v707_v58 = vadd.f32 %v706_v53, %v699_v26  ;;  %v1040_v26 = vsub.s32 0, %v1039_v36 }
  0xed   : > { %v2258_v57 = vpop.eup %2257  ;;  %v760_v59 = vmul.f32 0.6931472, %v2256_v40 }
  0xee   : > { %v3223_v45 = vpop.permute.xlu1 %894  ;;  %v3225_v46 = vpop.permute.xlu0 %884  ;;  %v734_v41 = vadd.f32 %v733_v55, %v726_v19  ;;  %v787_v60 = vmul.f32 0.6931472, %v2258_v57  ;;  %v789_v61 = vadd.f32 0.0001, %v707_v58 }
  0xef   : > { %v761_v62 = vadd.f32 %v760_v59, %v753_v54 }
  0xf0   : > { %v790_v63 = vadd.f32 0.0001, %v734_v41  ;;  %v788_v0 = vadd.f32 %v787_v60, %v780_v56 }
  0xf1   : > { %v791_v1 = vadd.f32 0.0001, %v761_v62 }
  0xf2   : > { %v3227_v47 = vpop.permute.xlu1 %904  ;;  %v3229_v50 = vpop.permute.xlu0 %899  ;;  %v793_v2 = vadd.f32 %v790_v63, %v789_v61  ;;  %v792_v3 = vadd.f32 0.0001, %v788_v0 }
  0xf4   : > { %2259 = vrcp.f32 %v793_v2  ;;  %v796_v6 = vadd.f32 %v792_v3, %v791_v1 }
  0xf6   : > { %v3233_v22 = vpop.permute.xlu1 %914  ;;  %v3235_v23 = vpop.permute.xlu0 %909  ;;  %2261 = vrcp.f32 %v796_v6 }
  0xfa   : > { %v3239_v38 = vpop.permute.xlu0 %919  ;;  %v3241_v29 = vpop.permute.xlu1 %1114 }
  0xfe   : > { %v3243_v4 = vpop.permute.xlu0 %1119  ;;  %v3245_v5 = vpop.permute.xlu1 %1124 }
  0xff   : > { %v2260_v34 = vpop.eup %2259 }
 0x100   : > { %v795_v13 = vmul.f32 %v2260_v34, %v789_v61  ;;  %v2262_v14 = vpop.eup %2261 }
 0x101   : > { %v798_v17 = vmul.f32 %v2262_v14, %v791_v1 }
 0x102   : > { %v3247_v7 = vpop.permute.xlu0 %1129  ;;  %v3249_v8 = vpop.permute.xlu1 %1134  ;;  %v801_v35 = vsub.f32 1.0, %v795_v13  ;;  %v804_v15 = vmax.f32 %v795_v13, 0.0001 }
 0x103   : > { %v799_v48 = vmul.f32 50.0, %v798_v17 }
 0x104   : > { %v802_v16 = vmax.f32 %v801_v35, 0.0001  ;;  %v805_v39 = vmin.f32 %v804_v15, 1.0 }
 0x105   : > { %v800_v49 = vadd.f32 1e-07, %v799_v48 }
 0x106   : > { %v3251_v9 = vpop.permute.xlu0 %1139  ;;  %v3253_v10 = vpop.permute.xlu1 %924  ;;  %v803_v21 = vmin.f32 %v802_v16, 1.0  ;;  %2263 = vlog2.f32 %v805_v39 }
 0x108   : > { %2265 = vlog2.f32 %v803_v21 }
 0x109   : > { %2267 = vrcp.f32 %v800_v49 }
 0x10a   : > { %v3255_v12 = vpop.permute.xlu0 %1144  ;;  %v3257_v11 = vpop.permute.xlu1 %1149 }
 0x10e   : > { %v3259_v18 = vpop.permute.xlu0 %929  ;;  %v3261_v20 = vpop.permute.xlu1 %934 }
 0x110   : > { %v2264_v42 = vpop.eup %2263 }
 0x111   : > { %v807_v43 = vmul.f32 0.6931472, %v2264_v42 }
 0x112   : > { %v3263_v25 = vpop.permute.xlu0 %1154  ;;  %v3265_v27 = vpop.permute.xlu1 %1159 }
 0x113   : > { %v2266_v44 = vpop.eup %2265 }
 0x114   : > { %v809_v19 = vmul.f32 0.6931472, %v2266_v44  ;;  %v2268_v58 = vpop.eup %2267 }
 0x115   : > { %v3303_v2 = vrot.slane %v2268_v58, %v1040_v26 }
 0x116   : > { %v3267_v30 = vpop.permute.xlu0 %939  ;;  %v3269_v32 = vpop.permute.xlu1 %944  ;;  %v810_v54 = vsub.f32 %v807_v43, %v809_v19 }
 0x118   : > { %v3279_v40 = vrot.slane %v810_v54, %v1040_v26  ;;  %v3281_v55 = vrot.slane %v810_v54, %v1044_v51 }
 0x11a   : > { %v3271_v31 = vpop.permute.xlu0 %1164  ;;  %v3273_v24 = vpop.permute.xlu1 %1169  ;;  %v1048_v59 = vmul.f32 %v3279_v40, %v3221_v37  ;;  %v1049_v41 = vmul.f32 %v3281_v55, %v3221_v37  ;;  %v1052_v60 = vmul.f32 %v3279_v40, %v3219_v33  ;;  %v1053_v61 = vmul.f32 %v3281_v55, %v3219_v33 }
 0x11b   : > { %v1050_v62 = vmul.f32 %v3279_v40, %v3225_v46  ;;  %v1051_v63 = vmul.f32 %v3281_v55, %v3225_v46  ;;  %v1054_v0 = vmul.f32 %v3279_v40, %v3223_v45  ;;  %v1055_v1 = vmul.f32 %v3281_v55, %v3223_v45 }
 0x11c   : > { %v3305_v37 = vrot.slane %v2268_v58, %v1044_v51  ;;  %v1058_v33 = vmul.f32 %v3279_v40, %v3227_v47  ;;  %v1059_v46 = vmul.f32 %v3281_v55, %v3227_v47  ;;  %v1056_v34 = vmul.f32 %v3279_v40, %v3229_v50 }
 0x11d   : > { %v1057_v45 = vmul.f32 %v3281_v55, %v3229_v50  ;;  %v1060_v13 = vmul.f32 %v3279_v40, %v3235_v23  ;;  %v1061_v14 = vmul.f32 %v3281_v55, %v3235_v23  ;;  %v1272_v35 = vadd.f32 %v3241_v29, %v1048_v59 }
 0x11e   : > { %v3275_v52 = vpop.permute.xlu0 %949  ;;  %v3277_v53 = vpop.permute.xlu1 %954  ;;  %v1273_v15 = vadd.f32 %v3241_v29, %v1049_v41  ;;  %v1274_v17 = vadd.f32 %v3243_v4, %v1050_v62  ;;  %v1275_v47 = vadd.f32 %v3243_v4, %v1051_v63  ;;  %v1276_v16 = vadd.f32 %v3245_v5, %v1052_v60 }
 0x11f   : > { %v1277_v39 = vadd.f32 %v3245_v5, %v1053_v61  ;;  %v3330_v50 = vmul.f32 %v3303_v2, %v1272_v35  ;;  %v1278_v23 = vadd.f32 %v3247_v7, %v1054_v0  ;;  %v1279_v48 = vadd.f32 %v3247_v7, %v1055_v1 }
 0x120   : > { %v3333_v21 = vmul.f32 %v3305_v37, %v1273_v15  ;;  %v3342_v4 = vmul.f32 %v3303_v2, %v1274_v17  ;;  %v3345_v28 = vmul.f32 %v3305_v37, %v1275_v47  ;;  %v3348_v5 = vmul.f32 %v3303_v2, %v1276_v16 }
 0x121   : > { %v3351_v36 = vmul.f32 %v3305_v37, %v1277_v39  ;;  %v3354_v42 = vmul.f32 %v3303_v2, %v1278_v23  ;;  %v3357_v7 = vmul.f32 %v3305_v37, %v1279_v48  ;;  %v1280_v43 = vadd.f32 %v3249_v8, %v1056_v34 }
 0x122   : > { %v3283_v56 = vpop.permute.xlu0 %1174  ;;  %v3285_v57 = vpop.permute.xlu1 %1179  ;;  %v1281_v44 = vadd.f32 %v3249_v8, %v1057_v45  ;;  %v1411_v26 = vmax.f32 %v3330_v50, %v3348_v5  ;;  %v1282_v19 = vadd.f32 %v3251_v9, %v1058_v33  ;;  %v1283_v54 = vadd.f32 %v3251_v9, %v1059_v46 }
 0x123   : > { %v1448_v51 = vmax.f32 %v3333_v21, %v3351_v36  ;;  %v1412_v58 = vmax.f32 %v3342_v4, %v3354_v42  ;;  %v1449_v59 = vmax.f32 %v3345_v28, %v3357_v7  ;;  %v3372_v41 = vmul.f32 %v3303_v2, %v1280_v43 }
 0x124   : > { %v3375_v8 = vmul.f32 %v3305_v37, %v1281_v44  ;;  %v1062_v62 = vmul.f32 %v3279_v40, %v3233_v22  ;;  %v1063_v9 = vmul.f32 %v3281_v55, %v3233_v22  ;;  %v3386_v63 = vmul.f32 %v3303_v2, %v1282_v19 }
 0x125   : > { %v3389_v0 = vmul.f32 %v3305_v37, %v1283_v54  ;;  %v1413_v1 = vmax.f32 %v1411_v26, %v3372_v41  ;;  %v1284_v46 = vadd.f32 %v3255_v12, %v1060_v13  ;;  %v1285_v34 = vadd.f32 %v3255_v12, %v1061_v14 }
 0x126   : > { %v3307_v3 = vpop.permute.xlu0 %959  ;;  %v3309_v6 = vpop.permute.xlu1 %964  ;;  %v1450_v33 = vmax.f32 %v1448_v51, %v3375_v8  ;;  %v1414_v45 = vmax.f32 %v1412_v58, %v3386_v63  ;;  %v1286_v22 = vadd.f32 %v3257_v11, %v1062_v62  ;;  %v1287_v15 = vadd.f32 %v3257_v11, %v1063_v9 }
 0x127   : > { %v1451_v35 = vmax.f32 %v1449_v59, %v3389_v0  ;;  %v1064_v17 = vmul.f32 %v3279_v40, %v3239_v38  ;;  %v1065_v47 = vmul.f32 %v3281_v55, %v3239_v38  ;;  %v3404_v16 = vmul.f32 %v3303_v2, %v1284_v46 }
 0x128   : > { %v3407_v13 = vmul.f32 %v3305_v37, %v1285_v34  ;;  %v1066_v39 = vmul.f32 %v3279_v40, %v3253_v10  ;;  %v1067_v11 = vmul.f32 %v3281_v55, %v3253_v10  ;;  %v3418_v23 = vmul.f32 %v3303_v2, %v1286_v22 }
 0x129   : > { %v3421_v38 = vmul.f32 %v3305_v37, %v1287_v15  ;;  %v1415_v48 = vmax.f32 %v1413_v1, %v3404_v16  ;;  %v1288_v44 = vadd.f32 %v3263_v25, %v1064_v17  ;;  %v1289_v26 = vadd.f32 %v3263_v25, %v1065_v47 }
 0x12a   : > { %v3337_v49 = vpop.permute.xlu0 %1184  ;;  %v3339_v29 = vpop.permute.xlu1 %1189  ;;  %v1452_v43 = vmax.f32 %v1450_v33, %v3407_v13  ;;  %v1416_v51 = vmax.f32 %v1414_v45, %v3418_v23  ;;  %v1290_v10 = vadd.f32 %v3265_v27, %v1066_v39  ;;  %v1291_v54 = vadd.f32 %v3265_v27, %v1067_v11 }
 0x12b   : > { %v1453_v19 = vmax.f32 %v1451_v35, %v3421_v38  ;;  %v1068_v58 = vmul.f32 %v3279_v40, %v3259_v18  ;;  %v1069_v59 = vmul.f32 %v3281_v55, %v3259_v18  ;;  %v3436_v62 = vmul.f32 %v3303_v2, %v1288_v44 }
 0x12c   : > { %v3439_v9 = vmul.f32 %v3305_v37, %v1289_v26  ;;  %v1070_v33 = vmul.f32 %v3279_v40, %v3261_v20  ;;  %v1071_v27 = vmul.f32 %v3281_v55, %v3261_v20  ;;  %v3450_v46 = vmul.f32 %v3303_v2, %v1290_v10 }
 0x12d   : > { %v3453_v18 = vmul.f32 %v3305_v37, %v1291_v54  ;;  %v1417_v34 = vmax.f32 %v1415_v48, %v3436_v62  ;;  %v1292_v35 = vadd.f32 %v3271_v31, %v1068_v58  ;;  %v1293_v22 = vadd.f32 %v3271_v31, %v1069_v59 }
 0x12e   : > { %v3377_v60 = vpop.permute.xlu0 %969  ;;  %v3379_v61 = vpop.permute.xlu1 %974  ;;  %v1454_v45 = vmax.f32 %v1452_v43, %v3439_v9  ;;  %v1418_v15 = vmax.f32 %v1416_v51, %v3450_v46  ;;  %v1294_v20 = vadd.f32 %v3273_v24, %v1070_v33  ;;  %v1295_v47 = vadd.f32 %v3273_v24, %v1071_v27 }
 0x12f   : > { %4510 = vst [vmem:[#allocation21_spill] sm:$0xff] %v3453_v18  ;;  %v1455_v17 = vmax.f32 %v1453_v19, %v3453_v18  ;;  %v3464_v39 = vmul.f32 %v3303_v2, %v1292_v35  ;;  %v3467_v11 = vmul.f32 %v3305_v37, %v1293_v22  ;;  %v1072_v58 = vmul.f32 %v3279_v40, %v3267_v30 }
 0x130   : > { %v3472_v44 = vmul.f32 %v3303_v2, %v1294_v20  ;;  %v3475_v31 = vmul.f32 %v3305_v37, %v1295_v47  ;;  %v1073_v59 = vmul.f32 %v3281_v55, %v3267_v30  ;;  %v1074_v35 = vmul.f32 %v3279_v40, %v3269_v32 }
 0x131   : > { %4511 = vst [vmem:[#allocation22_spill] sm:$0xff] %v3464_v39  ;;  %4512 = vst [vmem:[#allocation23_spill] sm:$0xff] %v3467_v11  ;;  %v1419_v26 = vmax.f32 %v1417_v34, %v3464_v39  ;;  %v1456_v51 = vmax.f32 %v1454_v45, %v3467_v11  ;;  %v1296_v33 = vadd.f32 %v3283_v56, %v1072_v58 }
 0x132   : > { %v3409_v12 = vpop.permute.xlu0 %1194  ;;  %v3411_v14 = vpop.permute.xlu1 %1199  ;;  %4513 = vst [vmem:[#allocation24_spill] sm:$0xff] %v3472_v44  ;;  %4514 = vst [vmem:[#allocation25_spill] sm:$0xff] %v3475_v31  ;;  %v1420_v24 = vmax.f32 %v1418_v15, %v3472_v44  ;;  %v1457_v19 = vmax.f32 %v1455_v17, %v3475_v31  ;;  %v1297_v27 = vadd.f32 %v3283_v56, %v1073_v59 }
 0x133   : > { %v1075_v22 = vmul.f32 %v3281_v55, %v3269_v32  ;;  %v1076_v15 = vmul.f32 %v3279_v40, %v3275_v52  ;;  %v1077_v30 = vmul.f32 %v3281_v55, %v3275_v52  ;;  %v1298_v17 = vadd.f32 %v3285_v57, %v1074_v35 }
 0x134   : > { %v1078_v20 = vmul.f32 %v3279_v40, %v3277_v53  ;;  %v1079_v47 = vmul.f32 %v3281_v55, %v3277_v53  ;;  %v3510_v58 = vmul.f32 %v3303_v2, %v1296_v33  ;;  %v3513_v32 = vmul.f32 %v3305_v37, %v1297_v27 }
 0x135   : > { %v1299_v56 = vadd.f32 %v3285_v57, %v1075_v22  ;;  %v1300_v52 = vadd.f32 %v3337_v49, %v1076_v15  ;;  %v1301_v57 = vadd.f32 %v3337_v49, %v1077_v30  ;;  %v1080_v35 = vmul.f32 %v3279_v40, %v3307_v3 }
 0x136   : > { %v3441_v25 = vpop.permute.xlu0 %979  ;;  %v3443_v1 = vpop.permute.xlu1 %984  ;;  %4515 = vst [vmem:[#allocation26_spill] sm:$0xff] %v3510_v58  ;;  %4516 = vst [vmem:[#allocation27_spill] sm:$0xff] %v3513_v32  ;;  %v1081_v53 = vmul.f32 %v3281_v55, %v3307_v3  ;;  %v1302_v33 = vadd.f32 %v3339_v29, %v1078_v20  ;;  %v1303_v22 = vadd.f32 %v3339_v29, %v1079_v47 }
 0x137   : > { %v3528_v27 = vmul.f32 %v3303_v2, %v1298_v17  ;;  %v3531_v44 = vmul.f32 %v3305_v37, %v1299_v56  ;;  %v1082_v15 = vmul.f32 %v3279_v40, %v3309_v6  ;;  %v1083_v49 = vmul.f32 %v3281_v55, %v3309_v6 }
 0x138   : > { %v1421_v30 = vmax.f32 %v1419_v26, %v3510_v58  ;;  %v1458_v3 = vmax.f32 %v1456_v51, %v3513_v32  ;;  %v1304_v20 = vadd.f32 %v3409_v12, %v1080_v35  ;;  %v1305_v29 = vadd.f32 %v3409_v12, %v1081_v53 }
 0x139   : > { %4517 = vst [vmem:[#allocation28_spill] sm:$0xff] %v3528_v27  ;;  %4518 = vst [vmem:[#allocation29_spill] sm:$0xff] %v3531_v44  ;;  %v3542_v11 = vmul.f32 %v3303_v2, %v1300_v52  ;;  %v3545_v56 = vmul.f32 %v3305_v37, %v1301_v57  ;;  %v1306_v39 = vadd.f32 %v3411_v14, %v1082_v15 }
 0x13a   : > { %v1205_v48 = vpop.permute.xlu0 %1204  ;;  %v3469_v43 = vpop.permute.xlu1 %1209  ;;  %v1307_v6 = vadd.f32 %v3411_v14, %v1083_v49  ;;  %v3550_v26 = vmul.f32 %v3303_v2, %v1302_v33  ;;  %v3553_v51 = vmul.f32 %v3305_v37, %v1303_v22  ;;  %v1084_v12 = vmul.f32 %v3279_v40, %v3377_v60 }
 0x13b   : > { %4519 = vst [vmem:[#allocation30_spill] sm:$0xff] %v3542_v11  ;;  %4520 = vst [vmem:[#allocation31_spill] sm:$0xff] %v3545_v56  ;;  %v1085_v52 = vmul.f32 %v3281_v55, %v3377_v60  ;;  %v1422_v35 = vmax.f32 %v1420_v24, %v3528_v27  ;;  %v1459_v57 = vmax.f32 %v1457_v19, %v3531_v44 }
 0x13c   : > { %4521 = vst [vmem:[#allocation32_spill] sm:$0xff] %v3550_v26  ;;  %4522 = vst [vmem:[#allocation33_spill] sm:$0xff] %v3553_v51  ;;  %v1086_v53 = vmul.f32 %v3279_v40, %v3379_v61  ;;  %v1087_v14 = vmul.f32 %v3281_v55, %v3379_v61  ;;  %v3566_v33 = vmul.f32 %v3303_v2, %v1304_v20 }
 0x13d   : > { %v3569_v22 = vmul.f32 %v3305_v37, %v1305_v29  ;;  %v1308_v15 = vadd.f32 %v1205_v48, %v1084_v12  ;;  %v1309_v49 = vadd.f32 %v1205_v48, %v1085_v52  ;;  %v3572_v24 = vmul.f32 %v3303_v2, %v1306_v39 }
 0x13e   : > { %v3481_v10 = vpop.permute.xlu0 %989  ;;  %v3483_v54 = vpop.permute.xlu1 %994  ;;  %4523 = vst [vmem:[#allocation34_spill] sm:$0xff] %v3566_v33  ;;  %v3575_v19 = vmul.f32 %v3305_v37, %v1307_v6  ;;  %v1310_v44 = vadd.f32 %v3469_v43, %v1086_v53  ;;  %v1311_v61 = vadd.f32 %v3469_v43, %v1087_v14  ;;  %v1423_v20 = vmax.f32 %v1421_v30, %v3542_v11 }
 0x13f   : > { %4524 = vst [vmem:[#allocation35_spill] sm:$0xff] %v3569_v22  ;;  %4525 = vst [vmem:[#allocation36_spill] sm:$0xff] %v3572_v24  ;;  %v1460_v27 = vmax.f32 %v1458_v3, %v3545_v56  ;;  %v1424_v29 = vmax.f32 %v1422_v35, %v3550_v26  ;;  %v1461_v48 = vmax.f32 %v1459_v57, %v3553_v51 }
 0x140   : > { %4526 = vst [vmem:[#allocation37_spill] sm:$0xff] %v3575_v19  ;;  %v1088_v12 = vmul.f32 %v3279_v40, %v3441_v25  ;;  %v1089_v39 = vmul.f32 %v3281_v55, %v3441_v25  ;;  %v1090_v6 = vmul.f32 %v3279_v40, %v3443_v1  ;;  %v1091_v43 = vmul.f32 %v3281_v55, %v3443_v1 }
 0x141   : > { %v1425_v30 = vmax.f32 %v1423_v20, %v3566_v33  ;;  %v1462_v3 = vmax.f32 %v1460_v27, %v3569_v22  ;;  %v3594_v52 = vmul.f32 %v3303_v2, %v1308_v15  ;;  %v3597_v35 = vmul.f32 %v3305_v37, %v1309_v49 }
 0x142   : > { %v3491_v34 = vpop.permute.xlu0 %1214  ;;  %v3493_v45 = vpop.permute.xlu1 %1219  ;;  %v1426_v25 = vmax.f32 %v1424_v29, %v3572_v24  ;;  %v1463_v14 = vmax.f32 %v1461_v48, %v3575_v19  ;;  %v3602_v51 = vmul.f32 %v3303_v2, %v1310_v44  ;;  %v3605_v1 = vmul.f32 %v3305_v37, %v1311_v61 }
 0x143   : > { %4527 = vst [vmem:[#allocation38_spill] sm:$0xff] %v3594_v52  ;;  %4528 = vst [vmem:[#allocation39_spill] sm:$0xff] %v3597_v35  ;;  %v1092_v27 = vmul.f32 %v3279_v40, %v3481_v10  ;;  %v1093_v15 = vmul.f32 %v3281_v55, %v3481_v10  ;;  %v1312_v49 = vadd.f32 %v3491_v34, %v1088_v12 }
 0x144   : > { %4529 = vst [vmem:[#allocation40_spill] sm:$0xff] %v3602_v51  ;;  %4530 = vst [vmem:[#allocation41_spill] sm:$0xff] %v3605_v1  ;;  %v1313_v20 = vadd.f32 %v3491_v34, %v1089_v39  ;;  %v1094_v29 = vmul.f32 %v3279_v40, %v3483_v54  ;;  %v1095_v44 = vmul.f32 %v3281_v55, %v3483_v54 }
 0x145   : > { %v1314_v48 = vadd.f32 %v3493_v45, %v1090_v6  ;;  %v1315_v61 = vadd.f32 %v3493_v45, %v1091_v43  ;;  %v1427_v19 = vmax.f32 %v1425_v30, %v3594_v52  ;;  %v1464_v24 = vmax.f32 %v1462_v3, %v3597_v35 }
 0x146   : > { %v3515_v59 = vpop.permute.xlu0 %999  ;;  %v3517_v31 = vpop.permute.xlu1 %1004  ;;  %v1428_v34 = vmax.f32 %v1426_v25, %v3602_v51  ;;  %v1465_v39 = vmax.f32 %v1463_v14, %v3605_v1  ;;  %v3624_v54 = vmul.f32 %v3303_v2, %v1312_v49  ;;  %v3627_v6 = vmul.f32 %v3305_v37, %v1313_v20 }
 0x147   : > { %v1096_v45 = vmul.f32 %v3279_v40, %v3515_v59  ;;  %v3634_v43 = vmul.f32 %v3303_v2, %v1314_v48  ;;  %v3637_v30 = vmul.f32 %v3305_v37, %v1315_v61  ;;  %v1099_v3 = vmul.f32 %v3281_v55, %v3517_v31 }
 0x148   : > { %v1429_v35 = vmax.f32 %v1427_v19, %v3624_v54 }
 0x149   : > { %v1430_v52 = vmax.f32 %v1428_v34, %v3634_v43 }
 0x14a   : > { %v1225_v47 = vpop.permute.xlu0 %1224  ;;  %v1230_v17 = vpop.permute.xlu1 %1229 }
 0x14b   : > { %v1316_v22 = vadd.f32 %v1225_v47, %v1092_v27  ;;  %v1317_v10 = vadd.f32 %v1225_v47, %v1093_v15  ;;  %v1318_v26 = vadd.f32 %v1230_v17, %v1094_v29  ;;  %v1319_v56 = vadd.f32 %v1230_v17, %v1095_v44 }
 0x14c   : > { %v1097_v47 = vmul.f32 %v3281_v55, %v3515_v59  ;;  %v1098_v17 = vmul.f32 %v3279_v40, %v3517_v31 }
 0x14d   : > { %v3644_v25 = vmul.f32 %v3303_v2, %v1316_v22  ;;  %v3647_v14 = vmul.f32 %v3305_v37, %v1317_v10  ;;  %v3652_v20 = vmul.f32 %v3303_v2, %v1318_v26  ;;  %v3655_v29 = vmul.f32 %v3305_v37, %v1319_v56 }
 0x14e   : > { %v1010_v32 = vpop.permute.xlu0 %1009  ;;  %v1015_v60 = vpop.permute.xlu1 %1014  ;;  %v1467_v26 = vmax.f32 %v1465_v39, %v3637_v30 }
 0x14f   : > { %v1100_v59 = vmul.f32 %v3279_v40, %v1010_v32  ;;  %v1101_v27 = vmul.f32 %v3281_v55, %v1010_v32  ;;  %v1102_v31 = vmul.f32 %v3279_v40, %v1015_v60  ;;  %v1103_v22 = vmul.f32 %v3281_v55, %v1015_v60 }
 0x150   : > { %v1466_v32 = vmax.f32 %v1464_v24, %v3627_v6  ;;  %v1431_v60 = vmax.f32 %v1429_v35, %v3644_v25  ;;  %v1469_v19 = vmax.f32 %v1467_v26, %v3655_v29 }
 0x152   : > { %v1235_v57 = vpop.permute.xlu0 %1234  ;;  %v1240_v53 = vpop.permute.xlu1 %1239 }
 0x153   : > { %v1320_v44 = vadd.f32 %v1235_v57, %v1096_v45  ;;  %v1321_v48 = vadd.f32 %v1235_v57, %v1097_v47  ;;  %v1322_v61 = vadd.f32 %v1240_v53, %v1098_v17  ;;  %v1323_v10 = vadd.f32 %v1240_v53, %v1099_v3 }
 0x154   : > { %v1468_v57 = vmax.f32 %v1466_v32, %v3647_v14  ;;  %v1432_v53 = vmax.f32 %v1430_v52, %v3652_v20 }
 0x155   : > { %v3668_v24 = vmul.f32 %v3303_v2, %v1320_v44  ;;  %v3671_v34 = vmul.f32 %v3305_v37, %v1321_v48  ;;  %v3674_v39 = vmul.f32 %v3303_v2, %v1322_v61  ;;  %v3677_v45 = vmul.f32 %v3305_v37, %v1323_v10 }
 0x156   : > { %v1020_v33 = vpop.permute.xlu0 %1019  ;;  %v1025_v12 = vpop.permute.xlu1 %1024 }
 0x157   : > { %v1104_v35 = vmul.f32 %v3279_v40, %v1020_v33  ;;  %v1105_v47 = vmul.f32 %v3281_v55, %v1020_v33  ;;  %v1106_v52 = vmul.f32 %v3279_v40, %v1025_v12  ;;  %v1107_v17 = vmul.f32 %v3281_v55, %v1025_v12 }
 0x158   : > { %v1433_v12 = vmax.f32 %v1431_v60, %v3668_v24  ;;  %v1434_v61 = vmax.f32 %v1432_v53, %v3674_v39 }
 0x15a   : > { %v1245_v15 = vpop.permute.xlu0 %1244  ;;  %v1250_v49 = vpop.permute.xlu1 %1249 }
 0x15b   : > { %v1324_v11 = vadd.f32 %v1245_v15, %v1100_v59  ;;  %v1325_v58 = vadd.f32 %v1245_v15, %v1101_v27  ;;  %v1326_v56 = vadd.f32 %v1250_v49, %v1102_v31  ;;  %v1327_v1 = vadd.f32 %v1250_v49, %v1103_v22 }
 0x15d   : > { %v3684_v3 = vmul.f32 %v3303_v2, %v1324_v11  ;;  %v3687_v59 = vmul.f32 %v3305_v37, %v1325_v58  ;;  %v3690_v27 = vmul.f32 %v3303_v2, %v1326_v56  ;;  %v3693_v15 = vmul.f32 %v3305_v37, %v1327_v1 }
 0x15e   : > { %v1030_v51 = vpop.permute.xlu0 %1029  ;;  %v1035_v18 = vpop.permute.xlu1 %1034  ;;  %v1470_v11 = vmax.f32 %v1468_v57, %v3671_v34  ;;  %v1471_v58 = vmax.f32 %v1469_v19, %v3677_v45 }
 0x15f   : > { %v1108_v56 = vmul.f32 %v3279_v40, %v1030_v51  ;;  %v1109_v60 = vmul.f32 %v3281_v55, %v1030_v51  ;;  %v1110_v57 = vmul.f32 %v3279_v40, %v1035_v18  ;;  %v1111_v53 = vmul.f32 %v3281_v55, %v1035_v18 }
 0x162   : > { %v1255_v49 = vpop.permute.xlu0 %1254  ;;  %v1260_v31 = vpop.permute.xlu1 %1259 }
 0x163   : > { %v1328_v22 = vadd.f32 %v1255_v49, %v1104_v35  ;;  %v1329_v33 = vadd.f32 %v1255_v49, %v1105_v47  ;;  %v1330_v44 = vadd.f32 %v1260_v31, %v1106_v52  ;;  %v1331_v48 = vadd.f32 %v1260_v31, %v1107_v17 }
 0x164   : > { %v1435_v47 = vmax.f32 %v1433_v12, %v3684_v3  ;;  %v1472_v52 = vmax.f32 %v1470_v11, %v3687_v59  ;;  %v1436_v17 = vmax.f32 %v1434_v61, %v3690_v27  ;;  %v1473_v49 = vmax.f32 %v1471_v58, %v3693_v15 }
 0x165   : > { %v3700_v10 = vmul.f32 %v3303_v2, %v1328_v22  ;;  %v3703_v1 = vmul.f32 %v3305_v37, %v1329_v33  ;;  %v3706_v32 = vmul.f32 %v3303_v2, %v1330_v44  ;;  %v3709_v26 = vmul.f32 %v3305_v37, %v1331_v48 }
 0x166   : > { %v1265_v19 = vpop.permute.xlu0 %1264  ;;  %v1270_v35 = vpop.permute.xlu1 %1269 }
 0x167   : > { %v1332_v31 = vadd.f32 %v1265_v19, %v1108_v56  ;;  %v1333_v22 = vadd.f32 %v1265_v19, %v1109_v60  ;;  %v1334_v33 = vadd.f32 %v1270_v35, %v1110_v57  ;;  %v1335_v44 = vadd.f32 %v1270_v35, %v1111_v53 }
 0x168   : > { %v1437_v51 = vmax.f32 %v1435_v47, %v3700_v10  ;;  %v1474_v40 = vmax.f32 %v1472_v52, %v3703_v1  ;;  %v1438_v55 = vmax.f32 %v1436_v17, %v3706_v32  ;;  %v1475_v18 = vmax.f32 %v1473_v49, %v3709_v26 }
 0x169   : > { %v3724_v48 = vmul.f32 %v3303_v2, %v1332_v31  ;;  %v3727_v12 = vmul.f32 %v3305_v37, %v1333_v22  ;;  %v3730_v11 = vmul.f32 %v3303_v2, %v1334_v33  ;;  %v3733_v61 = vmul.f32 %v3305_v37, %v1335_v44 }
 0x16b   : > { %v1439_v58 = vmax.f32 %v1437_v51, %v3724_v48  ;;  %v1476_v56 = vmax.f32 %v1474_v40, %v3727_v12  ;;  %v1440_v60 = vmax.f32 %v1438_v55, %v3730_v11  ;;  %v1477_v57 = vmax.f32 %v1475_v18, %v3733_v61 }
 0x16d   : > { %v1441_v53 = vmax.f32 %v1439_v58, %v1440_v60  ;;  %v1478_v19 = vmax.f32 %v1476_v56, %v1477_v57 }
 0x16f   : > { %v1442_v35 = vrot.slane %v1441_v53, 4  ;;  %v1479_v47 = vrot.slane %v1478_v19, 4 }
 0x171   : > { %v1443_v52 = vmax.f32 %v1441_v53, %v1442_v35  ;;  %v1480_v17 = vmax.f32 %v1478_v19, %v1479_v47  ;;  %v4533_v35 = vld [vmem:[#allocation23_spill] sm:$0xff] }
 0x173   : > { %v1444_v49 = vrot.slane %v1443_v52, 2  ;;  %v1481_v2 = vrot.slane %v1480_v17, 2 }
 0x175   : > { %v1445_v31 = vmax.f32 %v1443_v52, %v1444_v49  ;;  %v1482_v22 = vmax.f32 %v1480_v17, %v1481_v2  ;;  %v4534_v52 = vld [vmem:[#allocation24_spill] sm:$0xff]  ;;  %v4535_v49 = vld [vmem:[#allocation25_spill] sm:$0xff] }
 0x177   : > { %v1446_v37 = vrot.slane %v1445_v31, 1  ;;  %v1483_v33 = vrot.slane %v1482_v22, 1 }
 0x179   : > { %v3739_v44 = vmax.f32 %v1445_v31, %v1446_v37  ;;  %v3741_v51 = vmax.f32 %v1482_v22, %v1483_v33  ;;  %v4536_v31 = vld [vmem:[#allocation40_spill] sm:$0xff]  ;;  %v4537_v37 = vld [vmem:[#allocation41_spill] sm:$0xff] }
 0x17b   : > { %v1485_v40 = vsub.f32 %v3330_v50, %v3739_v44  ;;  %v1486_v55 = vsub.f32 %v3333_v21, %v3741_v51  ;;  %v1487_v18 = vsub.f32 %v3342_v4, %v3739_v44  ;;  %v1488_v58 = vsub.f32 %v3345_v28, %v3741_v51 }
 0x17c   : > { %v1489_v56 = vsub.f32 %v3348_v5, %v3739_v44  ;;  %v1490_v60 = vsub.f32 %v3351_v36, %v3741_v51  ;;  %v1491_v57 = vsub.f32 %v3354_v42, %v3739_v44  ;;  %v1492_v50 = vsub.f32 %v3357_v7, %v3741_v51 }
 0x17d   : > { %v1493_v21 = vsub.f32 %v3372_v41, %v3739_v44  ;;  %v1494_v4 = vsub.f32 %v3375_v8, %v3741_v51  ;;  %v1495_v28 = vsub.f32 %v3386_v63, %v3739_v44  ;;  %v1496_v5 = vsub.f32 %v3389_v0, %v3741_v51 }
 0x17e   : > { %v1497_v36 = vsub.f32 %v3404_v16, %v3739_v44  ;;  %v1498_v42 = vsub.f32 %v3407_v13, %v3741_v51  ;;  %v4531_v16 = vld [vmem:[#allocation21_spill] sm:$0xff]  ;;  %v4532_v13 = vld [vmem:[#allocation22_spill] sm:$0xff]  ;;  %v1549_v0 = vmul.f32 1.442695, %v1485_v40  ;;  %v1551_v17 = vmul.f32 1.442695, %v1486_v55 }
 0x17f   : > { %v1553_v63 = vmul.f32 1.442695, %v1487_v18  ;;  %v1555_v8 = vmul.f32 1.442695, %v1488_v58  ;;  %v1557_v22 = vmul.f32 1.442695, %v1489_v56 }
 0x180   : > { %2269 = vpow2.f32 %v1549_v0  ;;  %v1559_v2 = vmul.f32 1.442695, %v1490_v60  ;;  %v1561_v33 = vmul.f32 1.442695, %v1491_v57  ;;  %v1563_v41 = vmul.f32 1.442695, %v1492_v50 }
 0x181   : > { %2271 = vpow2.f32 %v1551_v17  ;;  %v1565_v53 = vmul.f32 1.442695, %v1493_v21  ;;  %v1567_v7 = vmul.f32 1.442695, %v1494_v4  ;;  %v1569_v19 = vmul.f32 1.442695, %v1495_v28 }
 0x182   : > { %2273 = vpow2.f32 %v1553_v63  ;;  %v1571_v47 = vmul.f32 1.442695, %v1496_v5  ;;  %v1573_v55 = vmul.f32 1.442695, %v1497_v36  ;;  %v1575_v58 = vmul.f32 1.442695, %v1498_v42 }
 0x183   : > { %2275 = vpow2.f32 %v1555_v8  ;;  %v4538_v60 = vsub.f32 %v3418_v23, %v3739_v44  ;;  %v4539_v21 = vsub.f32 %v3421_v38, %v3741_v51  ;;  %v4540_v28 = vsub.f32 %v3436_v62, %v3739_v44  ;;  %v4543_v63 = vld [vmem:[#allocation26_spill] sm:$0xff] }
 0x184   : > { %2277 = vpow2.f32 %v1557_v22  ;;  %v4541_v36 = vsub.f32 %v3439_v9, %v3741_v51  ;;  %v4542_v23 = vsub.f32 %v3450_v46, %v3739_v44  ;;  %v1509_v0 = vsub.f32 %v4543_v63, %v3739_v44 }
 0x185   : > { %2279 = vpow2.f32 %v1559_v2  ;;  %v1577_v57 = vmul.f32 1.442695, %v4538_v60  ;;  %v1579_v4 = vmul.f32 1.442695, %v4539_v21  ;;  %v1581_v5 = vmul.f32 1.442695, %v4540_v28 }
 0x186   : > { %2281 = vpow2.f32 %v1561_v33  ;;  %v1583_v42 = vmul.f32 1.442695, %v4541_v36  ;;  %v4544_v9 = vsub.f32 %v4531_v16, %v3741_v51  ;;  %v4545_v46 = vsub.f32 %v4532_v13, %v3739_v44  ;;  %v4546_v33 = vld [vmem:[#allocation27_spill] sm:$0xff] }
 0x187   : > { %2283 = vpow2.f32 %v1563_v41  ;;  %v1585_v41 = vmul.f32 1.442695, %v4542_v23  ;;  %v4548_v60 = vsub.f32 %v4533_v35, %v3741_v51  ;;  %v4549_v13 = vsub.f32 %v4534_v52, %v3739_v44  ;;  %v4550_v23 = vld [vmem:[#allocation29_spill] sm:$0xff] }
 0x188   : > { %2285 = vpow2.f32 %v1565_v53  ;;  %v1587_v53 = vmul.f32 1.442695, %v4544_v9  ;;  %v1597_v52 = vmul.f32 1.442695, %v1509_v0 }
 0x189   : > { %2287 = vpow2.f32 %v1567_v7 }
 0x18a   : > { %v3843_v40 = vpop.eup %2269  ;;  %2289 = vpow2.f32 %v1569_v19 }
 0x18b   : > { %v3845_v18 = vpop.eup %2271  ;;  %2291 = vpow2.f32 %v1571_v47  ;;  %v1589_v47 = vmul.f32 1.442695, %v4545_v46 }
 0x18c   : > { %v3847_v56 = vpop.eup %2273  ;;  %2293 = vpow2.f32 %v1573_v55  ;;  %v1510_v55 = vsub.f32 %v4546_v33, %v3741_v51 }
 0x18d   : > { %v3852_v50 = vpop.eup %2275  ;;  %2295 = vpow2.f32 %v1575_v58  ;;  %v1677_v38 = vadd.f32 %v3847_v56, %v3843_v40  ;;  %v4547_v58 = vld [vmem:[#allocation28_spill] sm:$0xff] }
 0x18e   : > { %v3863_v7 = vpop.eup %2277  ;;  %2297 = vpow2.f32 %v1577_v57  ;;  %v1714_v8 = vadd.f32 %v3852_v50, %v3845_v18  ;;  %v1511_v16 = vsub.f32 %v4547_v58, %v3739_v44  ;;  %v1591_v57 = vmul.f32 1.442695, %v4548_v60  ;;  %v4555_v58 = vld [vmem:[#allocation32_spill] sm:$0xff] }
 0x18f   : > { %v3872_v62 = vpop.eup %2279  ;;  %2299 = vpow2.f32 %v1579_v4  ;;  %v1678_v17 = vadd.f32 %v3863_v7, %v1677_v38  ;;  %v1593_v4 = vmul.f32 1.442695, %v4549_v13  ;;  %v4551_v38 = vld [vmem:[#allocation30_spill] sm:$0xff]  ;;  %v1599_v60 = vmul.f32 1.442695, %v1510_v55 }
 0x190   : > { %v3879_v19 = vpop.eup %2281  ;;  %2301 = vpow2.f32 %v1581_v5  ;;  %v1715_v2 = vadd.f32 %v3872_v62, %v1714_v8  ;;  %v1513_v35 = vsub.f32 %v4551_v38, %v3739_v44  ;;  %v1601_v13 = vmul.f32 1.442695, %v1511_v16  ;;  %v4559_v38 = vld [vmem:[#allocation34_spill] sm:$0xff] }
 0x191   : > { %v3886_v22 = vpop.eup %2283  ;;  %2303 = vpow2.f32 %v1583_v42  ;;  %v1679_v28 = vadd.f32 %v3879_v19, %v1678_v17  ;;  %v1512_v42 = vsub.f32 %v4550_v23, %v3741_v51 }
 0x192   : > { %v3895_v21 = vpop.eup %2285  ;;  %2305 = vpow2.f32 %v1585_v41  ;;  %v1716_v5 = vadd.f32 %v3886_v22, %v1715_v2  ;;  %v4552_v41 = vsub.f32 %v4535_v49, %v3741_v51  ;;  %v4554_v2 = vld [vmem:[#allocation31_spill] sm:$0xff]  ;;  %v1605_v55 = vmul.f32 1.442695, %v1513_v35 }
 0x193   : > { %v3902_v36 = vpop.eup %2287  ;;  %2307 = vpow2.f32 %v1587_v53  ;;  %v1680_v9 = vadd.f32 %v3895_v21, %v1679_v28  ;;  %v1514_v33 = vsub.f32 %v4554_v2, %v3741_v51  ;;  %v1515_v53 = vsub.f32 %v4555_v58, %v3739_v44 }
 0x194   : > { %v1595_v8 = vmul.f32 1.442695, %v4552_v41  ;;  %v3911_v63 = vpop.eup %2289  ;;  %2309 = vpow2.f32 %v1589_v47  ;;  %v1717_v46 = vadd.f32 %v3902_v36, %v1716_v5  ;;  %v4558_v5 = vld [vmem:[#allocation33_spill] sm:$0xff]  ;;  %v1517_v41 = vsub.f32 %v4559_v38, %v3739_v44 }
 0x195   : > { %v3915_v17 = vpop.eup %2291  ;;  %2311 = vpow2.f32 %v1591_v57  ;;  %v1681_v0 = vadd.f32 %v3911_v63, %v1680_v9  ;;  %v1516_v23 = vsub.f32 %v4558_v5, %v3741_v51  ;;  %v1603_v2 = vmul.f32 1.442695, %v1512_v42  ;;  %v4563_v5 = vld [vmem:[#allocation36_spill] sm:$0xff] }
 0x196   : > { %4553 = vst [vmem:[#allocation21_spill] sm:$0xff] %v3915_v17  ;;  %v3921_v49 = vpop.eup %2293  ;;  %2313 = vpow2.f32 %v1593_v4  ;;  %v1718_v47 = vadd.f32 %v3915_v17, %v1717_v46  ;;  %v4562_v46 = vld [vmem:[#allocation35_spill] sm:$0xff]  ;;  %v1519_v17 = vsub.f32 %v4563_v5, %v3739_v44  ;;  %v1607_v38 = vmul.f32 1.442695, %v1514_v33 }
 0x197   : > { %4556 = vst [vmem:[#allocation22_spill] sm:$0xff] %v3921_v49  ;;  %v3925_v28 = vpop.eup %2295  ;;  %2315 = vpow2.f32 %v1595_v8  ;;  %v1682_v16 = vadd.f32 %v3921_v49, %v1681_v0  ;;  %v1518_v58 = vsub.f32 %v4562_v46, %v3741_v51  ;;  %v1609_v42 = vmul.f32 1.442695, %v1515_v53  ;;  %v4565_v46 = vld [vmem:[#allocation38_spill] sm:$0xff] }
 0x198   : > { %4557 = vst [vmem:[#allocation23_spill] sm:$0xff] %v3925_v28  ;;  %v3931_v57 = vpop.eup %2297  ;;  %2317 = vpow2.f32 %v1597_v52  ;;  %v1719_v4 = vadd.f32 %v3925_v28, %v1718_v47  ;;  %v4564_v47 = vld [vmem:[#allocation37_spill] sm:$0xff]  ;;  %v1521_v49 = vsub.f32 %v4565_v46, %v3739_v44  ;;  %v1611_v5 = vmul.f32 1.442695, %v1516_v23 }
 0x199   : > { %4560 = vst [vmem:[#allocation24_spill] sm:$0xff] %v3931_v57  ;;  %v3935_v9 = vpop.eup %2299  ;;  %2319 = vpow2.f32 %v1599_v60  ;;  %v1683_v35 = vadd.f32 %v3931_v57, %v1682_v16  ;;  %v1520_v28 = vsub.f32 %v4564_v47, %v3741_v51  ;;  %v1613_v33 = vmul.f32 1.442695, %v1517_v41 }
 0x19a   : > { %4561 = vst [vmem:[#allocation25_spill] sm:$0xff] %v3935_v9  ;;  %v3941_v8 = vpop.eup %2301  ;;  %2321 = vpow2.f32 %v1601_v13  ;;  %v1720_v52 = vadd.f32 %v3935_v9, %v1719_v4  ;;  %v4566_v4 = vld [vmem:[#allocation39_spill] sm:$0xff]  ;;  %v1615_v47 = vmul.f32 1.442695, %v1518_v58  ;;  %v1621_v46 = vmul.f32 1.442695, %v1521_v49 }
 0x19b   : > { %v3945_v0 = vpop.eup %2303  ;;  %2323 = vpow2.f32 %v1603_v2  ;;  %v1684_v53 = vadd.f32 %v3941_v8, %v1683_v35  ;;  %v1522_v9 = vsub.f32 %v4566_v4, %v3741_v51  ;;  %v1617_v2 = vmul.f32 1.442695, %v1519_v17 }
 0x19c   : > { %v3951_v60 = vpop.eup %2305  ;;  %2325 = vpow2.f32 %v1605_v55  ;;  %v1721_v13 = vadd.f32 %v3945_v0, %v1720_v52  ;;  %v1619_v35 = vmul.f32 1.442695, %v1520_v28 }
 0x19d   : > { %v3955_v16 = vpop.eup %2307  ;;  %2327 = vpow2.f32 %v1607_v38  ;;  %v1685_v23 = vadd.f32 %v3951_v60, %v1684_v53  ;;  %v1623_v17 = vmul.f32 1.442695, %v1522_v9  ;;  %v4567_v53 = vsub.f32 %v4536_v31, %v3739_v44 }
 0x19e   : > { %v3959_v57 = vpop.eup %2309  ;;  %2329 = vpow2.f32 %v1609_v42  ;;  %v1722_v55 = vadd.f32 %v3955_v16, %v1721_v13  ;;  %v4568_v13 = vsub.f32 %v4537_v37, %v3741_v51  ;;  %v4569_v9 = vsub.f32 %v3624_v54, %v3739_v44 }
 0x19f   : > { %v3963_v41 = vpop.eup %2311  ;;  %2331 = vpow2.f32 %v1611_v5  ;;  %v1686_v4 = vadd.f32 %v3959_v57, %v1685_v23  ;;  %v1625_v5 = vmul.f32 1.442695, %v4567_v53 }
 0x1a0   : > { %v3965_v52 = vpop.eup %2313  ;;  %2333 = vpow2.f32 %v1613_v33  ;;  %v1723_v58 = vadd.f32 %v3963_v41, %v1722_v55  ;;  %v1627_v23 = vmul.f32 1.442695, %v4568_v13 }
 0x1a1   : > { %v3969_v38 = vpop.eup %2315  ;;  %2335 = vpow2.f32 %v1615_v47  ;;  %v1687_v28 = vadd.f32 %v3965_v52, %v1686_v4 }
 0x1a2   : > { %v3971_v42 = vpop.eup %2317  ;;  %2337 = vpow2.f32 %v1617_v2  ;;  %v1724_v33 = vadd.f32 %v3969_v38, %v1723_v58  ;;  %v1629_v2 = vmul.f32 1.442695, %v4569_v9 }
 0x1a3   : > { %v3978_v49 = vpop.eup %2319  ;;  %2339 = vpow2.f32 %v1619_v35  ;;  %v1688_v31 = vadd.f32 %v3971_v42, %v1687_v28  ;;  %v4570_v35 = vsub.f32 %v3627_v6, %v3741_v51 }
 0x1a4   : > { %v3983_v47 = vpop.eup %2321  ;;  %2341 = vpow2.f32 %v1621_v46  ;;  %v1725_v55 = vadd.f32 %v3978_v49, %v1724_v33  ;;  %v4571_v46 = vsub.f32 %v3634_v43, %v3739_v44 }
 0x1a5   : > { %v3990_v4 = vpop.eup %2323  ;;  %2343 = vpow2.f32 %v1623_v17  ;;  %v1631_v58 = vmul.f32 1.442695, %v4570_v35  ;;  %v1689_v54 = vadd.f32 %v3983_v47, %v1688_v31  ;;  %v4572_v17 = vsub.f32 %v3637_v30, %v3741_v51 }
 0x1a6   : > { %v3995_v37 = vpop.eup %2325  ;;  %2345 = vpow2.f32 %v1625_v5  ;;  %v1633_v53 = vmul.f32 1.442695, %v4571_v46  ;;  %v1726_v28 = vadd.f32 %v3990_v4, %v1725_v55  ;;  %v4573_v5 = vsub.f32 %v3644_v25, %v3739_v44 }
 0x1a7   : > { %v4002_v13 = vpop.eup %2327  ;;  %2347 = vpow2.f32 %v1627_v23  ;;  %v1635_v33 = vmul.f32 1.442695, %v4572_v17  ;;  %v1690_v43 = vadd.f32 %v3995_v37, %v1689_v54  ;;  %v4574_v23 = vsub.f32 %v3647_v14, %v3741_v51 }
 0x1a8   : > { %v4007_v6 = vpop.eup %2329  ;;  %2349 = vpow2.f32 %v1629_v2  ;;  %v1637_v9 = vmul.f32 1.442695, %v4573_v5  ;;  %v1727_v31 = vadd.f32 %v4002_v13, %v1726_v28  ;;  %v4575_v2 = vsub.f32 %v3652_v20, %v3739_v44 }
 0x1a9   : > { %v4014_v35 = vpop.eup %2331  ;;  %2351 = vpow2.f32 %v1631_v58  ;;  %v1639_v55 = vmul.f32 1.442695, %v4574_v23  ;;  %v1691_v25 = vadd.f32 %v4007_v6, %v1690_v43  ;;  %v4576_v58 = vsub.f32 %v3655_v29, %v3741_v51 }
 0x1aa   : > { %v4019_v30 = vpop.eup %2333  ;;  %2353 = vpow2.f32 %v1633_v53  ;;  %v1641_v46 = vmul.f32 1.442695, %v4575_v2  ;;  %v1728_v54 = vadd.f32 %v4014_v35, %v1727_v31  ;;  %v4577_v53 = vsub.f32 %v3668_v24, %v3739_v44 }
 0x1ab   : > { %v4026_v17 = vpop.eup %2335  ;;  %2355 = vpow2.f32 %v1635_v33  ;;  %v1643_v28 = vmul.f32 1.442695, %v4576_v58  ;;  %v1692_v20 = vadd.f32 %v4019_v30, %v1691_v25  ;;  %v4578_v33 = vsub.f32 %v3671_v34, %v3741_v51 }
 0x1ac   : > { %v4031_v14 = vpop.eup %2337  ;;  %2357 = vpow2.f32 %v1637_v9  ;;  %v1645_v5 = vmul.f32 1.442695, %v4577_v53  ;;  %v1729_v43 = vadd.f32 %v4026_v17, %v1728_v54  ;;  %v4579_v9 = vsub.f32 %v3674_v39, %v3739_v44 }
 0x1ad   : > { %v4038_v23 = vpop.eup %2339  ;;  %2359 = vpow2.f32 %v1639_v55  ;;  %v1647_v31 = vmul.f32 1.442695, %v4578_v33  ;;  %v1693_v24 = vadd.f32 %v4031_v14, %v1692_v20  ;;  %v4580_v55 = vsub.f32 %v3677_v45, %v3741_v51 }
 0x1ae   : > { %v4043_v29 = vpop.eup %2341  ;;  %2361 = vpow2.f32 %v1641_v46  ;;  %v1649_v2 = vmul.f32 1.442695, %v4579_v9  ;;  %v1730_v25 = vadd.f32 %v4038_v23, %v1729_v43  ;;  %v4581_v46 = vsub.f32 %v3684_v3, %v3739_v44 }
 0x1af   : > { %v4050_v58 = vpop.eup %2343  ;;  %2363 = vpow2.f32 %v1643_v28  ;;  %v1651_v54 = vmul.f32 1.442695, %v4580_v55  ;;  %v1694_v39 = vadd.f32 %v4043_v29, %v1693_v24  ;;  %v4582_v28 = vsub.f32 %v3687_v59, %v3741_v51 }
 0x1b0   : > { %v4055_v34 = vpop.eup %2345  ;;  %2365 = vpow2.f32 %v1645_v5  ;;  %v1653_v53 = vmul.f32 1.442695, %v4581_v46  ;;  %v1731_v20 = vadd.f32 %v4050_v58, %v1730_v25  ;;  %v4583_v5 = vsub.f32 %v3690_v27, %v3739_v44 }
 0x1b1   : > { %v4062_v33 = vpop.eup %2347  ;;  %2367 = vpow2.f32 %v1647_v31  ;;  %v1655_v43 = vmul.f32 1.442695, %v4582_v28  ;;  %v1695_v3 = vadd.f32 %v4055_v34, %v1694_v39  ;;  %v4584_v31 = vsub.f32 %v3693_v15, %v3741_v51 }
 0x1b2   : > { %v4067_v45 = vpop.eup %2349  ;;  %2369 = vpow2.f32 %v1649_v2  ;;  %v1657_v9 = vmul.f32 1.442695, %v4583_v5  ;;  %v1732_v24 = vadd.f32 %v4062_v33, %v1731_v20  ;;  %v4585_v2 = vsub.f32 %v3700_v10, %v3739_v44 }
 0x1b3   : > { %v4074_v55 = vpop.eup %2351  ;;  %2371 = vpow2.f32 %v1651_v54  ;;  %v1659_v25 = vmul.f32 1.442695, %v4584_v31  ;;  %v1696_v27 = vadd.f32 %v4067_v45, %v1695_v3  ;;  %v4586_v54 = vsub.f32 %v3703_v1, %v3741_v51 }
 0x1b4   : > { %v4079_v59 = vpop.eup %2353  ;;  %2373 = vpow2.f32 %v1653_v53  ;;  %v1661_v46 = vmul.f32 1.442695, %v4585_v2  ;;  %v1733_v39 = vadd.f32 %v4074_v55, %v1732_v24  ;;  %v4587_v53 = vsub.f32 %v3706_v32, %v3739_v44 }
 0x1b5   : > { %v4086_v28 = vpop.eup %2355  ;;  %2375 = vpow2.f32 %v1655_v43  ;;  %v1663_v20 = vmul.f32 1.442695, %v4586_v54  ;;  %v1697_v10 = vadd.f32 %v4079_v59, %v1696_v27  ;;  %v4588_v43 = vsub.f32 %v3709_v26, %v3741_v51 }
 0x1b6   : > { %v4091_v15 = vpop.eup %2357  ;;  %2377 = vpow2.f32 %v1657_v9  ;;  %v1665_v5 = vmul.f32 1.442695, %v4587_v53  ;;  %v1734_v3 = vadd.f32 %v4086_v28, %v1733_v39  ;;  %v4589_v9 = vsub.f32 %v3724_v48, %v3739_v44 }
 0x1b7   : > { %v4098_v31 = vpop.eup %2359  ;;  %2379 = vpow2.f32 %v1659_v25  ;;  %v1667_v24 = vmul.f32 1.442695, %v4588_v43  ;;  %v1698_v32 = vadd.f32 %v4091_v15, %v1697_v10  ;;  %v4591_v25 = vsub.f32 %v3727_v12, %v3741_v51 }
 0x1b8   : > { %v4103_v1 = vpop.eup %2361  ;;  %2381 = vpow2.f32 %v1661_v46  ;;  %v1669_v2 = vmul.f32 1.442695, %v4589_v9  ;;  %v1735_v27 = vadd.f32 %v4098_v31, %v1734_v3  ;;  %v4593_v46 = vsub.f32 %v3730_v11, %v3739_v44 }
 0x1b9   : > { %v4110_v54 = vpop.eup %2363  ;;  %2383 = vpow2.f32 %v1663_v20  ;;  %v1671_v39 = vmul.f32 1.442695, %v4591_v25  ;;  %v1699_v48 = vadd.f32 %v4103_v1, %v1698_v32  ;;  %v4595_v20 = vsub.f32 %v3733_v61, %v3741_v51 }
 0x1ba   : > { %4590 = vst [vmem:[#allocation40_spill] sm:$0xff] %v4110_v54  ;;  %v4115_v26 = vpop.eup %2365  ;;  %2385 = vpow2.f32 %v1665_v5  ;;  %v1673_v53 = vmul.f32 1.442695, %v4593_v46  ;;  %v1736_v10 = vadd.f32 %v4110_v54, %v1735_v27 }
 0x1bb   : > { %4592 = vst [vmem:[#allocation41_spill] sm:$0xff] %v4115_v26  ;;  %v4122_v43 = vpop.eup %2367  ;;  %2387 = vpow2.f32 %v1667_v24  ;;  %v1675_v3 = vmul.f32 1.442695, %v4595_v20  ;;  %v1700_v5 = vadd.f32 %v4115_v26, %v1699_v48 }
 0x1bc   : > { %4594 = vst [vmem:[#allocation26_spill] sm:$0xff] %v4122_v43  ;;  %v4127_v12 = vpop.eup %2369  ;;  %2389 = vpow2.f32 %v1669_v2  ;;  %v1737_v9 = vadd.f32 %v4122_v43, %v1736_v10 }
 0x1bd   : > { %4596 = vst [vmem:[#allocation27_spill] sm:$0xff] %v4127_v12  ;;  %v4131_v11 = vpop.eup %2371  ;;  %2391 = vpow2.f32 %v1671_v39  ;;  %v1701_v32 = vadd.f32 %v4127_v12, %v1700_v5 }
 0x1be   : > { %4597 = vst [vmem:[#allocation28_spill] sm:$0xff] %v4131_v11  ;;  %v4133_v44 = vpop.eup %2373  ;;  %2393 = vpow2.f32 %v1673_v53  ;;  %v1738_v24 = vadd.f32 %v4131_v11, %v1737_v9 }
 0x1bf   : > { %4598 = vst [vmem:[#allocation29_spill] sm:$0xff] %v4133_v44  ;;  %v4137_v27 = vpop.eup %2375  ;;  %2395 = vpow2.f32 %v1675_v3  ;;  %v1702_v51 = vadd.f32 %v4133_v44, %v1701_v32 }
 0x1c0   : > { %4599 = vst [vmem:[#allocation30_spill] sm:$0xff] %v4137_v27  ;;  %v4139_v61 = vpop.eup %2377  ;;  %v1739_v2 = vadd.f32 %v4137_v27, %v1738_v24 }
 0x1c1   : > { %4600 = vst [vmem:[#allocation31_spill] sm:$0xff] %v4139_v61  ;;  %v4143_v25 = vpop.eup %2379  ;;  %v1703_v39 = vadd.f32 %v4139_v61, %v1702_v51 }
 0x1c2   : > { %4601 = vst [vmem:[#allocation32_spill] sm:$0xff] %v4143_v25  ;;  %v4145_v46 = vpop.eup %2381  ;;  %v1740_v53 = vadd.f32 %v4143_v25, %v1739_v2 }
 0x1c3   : > { %4602 = vst [vmem:[#allocation33_spill] sm:$0xff] %v4145_v46  ;;  %v4149_v48 = vpop.eup %2383  ;;  %v1704_v20 = vadd.f32 %v4145_v46, %v1703_v39 }
 0x1c4   : > { %4603 = vst [vmem:[#allocation34_spill] sm:$0xff] %v4149_v48  ;;  %v4151_v10 = vpop.eup %2385  ;;  %v1741_v3 = vadd.f32 %v4149_v48, %v1740_v53 }
 0x1c5   : > { %4604 = vst [vmem:[#allocation35_spill] sm:$0xff] %v4151_v10  ;;  %v4155_v5 = vpop.eup %2387  ;;  %v1705_v32 = vadd.f32 %v4151_v10, %v1704_v20 }
 0x1c6   : > { %4605 = vst [vmem:[#allocation36_spill] sm:$0xff] %v4155_v5  ;;  %v4157_v9 = vpop.eup %2389  ;;  %v1742_v24 = vadd.f32 %v4155_v5, %v1741_v3 }
 0x1c7   : > { %v4161_v27 = vpop.eup %2391  ;;  %v1706_v2 = vadd.f32 %v4157_v9, %v1705_v32 }
 0x1c8   : > { %v2394_v51 = vpop.eup %2393  ;;  %v1743_v25 = vadd.f32 %v4161_v27, %v1742_v24 }
 0x1c9   : > { %v2396_v61 = vpop.eup %2395  ;;  %v1707_v44 = vadd.f32 %v2394_v51, %v1706_v2 }
 0x1ca   : > { %v1744_v39 = vadd.f32 %v2396_v61, %v1743_v25 }
 0x1cb   : > { %v1708_v53 = vrot.slane %v1707_v44, 4 }
 0x1cc   : > { %v1745_v48 = vrot.slane %v1744_v39, 4 }
 0x1cd   : > { %v1709_v46 = vadd.f32 %v1708_v53, %v1707_v44 }
 0x1ce   : > { %v1746_v11 = vadd.f32 %v1745_v48, %v1744_v39 }
 0x1cf   : > { %v1710_v12 = vrot.slane %v1709_v46, 2 }
 0x1d0   : > { %v1747_v20 = vrot.slane %v1746_v11, 2 }
 0x1d1   : > { %v1711_v10 = vadd.f32 %v1710_v12, %v1709_v46 }
 0x1d2   : > { %v1748_v3 = vadd.f32 %v1747_v20, %v1746_v11 }
 0x1d3   : > { %v1712_v5 = vrot.slane %v1711_v10, 1 }
 0x1d4   : > { %v1749_v43 = vrot.slane %v1748_v3, 1 }
 0x1d5   : > { %v1713_v26 = vadd.f32 %v1712_v5, %v1711_v10 }
 0x1d6   : > { %v1750_v54 = vadd.f32 %v1749_v43, %v1748_v3 }
 0x1d7   : > { %2397 = vrcp.f32 %v1713_v26 }
 0x1d8   : > { %2399 = vrcp.f32 %v1750_v54 }
 0x1e1   : > { %v2398_v32 = vpop.eup %2397 }
 0x1e2   : > { %v2400_v24 = vpop.eup %2399  ;;  %v1753_v25 = vmul.f32 %v2398_v32, %v1713_v26 }
 0x1e3   : > { %v1754_v2 = vmul.f32 %v2400_v24, %v1750_v54 }
 0x1e4   : > { %v1755_v44 = vsub.f32 2.0, %v1753_v25 }
 0x1e5   : > { %v1756_v48 = vsub.f32 2.0, %v1754_v2 }
 0x1e6   : > { %v4168_v39 = vmul.f32 %v2398_v32, %v1755_v44 }
 0x1e7   : > { %v4170_v53 = vmul.f32 %v2400_v24, %v1756_v48 }
 0x1e8   : > { %v1821_v12 = vmul.f32 %v2394_v51, %v4168_v39  ;;  %v1759_v43 = vmul.f32 %v3843_v40, %v4168_v39  ;;  %v1761_v11 = vmul.f32 %v3847_v56, %v4168_v39  ;;  %v1763_v26 = vmul.f32 %v3863_v7, %v4168_v39  ;;  %v4609_v51 = vld [vmem:[#allocation24_spill] sm:$0xff] }
 0x1e9   : > { %v1822_v54 = vmul.f32 %v2396_v61, %v4170_v53  ;;  %v1760_v46 = vmul.f32 %v3845_v18, %v4170_v53  ;;  %v1762_v10 = vmul.f32 %v3852_v50, %v4170_v53  ;;  %v1764_v5 = vmul.f32 %v3872_v62, %v4170_v53  ;;  %v4606_v62 = vld [vmem:[#allocation21_spill] sm:$0xff]  ;;  %v4608_v61 = vld [vmem:[#allocation23_spill] sm:$0xff] }
 0x1ea   : > { %1885 = vst [vmem:[%s4186_s21 + $0x1f0] sm:$0xff] %v1821_v12  ;;  %v1765_v40 = vmul.f32 %v3879_v19, %v4168_v39  ;;  %v1766_v18 = vmul.f32 %v3886_v22, %v4170_v53  ;;  %v1767_v56 = vmul.f32 %v3895_v21, %v4168_v39  ;;  %v1768_v50 = vmul.f32 %v3902_v36, %v4170_v53  ;;  %v4607_v22 = vld [vmem:[#allocation22_spill] sm:$0xff] }
 0x1eb   : > { %1823 = vst [vmem:[%s4186_s21] sm:$0xff] %v1759_v43  ;;  %1825 = vst [vmem:[%s4186_s21 + $0x10] sm:$0xff] %v1761_v11  ;;  %v1769_v7 = vmul.f32 %v3911_v63, %v4168_v39  ;;  %v1770_v19 = vmul.f32 %v4606_v62, %v4170_v53  ;;  %v1771_v21 = vmul.f32 %v4607_v22, %v4168_v39  ;;  %v4610_v63 = vld [vmem:[#allocation25_spill] sm:$0xff]  ;;  %v4614_v43 = vld [vmem:[#allocation27_spill] sm:$0xff] }
 0x1ec   : > { %1827 = vst [vmem:[%s4186_s21 + $0x20] sm:$0xff] %v1763_v26  ;;  %1886 = vst [vmem:[%s4186_s21 + $0x1f8] sm:$0xff] %v1822_v54  ;;  %v1772_v36 = vmul.f32 %v4608_v61, %v4170_v53  ;;  %v1773_v20 = vmul.f32 %v4609_v51, %v4168_v39  ;;  %v1774_v3 = vmul.f32 %v4610_v63, %v4170_v53  ;;  %v4615_v11 = vld [vmem:[#allocation28_spill] sm:$0xff]  ;;  %v4616_v54 = vld [vmem:[#allocation29_spill] sm:$0xff] }
 0x1ed   : > { %1824 = vst [vmem:[%s4186_s21 + $0x8] sm:$0xff] %v1760_v46  ;;  %1826 = vst [vmem:[%s4186_s21 + $0x18] sm:$0xff] %v1762_v10  ;;  %v1775_v32 = vmul.f32 %v3941_v8, %v4168_v39  ;;  %v1776_v24 = vmul.f32 %v3945_v0, %v4170_v53  ;;  %v1777_v25 = vmul.f32 %v3951_v60, %v4168_v39  ;;  %v4617_v10 = vld [vmem:[#allocation30_spill] sm:$0xff] }
 0x1ee   : > { %1828 = vst [vmem:[%s4186_s21 + $0x28] sm:$0xff] %v1764_v5  ;;  %1829 = vst [vmem:[%s4186_s21 + $0x30] sm:$0xff] %v1765_v40  ;;  %v1778_v2 = vmul.f32 %v3955_v16, %v4170_v53  ;;  %v1779_v8 = vmul.f32 %v3959_v57, %v4168_v39  ;;  %v1780_v0 = vmul.f32 %v3963_v41, %v4170_v53  ;;  %v4618_v40 = vld [vmem:[#allocation31_spill] sm:$0xff] }
 0x1ef   : > { %1830 = vst [vmem:[%s4186_s21 + $0x38] sm:$0xff] %v1766_v18  ;;  %1831 = vst [vmem:[%s4186_s21 + $0x40] sm:$0xff] %v1767_v56  ;;  %v1781_v60 = vmul.f32 %v3965_v52, %v4168_v39  ;;  %v1782_v16 = vmul.f32 %v3969_v38, %v4170_v53  ;;  %v1783_v57 = vmul.f32 %v3971_v42, %v4168_v39  ;;  %v4619_v56 = vld [vmem:[#allocation32_spill] sm:$0xff] }
 0x1f0   : > { %1832 = vst [vmem:[%s4186_s21 + $0x48] sm:$0xff] %v1768_v50  ;;  %1833 = vst [vmem:[%s4186_s21 + $0x50] sm:$0xff] %v1769_v7  ;;  %v1784_v41 = vmul.f32 %v3978_v49, %v4170_v53  ;;  %v1785_v52 = vmul.f32 %v3983_v47, %v4168_v39  ;;  %v1786_v38 = vmul.f32 %v3990_v4, %v4170_v53  ;;  %v4620_v7 = vld [vmem:[#allocation33_spill] sm:$0xff] }
 0x1f1   : > { %1834 = vst [vmem:[%s4186_s21 + $0x58] sm:$0xff] %v1770_v19  ;;  %1835 = vst [vmem:[%s4186_s21 + $0x60] sm:$0xff] %v1771_v21  ;;  %v1787_v42 = vmul.f32 %v3995_v37, %v4168_v39  ;;  %v1788_v49 = vmul.f32 %v4002_v13, %v4170_v53  ;;  %v1789_v47 = vmul.f32 %v4007_v6, %v4168_v39  ;;  %v4621_v19 = vld [vmem:[#allocation34_spill] sm:$0xff]  ;;  %v4622_v21 = vld [vmem:[#allocation35_spill] sm:$0xff] }
 0x1f2   : > { %1836 = vst [vmem:[%s4186_s21 + $0x68] sm:$0xff] %v1772_v36  ;;  %1837 = vst [vmem:[%s4186_s21 + $0x70] sm:$0xff] %v1773_v20  ;;  %v1790_v4 = vmul.f32 %v4014_v35, %v4170_v53  ;;  %v1791_v37 = vmul.f32 %v4019_v30, %v4168_v39  ;;  %v1792_v13 = vmul.f32 %v4026_v17, %v4170_v53  ;;  %v4623_v36 = vld [vmem:[#allocation36_spill] sm:$0xff] }
 0x1f3   : > { %1838 = vst [vmem:[%s4186_s21 + $0x78] sm:$0xff] %v1774_v3  ;;  %1839 = vst [vmem:[%s4186_s21 + $0x80] sm:$0xff] %v1775_v32  ;;  %v1793_v6 = vmul.f32 %v4031_v14, %v4168_v39  ;;  %v1794_v35 = vmul.f32 %v4038_v23, %v4170_v53  ;;  %v1795_v30 = vmul.f32 %v4043_v29, %v4168_v39 }
 0x1f4   : > { %1840 = vst [vmem:[%s4186_s21 + $0x88] sm:$0xff] %v1776_v24  ;;  %1841 = vst [vmem:[%s4186_s21 + $0x90] sm:$0xff] %v1777_v25  ;;  %v1796_v17 = vmul.f32 %v4050_v58, %v4170_v53  ;;  %v1797_v14 = vmul.f32 %v4055_v34, %v4168_v39  ;;  %v1798_v23 = vmul.f32 %v4062_v33, %v4170_v53 }
 0x1f5   : > { %1842 = vst [vmem:[%s4186_s21 + $0x98] sm:$0xff] %v1778_v2  ;;  %1843 = vst [vmem:[%s4186_s21 + $0xa0] sm:$0xff] %v1779_v8  ;;  %v1799_v29 = vmul.f32 %v4067_v45, %v4168_v39  ;;  %v1800_v58 = vmul.f32 %v4074_v55, %v4170_v53  ;;  %v1801_v34 = vmul.f32 %v4079_v59, %v4168_v39 }
 0x1f6   : > { %1844 = vst [vmem:[%s4186_s21 + $0xa8] sm:$0xff] %v1780_v0  ;;  %1845 = vst [vmem:[%s4186_s21 + $0xb0] sm:$0xff] %v1781_v60  ;;  %v1802_v33 = vmul.f32 %v4086_v28, %v4170_v53  ;;  %v1803_v45 = vmul.f32 %v4091_v15, %v4168_v39  ;;  %v1804_v55 = vmul.f32 %v4098_v31, %v4170_v53  ;;  %v4611_v28 = vld [vmem:[#allocation40_spill] sm:$0xff]  ;;  %v4612_v15 = vld [vmem:[#allocation41_spill] sm:$0xff] }
 0x1f7   : > { %1846 = vst [vmem:[%s4186_s21 + $0xb8] sm:$0xff] %v1782_v16  ;;  %1847 = vst [vmem:[%s4186_s21 + $0xc0] sm:$0xff] %v1783_v57  ;;  %v1805_v59 = vmul.f32 %v4103_v1, %v4168_v39  ;;  %v1806_v44 = vmul.f32 %v4611_v28, %v4170_v53  ;;  %v1807_v48 = vmul.f32 %v4612_v15, %v4168_v39  ;;  %v4613_v31 = vld [vmem:[#allocation26_spill] sm:$0xff] }
 0x1f8   : > { %1848 = vst [vmem:[%s4186_s21 + $0xc8] sm:$0xff] %v1784_v41  ;;  %1849 = vst [vmem:[%s4186_s21 + $0xd0] sm:$0xff] %v1785_v52  ;;  %v1808_v12 = vmul.f32 %v4613_v31, %v4170_v53  ;;  %v1809_v1 = vmul.f32 %v4614_v43, %v4168_v39  ;;  %v1810_v26 = vmul.f32 %v4615_v11, %v4170_v53 }
 0x1f9   : > { %1850 = vst [vmem:[%s4186_s21 + $0xd8] sm:$0xff] %v1786_v38  ;;  %1851 = vst [vmem:[%s4186_s21 + $0xe0] sm:$0xff] %v1787_v42  ;;  %v1811_v46 = vmul.f32 %v4616_v54, %v4168_v39  ;;  %v1812_v5 = vmul.f32 %v4617_v10, %v4170_v53  ;;  %v1813_v18 = vmul.f32 %v4618_v40, %v4168_v39 }
 0x1fa   : > { %1852 = vst [vmem:[%s4186_s21 + $0xe8] sm:$0xff] %v1788_v49  ;;  %1853 = vst [vmem:[%s4186_s21 + $0xf0] sm:$0xff] %v1789_v47  ;;  %v1814_v50 = vmul.f32 %v4619_v56, %v4170_v53  ;;  %v1815_v62 = vmul.f32 %v4620_v7, %v4168_v39  ;;  %v1816_v22 = vmul.f32 %v4621_v19, %v4170_v53 }
 0x1fb   : > { %1854 = vst [vmem:[%s4186_s21 + $0xf8] sm:$0xff] %v1790_v4  ;;  %1855 = vst [vmem:[%s4186_s21 + $0x100] sm:$0xff] %v1791_v37  ;;  %v1817_v61 = vmul.f32 %v4622_v21, %v4168_v39  ;;  %v1818_v51 = vmul.f32 %v4623_v36, %v4170_v53  ;;  %v1819_v20 = vmul.f32 %v4157_v9, %v4168_v39 }
 0x1fc   : > { %1856 = vst [vmem:[%s4186_s21 + $0x108] sm:$0xff] %v1792_v13  ;;  %1857 = vst [vmem:[%s4186_s21 + $0x110] sm:$0xff] %v1793_v6  ;;  %v1820_v63 = vmul.f32 %v4161_v27, %v4170_v53 }
 0x1fd   : > { %1858 = vst [vmem:[%s4186_s21 + $0x118] sm:$0xff] %v1794_v35  ;;  %1859 = vst [vmem:[%s4186_s21 + $0x120] sm:$0xff] %v1795_v30 }
 0x1fe   : > { %1860 = vst [vmem:[%s4186_s21 + $0x128] sm:$0xff] %v1796_v17  ;;  %1861 = vst [vmem:[%s4186_s21 + $0x130] sm:$0xff] %v1797_v14 }
 0x1ff   : > { %1862 = vst [vmem:[%s4186_s21 + $0x138] sm:$0xff] %v1798_v23  ;;  %1863 = vst [vmem:[%s4186_s21 + $0x140] sm:$0xff] %v1799_v29 }
 0x200   : > { %1864 = vst [vmem:[%s4186_s21 + $0x148] sm:$0xff] %v1800_v58  ;;  %1865 = vst [vmem:[%s4186_s21 + $0x150] sm:$0xff] %v1801_v34 }
 0x201   : > { %1866 = vst [vmem:[%s4186_s21 + $0x158] sm:$0xff] %v1802_v33  ;;  %1867 = vst [vmem:[%s4186_s21 + $0x160] sm:$0xff] %v1803_v45 }
 0x202   : > { %1868 = vst [vmem:[%s4186_s21 + $0x168] sm:$0xff] %v1804_v55  ;;  %1869 = vst [vmem:[%s4186_s21 + $0x170] sm:$0xff] %v1805_v59 }
 0x203   : > { %1870 = vst [vmem:[%s4186_s21 + $0x178] sm:$0xff] %v1806_v44  ;;  %1871 = vst [vmem:[%s4186_s21 + $0x180] sm:$0xff] %v1807_v48 }
 0x204   : > { %1872 = vst [vmem:[%s4186_s21 + $0x188] sm:$0xff] %v1808_v12  ;;  %1873 = vst [vmem:[%s4186_s21 + $0x190] sm:$0xff] %v1809_v1 }
 0x205   : > { %1874 = vst [vmem:[%s4186_s21 + $0x198] sm:$0xff] %v1810_v26  ;;  %1875 = vst [vmem:[%s4186_s21 + $0x1a0] sm:$0xff] %v1811_v46 }
 0x206   : > { %1876 = vst [vmem:[%s4186_s21 + $0x1a8] sm:$0xff] %v1812_v5  ;;  %1877 = vst [vmem:[%s4186_s21 + $0x1b0] sm:$0xff] %v1813_v18 }
 0x207   : > { %1878 = vst [vmem:[%s4186_s21 + $0x1b8] sm:$0xff] %v1814_v50  ;;  %1879 = vst [vmem:[%s4186_s21 + $0x1c0] sm:$0xff] %v1815_v62 }
 0x208   : > { %1880 = vst [vmem:[%s4186_s21 + $0x1c8] sm:$0xff] %v1816_v22  ;;  %1881 = vst [vmem:[%s4186_s21 + $0x1d0] sm:$0xff] %v1817_v61 }
 0x209   : > { %1882 = vst [vmem:[%s4186_s21 + $0x1d8] sm:$0xff] %v1818_v51  ;;  %1883 = vst [vmem:[%s4186_s21 + $0x1e0] sm:$0xff] %v1819_v20 }
 0x20a   : > { %1884 = vst [vmem:[%s4186_s21 + $0x1e8] sm:$0xff] %v1820_v63 }
 0x20b   : > { %2474 = shalt.err (!%p2471_p0)
}
 0x20c   : > { %s2475_s5 = scalar_lea.hbm %s4349_s22, 8192  ;;  %s2479_s11 = scalar_lea.hbm %s4429_s8, 16384 }
 0x20d   : > { %p2476_p2 = scmp.ne.s32.totalorder %s4349_s22, %s2475_s5  ;;  %p2480_p6 = scmp.lt.u32.totalorder %s4349_s22, %s4429_s8 }
 0x20e   : > { %p2481_p7 = scmp.lt.u32.totalorder %s2479_s11, %s2475_s5  ;;  %p2483_p1 = scmp.lt.u32.totalorder %s2475_s5, %s4349_s22 }
 0x20f   : > { %p2477_p3 = pnand %p2476_p2, %p4624_p9 }
 0x210   : > { %p2482_p13 = por %p2481_p7, %p2480_p6 }
 0x211   : > { %p2478_p5 = pneg %p2477_p3 }
 0x212   : > { %p2484_p8 = por %p2483_p1, %p2482_p13 }
 0x214   : > { %p2485_p12 = pnand %p2484_p8, %p2478_p5 }
 0x216   : > { %2488 = shalt.err (!%p2485_p12)
}
 0x217   : > { %s2560_s23 = smov 256   ;;  %s2561_s27 = smov 16  }
 0x218   : > { %2141 = dma.vmem_to_hbm [thread:$0]  (%p4624_p9), %s4351_s13, 8192, %s4349_s22, %s4375_s24, %s2560_s23, %s2560_s23, %s2561_s27  }
 0x219 PF: > { %s4625_s17 = sld [smem:[#allocation15_spill]]  ;;  %s4626_s7 = sld [smem:[#allocation19_spill]] }
 0x21a   : > { %p2168_p4 = scmp.ge.s32.totalorder %s2551_s10, 2 }
 0x21f   : > { %s1918_s9 = sand.u32 1, %s4625_s17   ;;  %p4627_p10 = scmp.ne.s32.totalorder %s4626_s7, 0 }
 0x220   : > { %s1919_s19 = scalar_lea.sflag [#allocation3], %s1918_s9 }
 0x221   : > { %p2157_p11 = pnand %p2168_p4, %p4627_p10 }
 0x223   : > { %2526 = dma.done.wait (!%p2157_p11), %s1919_s19, 8192  }
 0x224   : > { %2528 = vsyncadd (!%p2157_p11), %s1919_s19, 4294959104  ;;  %s24_s10 = sadd.s32 1, %s2551_s10   ;;  %s4628_s20 = sld [smem:[#allocation16_spill]] }
 0x225   : > { %p21_p0 = scmp.ge.s32.totalorder %s24_s10, 4   ;;  %s4629_s29 = sld [smem:[#allocation20_spill]] }
 0x226   : > { %s4630_s30 = sld [smem:[#allocation17_spill]]  ;;  %s4631_s9 = sld [smem:[#allocation18_spill]] }
 0x227   : > { %s4632_s27 = smov %s2535_s28  ;;  %23 = sbr.rel (!%p21_p0) target bundleno = 13 (0xd), region = 113 }
 0x22a   : > { %s4633_s28 = smov %s4628_s20 }
 0x22e   :  { %1924 = vsyncpa [#allocation3], 1 }
 0x22f   :  { %1926 = vsyncpa [#allocation3 + $0x1], 1 }
 0x230   :  { %1927 = vsyncpa [#allocation4], 1 }
 0x231   :  { %1929 = vsyncpa [#allocation4 + $0x1], 1 }
 0x232   :  { %1930 = vsyncpa [#allocation6], 1 }
 0x233   :  { %1931 = vsyncpa [#allocation9], 1 }

</bundles_post_ra>
